<compile_context>
chip_gen: v7x
topology: tpu7x:2x2x1
jax: 0.10.0
libtpu: 0.0.40
codegen_flags: <defaults>
</compile_context>

<pallas_src>
import functools

import jax
import jax.numpy as jnp
from jax.experimental import pallas as pl
from jax.experimental.pallas import tpu as pltpu


# ----------------------------------------------------------------------------
# Tiling / footprint helpers
# ----------------------------------------------------------------------------
_VMEM_BUDGET = 10 << 20   # conservative: fits v5e's 16 MiB default scoped VMEM


def _pick_tm(M, K, N, cap=512, budget_bytes=_VMEM_BUDGET):
    """Row tile for the tiled matmul path: full-extent block for small M (always
    legal), else a multiple of 8 whose double-buffered bf16 patch tile + f32/bf16
    output tile + resident weights stay under the (v5e-safe) VMEM budget."""
    if M <= cap:
        return M

    def footprint(t):
        return 2 * t * K * 2 + 2 * t * max(N, 128) * 4 + K * N * 2

    tm = cap
    while tm > 64 and footprint(tm) > budget_bytes:
        tm //= 2
    return tm


def _pick_tm_elementwise(M, C, cap=2048, budget_bytes=_VMEM_BUDGET):
    """Row tile for the pure elementwise BN-apply fallback (HBM-bandwidth bound:
    only the double-buffered bf16 in/out tiles count — no phantom weight term)."""
    if M <= cap:
        return M

    def footprint(t):
        return 2 * t * C * 2 * 2

    tm = cap
    while tm > 128 and footprint(tm) > budget_bytes:
        tm //= 2
    return tm


def _fused_fits(M, K, N, budget_bytes=_VMEM_BUDGET):
    """Can the whole [M,K]x[K,N] conv (+ f32 acc + bf16 out) live in one tile?"""
    fp = 2 * (M * K * 2 + K * N * 2) + M * N * 4 + M * N * 2
    return fp <= budget_bytes


# ----------------------------------------------------------------------------
# Pallas kernels
# ----------------------------------------------------------------------------
def _conv_bias_act_kernel(p_ref, w_ref, b_ref, o_ref, *, act, alpha):
    """One row tile: out = act(patches @ w + b); bf16 operands, f32 accumulate."""
    acc = jnp.dot(p_ref[...], w_ref[...], preferred_element_type=jnp.float32)
    acc = acc + b_ref[...]                       # (1, N) broadcast
    if act == "leaky":
        acc = jnp.where(acc > 0, acc, alpha * acc)
    o_ref[...] = acc.astype(o_ref.dtype)


def _conv_bn_leaky_kernel(p_ref, w_ref, g_ref, be_ref, o_ref, *, alpha, eps):
    """Single-tile fused Conv (bias cancelled by BN) + BatchNorm over the batch
    (two-pass f32 variance) + LeakyReLU."""
    acc = jnp.dot(p_ref[...], w_ref[...], preferred_element_type=jnp.float32)
    m = acc.shape[0]
    mean = jnp.sum(acc, axis=0, keepdims=True) * (1.0 / m)
    cen = acc - mean
    var = jnp.sum(cen * cen, axis=0, keepdims=True) * (1.0 / m)
    inv = jax.lax.rsqrt(var + eps)
    z = cen * (g_ref[...] * inv) + be_ref[...]
    o_ref[...] = jnp.where(z > 0, z, alpha * z).astype(o_ref.dtype)


def _conv_bn_leaky_head_kernel(p_ref, w_ref, g_ref, be_ref, w4_ref, pool_ref,
                               b4_ref, o_ref, *, alpha, eps):
    """Layer-3 conv + BN + LeakyReLU fused with the Conv2d(256,1,k=4)+Sigmoid
    head.  Head contraction = VPU multiply by tiled head weights, then a small
    lane-dense pooling matmul (B x M3 @ M3 x 256) + lane reduce; avoids an N=1
    MXU matmul and any extra HBM round trip."""
    acc = jnp.dot(p_ref[...], w_ref[...], preferred_element_type=jnp.float32)
    m = acc.shape[0]
    mean = jnp.sum(acc, axis=0, keepdims=True) * (1.0 / m)
    cen = acc - mean
    var = jnp.sum(cen * cen, axis=0, keepdims=True) * (1.0 / m)
    inv = jax.lax.rsqrt(var + eps)
    z = cen * (g_ref[...] * inv) + be_ref[...]
    z = jnp.where(z > 0, z, alpha * z)                        # (M3, 256) f32

    t = z * w4_ref[...].astype(jnp.float32)                   # head weights
    pooled = jnp.dot(pool_ref[...].astype(jnp.float32), t,
                     preferred_element_type=jnp.float32)      # (B, 256)
    logit = jnp.sum(pooled, axis=1, keepdims=True) + b4_ref[...]   # (B, 1)
    o_ref[...] = jax.nn.sigmoid(logit).astype(o_ref.dtype)


# --- large-batch fallback kernels (tiled, proven path) -----------------------
def _conv_stats_kernel(p_ref, w_ref, o_ref, s_ref, *, m_total, need_mask):
    """One row tile: out = patches @ w plus per-tile per-channel (sum, sum_sq)."""
    acc = jnp.dot(p_ref[...], w_ref[...], preferred_element_type=jnp.float32)
    o_ref[...] = acc.astype(o_ref.dtype)
    if need_mask:   # only compiled in when M % tm != 0 (edge-tile padding rows)
        tm = acc.shape[0]
        rows = (jax.lax.broadcasted_iota(jnp.int32, (tm, 1), 0)
                + pl.program_id(0) * tm)
        acc = jnp.where(rows < m_total, acc, 0.0)
    s = jnp.sum(acc, axis=0, keepdims=True)
    ss = jnp.sum(acc * acc, axis=0, keepdims=True)
    s_ref[0, :, :] = jnp.concatenate([s, ss], axis=0)         # (2, N)


def _bn_apply_kernel(y_ref, sc_ref, sh_ref, o_ref, *, alpha):
    z = y_ref[...].astype(jnp.float32) * sc_ref[...] + sh_ref[...]
    o_ref[...] = jnp.where(z > 0, z, alpha * z).astype(o_ref.dtype)


# ----------------------------------------------------------------------------
# pallas_call wrappers
# ----------------------------------------------------------------------------
def conv_bias_act(patches, w, b, *, act="leaky", alpha=0.2,
                  out_dtype=jnp.bfloat16):
    """patches [M, K] bf16, w [K, N] bf16, b [N] f32 -> act(p@w + b) [M, N]."""
    M, K = patches.shape
    _, N = w.shape
    tm = _pick_tm(M, K, N)
    kern = functools.partial(_conv_bias_act_kernel, act=act, alpha=alpha)
    return pl.pallas_call(
        kern,
        out_shape=jax.ShapeDtypeStruct((M, N), out_dtype),
        grid=(pl.cdiv(M, tm),),
        in_specs=[
            pl.BlockSpec((tm, K), lambda i: (i, 0)),
            pl.BlockSpec((K, N), lambda i: (0, 0)),
            pl.BlockSpec((1, N), lambda i: (0, 0)),
        ],
        out_specs=pl.BlockSpec((tm, N), lambda i: (i, 0)),
        compiler_params=pltpu.CompilerParams(dimension_semantics=("parallel",)),
    )(patches, w, b.reshape(1, N))


def conv_bn_leaky(patches, w, gamma, beta, *, alpha=0.2, eps=1e-5,
                  out_dtype=jnp.bfloat16):
    """Fused conv + BatchNorm(batch stats) + LeakyReLU; single-tile kernel when
    it fits VMEM, otherwise the tiled 2-pass fallback."""
    M, K = patches.shape
    _, N = w.shape
    if not _fused_fits(M, K, N):
        return _conv_bn_leaky_tiled(patches, w, gamma, beta, alpha=alpha,
                                    eps=eps, out_dtype=out_dtype)
    kern = functools.partial(_conv_bn_leaky_kernel, alpha=alpha, eps=eps)
    return pl.pallas_call(
        kern,
        out_shape=jax.ShapeDtypeStruct((M, N), out_dtype),
        grid=(1,),
        in_specs=[
            pl.BlockSpec((M, K), lambda i: (0, 0)),
            pl.BlockSpec((K, N), lambda i: (0, 0)),
            pl.BlockSpec((1, N), lambda i: (0, 0)),
            pl.BlockSpec((1, N), lambda i: (0, 0)),
        ],
        out_specs=pl.BlockSpec((M, N), lambda i: (0, 0)),
        compiler_params=pltpu.CompilerParams(dimension_semantics=("arbitrary",)),
    )(patches, w, gamma.reshape(1, N), beta.reshape(1, N))


def conv_bn_leaky_sigmoid_head(patches, w3, gamma, beta, w4_tiled, pool, b4,
                               *, alpha=0.2, eps=1e-5):
    """Layer-3 conv+BN+LeakyReLU fused with the 256->1 conv + sigmoid head."""
    M, K = patches.shape
    _, N = w3.shape
    B = pool.shape[0]
    kern = functools.partial(_conv_bn_leaky_head_kernel, alpha=alpha, eps=eps)
    return pl.pallas_call(
        kern,
        out_shape=jax.ShapeDtypeStruct((B, 1), jnp.float32),
        grid=(1,),
        in_specs=[
            pl.BlockSpec((M, K), lambda i: (0, 0)),
            pl.BlockSpec((K, N), lambda i: (0, 0)),
            pl.BlockSpec((1, N), lambda i: (0, 0)),
            pl.BlockSpec((1, N), lambda i: (0, 0)),
            pl.BlockSpec((M, N), lambda i: (0, 0)),
            pl.BlockSpec((B, M), lambda i: (0, 0)),
            pl.BlockSpec((1, 1), lambda i: (0, 0)),
        ],
        out_specs=pl.BlockSpec((B, 1), lambda i: (0, 0)),
        compiler_params=pltpu.CompilerParams(dimension_semantics=("arbitrary",)),
    )(patches, w3, gamma.reshape(1, N), beta.reshape(1, N),
      w4_tiled, pool, b4.reshape(1, 1))


def _conv_bn_leaky_tiled(patches, w, gamma, beta, *, alpha, eps, out_dtype):
    """Large-batch fallback: tiled conv + masked partial stats, tiny XLA
    finalize, tiled affine+LeakyReLU apply."""
    M, K = patches.shape
    _, N = w.shape
    tm = _pick_tm(M, K, N)
    grid_m = pl.cdiv(M, tm)
    kern = functools.partial(_conv_stats_kernel, m_total=M,
                             need_mask=(M % tm) != 0)
    y, stats = pl.pallas_call(
        kern,
        out_shape=(jax.ShapeDtypeStruct((M, N), out_dtype),
                   jax.ShapeDtypeStruct((grid_m, 2, N), jnp.float32)),
        grid=(grid_m,),
        in_specs=[
            pl.BlockSpec((tm, K), lambda i: (i, 0)),
            pl.BlockSpec((K, N), lambda i: (0, 0)),
        ],
        out_specs=(
            pl.BlockSpec((tm, N), lambda i: (i, 0)),
            pl.BlockSpec((1, 2, N), lambda i: (i, 0, 0)),
        ),
        compiler_params=pltpu.CompilerParams(dimension_semantics=("parallel",)),
    )(patches, w)

    s = jnp.sum(stats[:, 0, :], axis=0)
    ss = jnp.sum(stats[:, 1, :], axis=0)
    mean = s / M
    var = jnp.maximum(ss / M - mean * mean, 0.0)   # biased variance (train mode)
    inv = jax.lax.rsqrt(var + eps)
    scale = gamma * inv
    shift = beta - mean * scale

    tm2 = _pick_tm_elementwise(M, N)
    kern2 = functools.partial(_bn_apply_kernel, alpha=alpha)
    return pl.pallas_call(
        kern2,
        out_shape=jax.ShapeDtypeStruct((M, N), out_dtype),
        grid=(pl.cdiv(M, tm2),),
        in_specs=[
            pl.BlockSpec((tm2, N), lambda i: (i, 0)),
            pl.BlockSpec((1, N), lambda i: (0, 0)),
            pl.BlockSpec((1, N), lambda i: (0, 0)),
        ],
        out_specs=pl.BlockSpec((tm2, N), lambda i: (i, 0)),
        compiler_params=pltpu.CompilerParams(dimension_semantics=("parallel",)),
    )(y, scale.reshape(1, N), shift.reshape(1, N))


# ----------------------------------------------------------------------------
# Glue: im2col (plain JAX), parameter init, forward pass
# ----------------------------------------------------------------------------
def im2col(x_nhwc, kh, kw, stride, pad):
    """x: [B, H, W, C] -> ([B*Ho*Wo, kh*kw*C], (B, Ho, Wo)); patch channel
    ordering (i, j, c) matches the (kh, kw, Cin, Cout) weight flattening."""
    x = jnp.pad(x_nhwc, ((0, 0), (pad, pad), (pad, pad), (0, 0)))
    B, H, W, C = x.shape
    Ho = (H - kh) // stride + 1
    Wo = (W - kw) // stride + 1
    pieces = []
    for i in range(kh):
        for j in range(kw):
            pieces.append(
                x[:, i:i + stride * Ho:stride, j:j + stride * Wo:stride, :])
    p = jnp.concatenate(pieces, axis=-1)          # [B, Ho, Wo, kh*kw*C]
    return p.reshape(B * Ho * Wo, kh * kw * C), (B, Ho, Wo)


def init_params(key):
    """Deterministic synthetic parameters (DCGAN-style N(0, 0.02) weights).
    Conv weights stored in bf16 im2col layout (kh*kw*Cin, Cout); biases of the
    BN-followed convs are omitted (exactly cancelled by the BN mean)."""
    keys = jax.random.split(key, 6)
    scale = 0.02

    def conv_w(k, kh, kw, cin, cout):
        w = scale * jax.random.normal(k, (kh * kw * cin, cout), jnp.float32)
        return w.astype(jnp.bfloat16)

    return {
        "w1": conv_w(keys[0], 4, 4, 1, 64),
        "b1": scale * jax.random.normal(keys[1], (64,), jnp.float32),
        "w2": conv_w(keys[2], 4, 4, 64, 128),
        "w3": conv_w(keys[3], 3, 3, 128, 256),
        "w4": conv_w(keys[4], 4, 4, 256, 1),
        "b4": scale * jax.random.normal(keys[5], (1,), jnp.float32),
        # BatchNorm2d default init: gamma=1, beta=0
        "g2": jnp.ones((128,), jnp.float32),
        "be2": jnp.zeros((128,), jnp.float32),
        "g3": jnp.ones((256,), jnp.float32),
        "be3": jnp.zeros((256,), jnp.float32),
    }


def discriminator_forward(x_nchw, params):
    """Equivalent of DC_Classical_Discriminator.forward for 1x28x28 inputs."""
    x = jnp.transpose(x_nchw, (0, 2, 3, 1)).astype(jnp.bfloat16)   # NHWC bf16

    # Conv2d(1, 64, k=4, s=2, p=1) + LeakyReLU(0.2)
    p, (B, Ho, Wo) = im2col(x, 4, 4, 2, 1)
    y = conv_bias_act(p, params["w1"], params["b1"], act="leaky")
    x = y.reshape(B, Ho, Wo, 64)

    # Conv2d(64, 128, k=4, s=2, p=1) + BatchNorm2d(128) + LeakyReLU(0.2)
    p, (B, Ho, Wo) = im2col(x, 4, 4, 2, 1)
    y = conv_bn_leaky(p, params["w2"], params["g2"], params["be2"])
    x = y.reshape(B, Ho, Wo, 128)

    # Conv2d(128, 256, k=3, s=2, p=1) + BN(256) + LeakyReLU(0.2)
    #   + Conv2d(256, 1, k=4, s=1, p=0) + Sigmoid        (fused head)
    p, (B, Ho, Wo) = im2col(x, 3, 3, 2, 1)
    K3 = p.shape[1]
    M3 = B * Ho * Wo
    spatial = Ho * Wo
    if Ho == 4 and Wo == 4 and _fused_fits(M3, K3, 256):
        w4r = params["w4"].reshape(spatial, 256)          # (tap = h*4 + w, cin)
        w4_tiled = jnp.tile(w4r, (B, 1))                  # rows match (b, h, w)
        pool = jnp.kron(jnp.eye(B, dtype=jnp.float32),
                        jnp.ones((1, spatial), jnp.float32)).astype(jnp.bfloat16)
        return conv_bn_leaky_sigmoid_head(
            p, params["w3"], params["g3"], params["be3"],
            w4_tiled, pool, params["b4"])

    # Large-batch / generic fallback: tiled conv+BN+leaky, head as plain XLA.
    y = conv_bn_leaky(p, params["w3"], params["g3"], params["be3"])
    x = y.reshape(B, Ho, Wo, 256)
    p4, _ = im2col(x, 4, 4, 1, 0)
    logits = (p4.astype(jnp.float32) @ params["w4"].astype(jnp.float32)
              + params["b4"])
    return jax.nn.sigmoid(logits).reshape(-1, 1)


if __name__ == "__main__":
    root = jax.random.PRNGKey(0)
    kx, kp = jax.random.split(root)
    # MNIST-style input implied by the conv stack: 28x28 -> 14 -> 7 -> 4 -> 1
    x = jax.random.normal(kx, (2, 1, 28, 28), jnp.float32)
    params = init_params(kp)

    fwd = jax.jit(discriminator_forward)
    out = jax.block_until_ready(fwd(x, params))

    assert out.shape == (2, 1), out.shape
    assert bool(jnp.all(jnp.isfinite(out)))
    assert bool(jnp.all((out >= 0.0) & (out <= 1.0)))
    print("KERNEL_OK")
</pallas_src>

<mosaic_0001>
module attributes {stable_mosaic.version = 11 : i64} {
  func.func @_conv_bias_act_kernel(%arg0: i32, %arg1: memref<392x16xbf16, #tpu.memory_space<vmem>>, %arg2: memref<16x64xbf16, #tpu.memory_space<vmem>>, %arg3: memref<1x64xf32, #tpu.memory_space<vmem>>, %arg4: memref<392x64xbf16, #tpu.memory_space<vmem>>) attributes {dimension_semantics = [#tpu.dimension_semantics<parallel>], iteration_bounds = array<i64: 1>, scalar_prefetch = 0 : i64, scratch_operands = 0 : i64, tpu.core_type = #tpu.core_type<tc>, window_params = [{transform_indices = @transform_0, window_bounds = array<i64: 392, 16>}, {pipeline_mode = #tpu.pipeline_mode<synchronous>, transform_indices = @transform_1, window_bounds = array<i64: 16, 64>}, {pipeline_mode = #tpu.pipeline_mode<synchronous>, transform_indices = @transform_2, window_bounds = array<i64: 1, 64>}, {transform_indices = @transform_3, window_bounds = array<i64: 392, 64>}]} {
    %c0 = arith.constant 0 : index
    %c0_0 = arith.constant 0 : index
    %0 = vector.load %arg1[%c0, %c0_0] : memref<392x16xbf16, #tpu.memory_space<vmem>>, vector<392x16xbf16>
    %c0_1 = arith.constant 0 : index
    %c0_2 = arith.constant 0 : index
    %1 = vector.load %arg2[%c0_1, %c0_2] : memref<16x64xbf16, #tpu.memory_space<vmem>>, vector<16x64xbf16>
    %cst = arith.constant dense<0.000000e+00> : vector<392x64xf32>
    %2 = tpu.matmul %0, %1, %cst {dimension_numbers = #tpu.dot_dimension_numbers<[1], [0], [0], [1], [0, 0, 1, 1], [], []>} : vector<392x16xbf16>, vector<16x64xbf16>, vector<392x64xf32> -> vector<392x64xf32>
    %c0_3 = arith.constant 0 : index
    %c0_4 = arith.constant 0 : index
    %3 = vector.load %arg3[%c0_3, %c0_4] : memref<1x64xf32, #tpu.memory_space<vmem>>, vector<1x64xf32>
    %4 = vector.broadcast %3 : vector<1x64xf32> to vector<392x64xf32>
    %5 = arith.addf %2, %4 : vector<392x64xf32>
    %cst_5 = arith.constant 0.000000e+00 : f32
    %6 = vector.broadcast %cst_5 : f32 to vector<392x64xf32>
    %7 = arith.cmpf ogt, %5, %6 : vector<392x64xf32>
    %cst_6 = arith.constant 2.000000e-01 : f32
    %8 = vector.broadcast %cst_6 : f32 to vector<392x64xf32>
    %9 = arith.mulf %8, %5 : vector<392x64xf32>
    %10 = arith.select %7, %5, %9 : vector<392x64xi1>, vector<392x64xf32>
    %11 = arith.truncf %10 : vector<392x64xf32> to vector<392x64xbf16>
    %c0_7 = arith.constant 0 : index
    %c0_8 = arith.constant 0 : index
    %12 = vector.load %arg4[%c0_7, %c0_8] : memref<392x64xbf16, #tpu.memory_space<vmem>>, vector<392x64xbf16>
    tpu.vector_store %arg4[%c0_7, %c0_8], %11 {strides = array<i32>} : memref<392x64xbf16, #tpu.memory_space<vmem>>, vector<392x64xbf16>,
    return
  }
  func.func @transform_0(%arg0: i32) -> (i32, i32) {
    %c0_i32 = arith.constant 0 : i32
    %c0_i32_0 = arith.constant 0 : i32
    return %arg0, %c0_i32 : i32, i32
  }
  func.func @transform_1(%arg0: i32) -> (i32, i32) {
    %c0_i32 = arith.constant 0 : i32
    %c0_i32_0 = arith.constant 0 : i32
    %c0_i32_1 = arith.constant 0 : i32
    return %c0_i32, %c0_i32_0 : i32, i32
  }
  func.func @transform_2(%arg0: i32) -> (i32, i32) {
    %c0_i32 = arith.constant 0 : i32
    %c0_i32_0 = arith.constant 0 : i32
    %c0_i32_1 = arith.constant 0 : i32
    return %c0_i32, %c0_i32_0 : i32, i32
  }
  func.func @transform_3(%arg0: i32) -> (i32, i32) {
    %c0_i32 = arith.constant 0 : i32
    %c0_i32_0 = arith.constant 0 : i32
    return %arg0, %c0_i32 : i32, i32
  }
}

module attributes {stable_mosaic.version = 11 : i64} {
  func.func @_conv_bn_leaky_kernel(%arg0: i32, %arg1: memref<98x1024xbf16, #tpu.memory_space<vmem>>, %arg2: memref<1024x128xbf16, #tpu.memory_space<vmem>>, %arg3: memref<1x128xf32, #tpu.memory_space<vmem>>, %arg4: memref<1x128xf32, #tpu.memory_space<vmem>>, %arg5: memref<98x128xbf16, #tpu.memory_space<vmem>>) attributes {dimension_semantics = [#tpu.dimension_semantics<arbitrary>], iteration_bounds = array<i64: 1>, scalar_prefetch = 0 : i64, scratch_operands = 0 : i64, tpu.core_type = #tpu.core_type<tc>, window_params = [{pipeline_mode = #tpu.pipeline_mode<synchronous>, transform_indices = @transform_0, window_bounds = array<i64: 98, 1024>}, {pipeline_mode = #tpu.pipeline_mode<synchronous>, transform_indices = @transform_1, window_bounds = array<i64: 1024, 128>}, {pipeline_mode = #tpu.pipeline_mode<synchronous>, transform_indices = @transform_2, window_bounds = array<i64: 1, 128>}, {pipeline_mode = #tpu.pipeline_mode<synchronous>, transform_indices = @transform_3, window_bounds = array<i64: 1, 128>}, {pipeline_mode = #tpu.pipeline_mode<synchronous>, transform_indices = @transform_4, window_bounds = array<i64: 98, 128>}]} {
    %c0 = arith.constant 0 : index
    %c0_0 = arith.constant 0 : index
    %0 = vector.load %arg1[%c0, %c0_0] : memref<98x1024xbf16, #tpu.memory_space<vmem>>, vector<98x1024xbf16>
    %c0_1 = arith.constant 0 : index
    %c0_2 = arith.constant 0 : index
    %1 = vector.load %arg2[%c0_1, %c0_2] : memref<1024x128xbf16, #tpu.memory_space<vmem>>, vector<1024x128xbf16>
    %cst = arith.constant dense<0.000000e+00> : vector<98x128xf32>
    %2 = tpu.matmul %0, %1, %cst {dimension_numbers = #tpu.dot_dimension_numbers<[1], [0], [0], [1], [0, 0, 1, 1], [], []>} : vector<98x1024xbf16>, vector<1024x128xbf16>, vector<98x128xf32> -> vector<98x128xf32>
    %cst_3 = arith.constant dense<0.000000e+00> : vector<128xf32>
    %3 = vector.multi_reduction <add>, %2, %cst_3 [0] : vector<98x128xf32> to vector<128xf32>
    %4 = vector.shape_cast %3 : vector<128xf32> to vector<1x128xf32>
    %cst_4 = arith.constant 0.0102040814 : f32
    %5 = vector.broadcast %cst_4 : f32 to vector<1x128xf32>
    %6 = arith.mulf %4, %5 : vector<1x128xf32>
    %7 = vector.broadcast %6 : vector<1x128xf32> to vector<98x128xf32>
    %8 = arith.subf %2, %7 : vector<98x128xf32>
    %9 = arith.mulf %8, %8 : vector<98x128xf32>
    %cst_5 = arith.constant dense<0.000000e+00> : vector<128xf32>
    %10 = vector.multi_reduction <add>, %9, %cst_5 [0] : vector<98x128xf32> to vector<128xf32>
    %11 = vector.shape_cast %10 : vector<128xf32> to vector<1x128xf32>
    %cst_6 = arith.constant 0.0102040814 : f32
    %12 = vector.broadcast %cst_6 : f32 to vector<1x128xf32>
    %13 = arith.mulf %11, %12 : vector<1x128xf32>
    %cst_7 = arith.constant 9.99999974E-6 : f32
    %14 = vector.broadcast %cst_7 : f32 to vector<1x128xf32>
    %15 = arith.addf %13, %14 : vector<1x128xf32>
    %16 = math.rsqrt %15 : vector<1x128xf32>
    %c0_8 = arith.constant 0 : index
    %c0_9 = arith.constant 0 : index
    %17 = vector.load %arg3[%c0_8, %c0_9] : memref<1x128xf32, #tpu.memory_space<vmem>>, vector<1x128xf32>
    %18 = arith.mulf %17, %16 : vector<1x128xf32>
    %19 = vector.broadcast %18 : vector<1x128xf32> to vector<98x128xf32>
    %20 = arith.mulf %8, %19 : vector<98x128xf32>
    %c0_10 = arith.constant 0 : index
    %c0_11 = arith.constant 0 : index
    %21 = vector.load %arg4[%c0_10, %c0_11] : memref<1x128xf32, #tpu.memory_space<vmem>>, vector<1x128xf32>
    %22 = vector.broadcast %21 : vector<1x128xf32> to vector<98x128xf32>
    %23 = arith.addf %20, %22 : vector<98x128xf32>
    %cst_12 = arith.constant 0.000000e+00 : f32
    %24 = vector.broadcast %cst_12 : f32 to vector<98x128xf32>
    %25 = arith.cmpf ogt, %23, %24 : vector<98x128xf32>
    %cst_13 = arith.constant 2.000000e-01 : f32
    %26 = vector.broadcast %cst_13 : f32 to vector<98x128xf32>
    %27 = arith.mulf %26, %23 : vector<98x128xf32>
    %28 = arith.select %25, %23, %27 : vector<98x128xi1>, vector<98x128xf32>
    %29 = arith.truncf %28 : vector<98x128xf32> to vector<98x128xbf16>
    %c0_14 = arith.constant 0 : index
    %c0_15 = arith.constant 0 : index
    %30 = vector.load %arg5[%c0_14, %c0_15] : memref<98x128xbf16, #tpu.memory_space<vmem>>, vector<98x128xbf16>
    tpu.vector_store %arg5[%c0_14, %c0_15], %29 {strides = array<i32>} : memref<98x128xbf16, #tpu.memory_space<vmem>>, vector<98x128xbf16>,
    return
  }
  func.func @transform_0(%arg0: i32) -> (i32, i32) {
    %c0_i32 = arith.constant 0 : i32
    %c0_i32_0 = arith.constant 0 : i32
    %c0_i32_1 = arith.constant 0 : i32
    return %c0_i32, %c0_i32_0 : i32, i32
  }
  func.func @transform_1(%arg0: i32) -> (i32, i32) {
    %c0_i32 = arith.constant 0 : i32
    %c0_i32_0 = arith.constant 0 : i32
    %c0_i32_1 = arith.constant 0 : i32
    return %c0_i32, %c0_i32_0 : i32, i32
  }
  func.func @transform_2(%arg0: i32) -> (i32, i32) {
    %c0_i32 = arith.constant 0 : i32
    %c0_i32_0 = arith.constant 0 : i32
    %c0_i32_1 = arith.constant 0 : i32
    return %c0_i32, %c0_i32_0 : i32, i32
  }
  func.func @transform_3(%arg0: i32) -> (i32, i32) {
    %c0_i32 = arith.constant 0 : i32
    %c0_i32_0 = arith.constant 0 : i32
    %c0_i32_1 = arith.constant 0 : i32
    return %c0_i32, %c0_i32_0 : i32, i32
  }
  func.func @transform_4(%arg0: i32) -> (i32, i32) {
    %c0_i32 = arith.constant 0 : i32
    %c0_i32_0 = arith.constant 0 : i32
    %c0_i32_1 = arith.constant 0 : i32
    return %c0_i32, %c0_i32_0 : i32, i32
  }
}

module attributes {stable_mosaic.version = 11 : i64} {
  func.func @_conv_bn_leaky_head_kernel(%arg0: i32, %arg1: memref<32x1152xbf16, #tpu.memory_space<vmem>>, %arg2: memref<1152x256xbf16, #tpu.memory_space<vmem>>, %arg3: memref<1x256xf32, #tpu.memory_space<vmem>>, %arg4: memref<1x256xf32, #tpu.memory_space<vmem>>, %arg5: memref<32x256xbf16, #tpu.memory_space<vmem>>, %arg6: memref<2x32xbf16, #tpu.memory_space<vmem>>, %arg7: memref<1x1xf32, #tpu.memory_space<vmem>>, %arg8: memref<2x1xf32, #tpu.memory_space<vmem>>) attributes {dimension_semantics = [#tpu.dimension_semantics<arbitrary>], iteration_bounds = array<i64: 1>, scalar_prefetch = 0 : i64, scratch_operands = 0 : i64, tpu.core_type = #tpu.core_type<tc>, window_params = [{pipeline_mode = #tpu.pipeline_mode<synchronous>, transform_indices = @transform_0, window_bounds = array<i64: 32, 1152>}, {pipeline_mode = #tpu.pipeline_mode<synchronous>, transform_indices = @transform_1, window_bounds = array<i64: 1152, 256>}, {pipeline_mode = #tpu.pipeline_mode<synchronous>, transform_indices = @transform_2, window_bounds = array<i64: 1, 256>}, {pipeline_mode = #tpu.pipeline_mode<synchronous>, transform_indices = @transform_3, window_bounds = array<i64: 1, 256>}, {pipeline_mode = #tpu.pipeline_mode<synchronous>, transform_indices = @transform_4, window_bounds = array<i64: 32, 256>}, {pipeline_mode = #tpu.pipeline_mode<synchronous>, transform_indices = @transform_5, window_bounds = array<i64: 2, 32>}, {pipeline_mode = #tpu.pipeline_mode<synchronous>, transform_indices = @transform_6, window_bounds = array<i64: 1, 1>}, {pipeline_mode = #tpu.pipeline_mode<synchronous>, transform_indices = @transform_7, window_bounds = array<i64: 2, 1>}]} {
    %c0 = arith.constant 0 : index
    %c0_0 = arith.constant 0 : index
    %0 = vector.load %arg1[%c0, %c0_0] : memref<32x1152xbf16, #tpu.memory_space<vmem>>, vector<32x1152xbf16>
    %c0_1 = arith.constant 0 : index
    %c0_2 = arith.constant 0 : index
    %1 = vector.load %arg2[%c0_1, %c0_2] : memref<1152x256xbf16, #tpu.memory_space<vmem>>, vector<1152x256xbf16>
    %cst = arith.constant dense<0.000000e+00> : vector<32x256xf32>
    %2 = tpu.matmul %0, %1, %cst {dimension_numbers = #tpu.dot_dimension_numbers<[1], [0], [0], [1], [0, 0, 1, 1], [], []>} : vector<32x1152xbf16>, vector<1152x256xbf16>, vector<32x256xf32> -> vector<32x256xf32>
    %cst_3 = arith.constant dense<0.000000e+00> : vector<256xf32>
    %3 = vector.multi_reduction <add>, %2, %cst_3 [0] : vector<32x256xf32> to vector<256xf32>
    %4 = vector.shape_cast %3 : vector<256xf32> to vector<1x256xf32>
    %cst_4 = arith.constant 3.125000e-02 : f32
    %5 = vector.broadcast %cst_4 : f32 to vector<1x256xf32>
    %6 = arith.mulf %4, %5 : vector<1x256xf32>
    %7 = vector.broadcast %6 : vector<1x256xf32> to vector<32x256xf32>
    %8 = arith.subf %2, %7 : vector<32x256xf32>
    %9 = arith.mulf %8, %8 : vector<32x256xf32>
    %cst_5 = arith.constant dense<0.000000e+00> : vector<256xf32>
    %10 = vector.multi_reduction <add>, %9, %cst_5 [0] : vector<32x256xf32> to vector<256xf32>
    %11 = vector.shape_cast %10 : vector<256xf32> to vector<1x256xf32>
    %cst_6 = arith.constant 3.125000e-02 : f32
    %12 = vector.broadcast %cst_6 : f32 to vector<1x256xf32>
    %13 = arith.mulf %11, %12 : vector<1x256xf32>
    %cst_7 = arith.constant 9.99999974E-6 : f32
    %14 = vector.broadcast %cst_7 : f32 to vector<1x256xf32>
    %15 = arith.addf %13, %14 : vector<1x256xf32>
    %16 = math.rsqrt %15 : vector<1x256xf32>
    %c0_8 = arith.constant 0 : index
    %c0_9 = arith.constant 0 : index
    %17 = vector.load %arg3[%c0_8, %c0_9] : memref<1x256xf32, #tpu.memory_space<vmem>>, vector<1x256xf32>
    %18 = arith.mulf %17, %16 : vector<1x256xf32>
    %19 = vector.broadcast %18 : vector<1x256xf32> to vector<32x256xf32>
    %20 = arith.mulf %8, %19 : vector<32x256xf32>
    %c0_10 = arith.constant 0 : index
    %c0_11 = arith.constant 0 : index
    %21 = vector.load %arg4[%c0_10, %c0_11] : memref<1x256xf32, #tpu.memory_space<vmem>>, vector<1x256xf32>
    %22 = vector.broadcast %21 : vector<1x256xf32> to vector<32x256xf32>
    %23 = arith.addf %20, %22 : vector<32x256xf32>
    %cst_12 = arith.constant 0.000000e+00 : f32
    %24 = vector.broadcast %cst_12 : f32 to vector<32x256xf32>
    %25 = arith.cmpf ogt, %23, %24 : vector<32x256xf32>
    %cst_13 = arith.constant 2.000000e-01 : f32
    %26 = vector.broadcast %cst_13 : f32 to vector<32x256xf32>
    %27 = arith.mulf %26, %23 : vector<32x256xf32>
    %28 = arith.select %25, %23, %27 : vector<32x256xi1>, vector<32x256xf32>
    %c0_14 = arith.constant 0 : index
    %c0_15 = arith.constant 0 : index
    %29 = vector.load %arg5[%c0_14, %c0_15] : memref<32x256xbf16, #tpu.memory_space<vmem>>, vector<32x256xbf16>
    %30 = arith.extf %29 : vector<32x256xbf16> to vector<32x256xf32>
    %31 = arith.mulf %28, %30 : vector<32x256xf32>
    %c0_16 = arith.constant 0 : index
    %c0_17 = arith.constant 0 : index
    %32 = vector.load %arg6[%c0_16, %c0_17] : memref<2x32xbf16, #tpu.memory_space<vmem>>, vector<2x32xbf16>
    %33 = arith.extf %32 : vector<2x32xbf16> to vector<2x32xf32>
    %cst_18 = arith.constant dense<0.000000e+00> : vector<2x256xf32>
    %34 = tpu.matmul %33, %31, %cst_18 {dimension_numbers = #tpu.dot_dimension_numbers<[1], [0], [0], [1], [0, 0, 1, 1], [], []>} : vector<2x32xf32>, vector<32x256xf32>, vector<2x256xf32> -> vector<2x256xf32>
    %cst_19 = arith.constant dense<0.000000e+00> : vector<2xf32>
    %35 = vector.multi_reduction <add>, %34, %cst_19 [1] : vector<2x256xf32> to vector<2xf32>
    %36 = vector.shape_cast %35 : vector<2xf32> to vector<2x1xf32>
    %c0_20 = arith.constant 0 : index
    %c0_21 = arith.constant 0 : index
    %37 = vector.load %arg7[%c0_20, %c0_21] : memref<1x1xf32, #tpu.memory_space<vmem>>, vector<1x1xf32>
    %38 = vector.broadcast %37 : vector<1x1xf32> to vector<2x1xf32>
    %39 = arith.addf %36, %38 : vector<2x1xf32>
    %40 = arith.negf %39 : vector<2x1xf32>
    %41 = math.exp %40 : vector<2x1xf32>
    %cst_22 = arith.constant 1.000000e+00 : f32
    %42 = vector.broadcast %cst_22 : f32 to vector<2x1xf32>
    %43 = arith.addf %42, %41 : vector<2x1xf32>
    %44 = arith.divf %42, %43 : vector<2x1xf32>
    %c0_23 = arith.constant 0 : index
    %c0_24 = arith.constant 0 : index
    %45 = vector.load %arg8[%c0_23, %c0_24] : memref<2x1xf32, #tpu.memory_space<vmem>>, vector<2x1xf32>
    tpu.vector_store %arg8[%c0_23, %c0_24], %44 {strides = array<i32>} : memref<2x1xf32, #tpu.memory_space<vmem>>, vector<2x1xf32>,
    return
  }
  func.func @transform_0(%arg0: i32) -> (i32, i32) {
    %c0_i32 = arith.constant 0 : i32
    %c0_i32_0 = arith.constant 0 : i32
    %c0_i32_1 = arith.constant 0 : i32
    return %c0_i32, %c0_i32_0 : i32, i32
  }
  func.func @transform_1(%arg0: i32) -> (i32, i32) {
    %c0_i32 = arith.constant 0 : i32
    %c0_i32_0 = arith.constant 0 : i32
    %c0_i32_1 = arith.constant 0 : i32
    return %c0_i32, %c0_i32_0 : i32, i32
  }
  func.func @transform_2(%arg0: i32) -> (i32, i32) {
    %c0_i32 = arith.constant 0 : i32
    %c0_i32_0 = arith.constant 0 : i32
    %c0_i32_1 = arith.constant 0 : i32
    return %c0_i32, %c0_i32_0 : i32, i32
  }
  func.func @transform_3(%arg0: i32) -> (i32, i32) {
    %c0_i32 = arith.constant 0 : i32
    %c0_i32_0 = arith.constant 0 : i32
    %c0_i32_1 = arith.constant 0 : i32
    return %c0_i32, %c0_i32_0 : i32, i32
  }
  func.func @transform_4(%arg0: i32) -> (i32, i32) {
    %c0_i32 = arith.constant 0 : i32
    %c0_i32_0 = arith.constant 0 : i32
    %c0_i32_1 = arith.constant 0 : i32
    return %c0_i32, %c0_i32_0 : i32, i32
  }
  func.func @transform_5(%arg0: i32) -> (i32, i32) {
    %c0_i32 = arith.constant 0 : i32
    %c0_i32_0 = arith.constant 0 : i32
    %c0_i32_1 = arith.constant 0 : i32
    return %c0_i32, %c0_i32_0 : i32, i32
  }
  func.func @transform_6(%arg0: i32) -> (i32, i32) {
    %c0_i32 = arith.constant 0 : i32
    %c0_i32_0 = arith.constant 0 : i32
    %c0_i32_1 = arith.constant 0 : i32
    return %c0_i32, %c0_i32_0 : i32, i32
  }
  func.func @transform_7(%arg0: i32) -> (i32, i32) {
    %c0_i32 = arith.constant 0 : i32
    %c0_i32_0 = arith.constant 0 : i32
    %c0_i32_1 = arith.constant 0 : i32
    return %c0_i32, %c0_i32_0 : i32, i32
  }
}

</mosaic_0001>

<bundles_post_ra>
// kernel: discriminator_forward.3
= control target key start
LH: loop header
LB: loop body
LE: loop exit
PB: predicated region body
PF: predicated region fallthrough
CT: control target
= control target key end

     0   :  { %v1216_v0 = vmov 0.0   ;;  %vm1217_vm0 = vmmov 0   ;;  %vm202_vm1 = vcmask 130048   ;;  %vm854_vm4 = vcmask 519168   ;;  %s1643_s1 = inlined_call_operand.vmem [shape: bf16[16,64], index: 1, kind: input, shape index: {}]   ;;  %s1644_s0 = inlined_call_operand.vmem [shape: bf16[392,16], index: 0, kind: input, shape index: {}]   ;;  %s1645_s2 = inlined_call_operand.vmem [shape: f32[1,64], index: 2, kind: input, shape index: {}]   ;;  %s1646_s3 = inlined_call_operand.vmem [shape: bf16[392,64], index: 3, kind: output, shape index: {}]  }
   0x1   :  { %1084 = vmatprep.subr.bf16.mxu0 %v1216_v0  ;;  %v1190_v1 = vld [vmem:[%s1643_s1] sm:$0xff]   ;;  %1086 = vmatprep.mubr.msk.bf16.mxu0 %vm1217_vm0, %v1216_v0  ;;  %v1192_v3 = vld [vmem:[%s1644_s0 + $0x68] sm:$0xff]   ;;  %v1194_v5 = vld [vmem:[%s1644_s0 + $0x70] sm:$0xff]  }
   0x2   :  { %v1191_v2 = vld [vmem:[%s1644_s0] sm:$0xff]   ;;  %1186 = vmatprep.subr.bf16.mxu1 %v1216_v0  ;;  %1138 = vmatprep.mubr.msk.bf16.mxu1 %vm1217_vm0, %v1216_v0  ;;  %v1193_v4 = vld [vmem:[%s1644_s0 + $0x8] sm:$0xff]   ;;  %v1195_v6 = vld [vmem:[%s1644_s0 + $0x10] sm:$0xff]  }
   0x3   :  { %1085 = vmatpush3.bf16.msra.mxu0 %v1190_v1  ;;  %1187 = vmatpush3.bf16.msra.mxu1 %v1190_v1  ;;  %v1196_v7 = vld [vmem:[%s1644_s0 + $0x78] sm:$0xff]   ;;  %v1198_v9 = vld [vmem:[%s1644_s0 + $0x80] sm:$0xff]   ;;  %v1200_v11 = vld [vmem:[%s1644_s0 + $0x88] sm:$0xff]  }
   0x4   :  { %v1197_v8 = vld [vmem:[%s1644_s0 + $0x18] sm:$0xff]   ;;  %v1199_v10 = vld [vmem:[%s1644_s0 + $0x20] sm:$0xff]   ;;  %v1201_v12 = vld [vmem:[%s1644_s0 + $0x28] sm:$0xff]  }
   0x5   :  { %v1202_v13 = vld [vmem:[%s1644_s0 + $0x90] sm:$0xff]   ;;  %v1204_v15 = vld [vmem:[%s1644_s0 + $0x98] sm:$0xff]   ;;  %v1206_v17 = vld [vmem:[%s1644_s0 + $0xa0] sm:$0xff]  }
   0x6   :  { %1087 = vmatmul.mubr.msk.bf16.vlgmr.msra.gmra.mrb[0].mxu0 %vm202_vm1, %v1191_v2  ;;  %1139 = vmatmul.mubr.msk.bf16.vlgmr.msra.gmra.mrb[0].mxu1 %vm202_vm1, %v1192_v3  ;;  %v1203_v14 = vld [vmem:[%s1644_s0 + $0x30] sm:$0xff]   ;;  %v1205_v16 = vld [vmem:[%s1644_s0 + $0x38] sm:$0xff]   ;;  %v1207_v18 = vld [vmem:[%s1644_s0 + $0x40] sm:$0xff]  }
   0x7   :  { %1090 = vmatprep.mubr.msk.bf16.mxu0 %vm1217_vm0, %v1216_v0  ;;  %1142 = vmatprep.mubr.msk.bf16.mxu1 %vm1217_vm0, %v1216_v0  ;;  %v1208_v19 = vld [vmem:[%s1644_s0 + $0xa8] sm:$0xff]   ;;  %v1210_v21 = vld [vmem:[%s1644_s0 + $0xb0] sm:$0xff]   ;;  %v1212_v23 = vld [vmem:[%s1644_s0 + $0xb8] sm:$0xff]  }
   0x8   :  { %v1209_v20 = vld [vmem:[%s1644_s0 + $0x48] sm:$0xff]   ;;  %v1211_v22 = vld [vmem:[%s1644_s0 + $0x50] sm:$0xff]   ;;  %v1213_v24 = vld [vmem:[%s1644_s0 + $0x58] sm:$0xff]  }
   0x9   :  { %v1214_v25 = vld [vmem:[%s1644_s0 + $0xc0] ss:$0 sps:$4 sm:$0xff]  }
   0xa   :  { %v1215_v26 = vld [vmem:[%s1644_s0 + $0x60] sm:$0xff]  }
   0xb   :  { %v1396_v27 = vld [vmem:[%s1645_s2] ss:$0 sm:$0xff] }
   0xe   :  { %1091 = vmatmul.mubr.msk.bf16.gmra.mrb[4].mxu0 %vm202_vm1, %v1193_v4  ;;  %1143 = vmatmul.mubr.msk.bf16.gmra.mrb[4].mxu1 %vm202_vm1, %v1194_v5 }
   0xf   :  { %1094 = vmatprep.mubr.msk.bf16.mxu0 %vm1217_vm0, %v1216_v0  ;;  %1146 = vmatprep.mubr.msk.bf16.mxu1 %vm1217_vm0, %v1216_v0 }
  0x16   :  { %1095 = vmatmul.mubr.msk.bf16.gmra.mrb[8].mxu0 %vm202_vm1, %v1195_v6  ;;  %1147 = vmatmul.mubr.msk.bf16.gmra.mrb[8].mxu1 %vm202_vm1, %v1196_v7 }
  0x17   :  { %1098 = vmatprep.mubr.msk.bf16.mxu0 %vm1217_vm0, %v1216_v0  ;;  %1150 = vmatprep.mubr.msk.bf16.mxu1 %vm1217_vm0, %v1216_v0 }
  0x1e   :  { %1099 = vmatmul.mubr.msk.bf16.gmra.mrb[12].mxu0 %vm202_vm1, %v1197_v8  ;;  %1151 = vmatmul.mubr.msk.bf16.gmra.mrb[12].mxu1 %vm202_vm1, %v1198_v9 }
  0x1f   :  { %1102 = vmatprep.mubr.msk.bf16.mxu0 %vm1217_vm0, %v1216_v0  ;;  %1154 = vmatprep.mubr.msk.bf16.mxu1 %vm1217_vm0, %v1216_v0 }
  0x26   :  { %1103 = vmatmul.mubr.msk.bf16.gmra.mrb[16].mxu0 %vm202_vm1, %v1199_v10  ;;  %1155 = vmatmul.mubr.msk.bf16.gmra.mrb[16].mxu1 %vm202_vm1, %v1200_v11 }
  0x27   :  { %1106 = vmatprep.mubr.msk.bf16.mxu0 %vm1217_vm0, %v1216_v0  ;;  %1158 = vmatprep.mubr.msk.bf16.mxu1 %vm1217_vm0, %v1216_v0 }
  0x2e   :  { %1107 = vmatmul.mubr.msk.bf16.gmra.mrb[20].mxu0 %vm202_vm1, %v1201_v12  ;;  %1159 = vmatmul.mubr.msk.bf16.gmra.mrb[20].mxu1 %vm202_vm1, %v1202_v13 }
  0x2f   :  { %1110 = vmatprep.mubr.msk.bf16.mxu0 %vm1217_vm0, %v1216_v0  ;;  %1162 = vmatprep.mubr.msk.bf16.mxu1 %vm1217_vm0, %v1216_v0 }
  0x36   :  { %1111 = vmatmul.mubr.msk.bf16.gmra.mrb[24].mxu0 %vm202_vm1, %v1203_v14  ;;  %1163 = vmatmul.mubr.msk.bf16.gmra.mrb[24].mxu1 %vm202_vm1, %v1204_v15 }
  0x37   :  { %1114 = vmatprep.mubr.msk.bf16.mxu0 %vm1217_vm0, %v1216_v0  ;;  %1166 = vmatprep.mubr.msk.bf16.mxu1 %vm1217_vm0, %v1216_v0 }
  0x3e   :  { %1115 = vmatmul.mubr.msk.bf16.gmra.mrb[28].mxu0 %vm202_vm1, %v1205_v16  ;;  %1167 = vmatmul.mubr.msk.bf16.gmra.mrb[28].mxu1 %vm202_vm1, %v1206_v17 }
  0x3f   :  { %1118 = vmatprep.mubr.msk.bf16.mxu0 %vm1217_vm0, %v1216_v0  ;;  %1170 = vmatprep.mubr.msk.bf16.mxu1 %vm1217_vm0, %v1216_v0 }
  0x46   :  { %1119 = vmatmul.mubr.msk.bf16.gmra.mrb[32].mxu0 %vm202_vm1, %v1207_v18  ;;  %1171 = vmatmul.mubr.msk.bf16.gmra.mrb[32].mxu1 %vm202_vm1, %v1208_v19 }
  0x47   :  { %1122 = vmatprep.mubr.msk.bf16.mxu0 %vm1217_vm0, %v1216_v0  ;;  %1174 = vmatprep.mubr.msk.bf16.mxu1 %vm1217_vm0, %v1216_v0 }
  0x4e   :  { %1123 = vmatmul.mubr.msk.bf16.gmra.mrb[36].mxu0 %vm202_vm1, %v1209_v20  ;;  %1175 = vmatmul.mubr.msk.bf16.gmra.mrb[36].mxu1 %vm202_vm1, %v1210_v21 }
  0x4f   :  { %1126 = vmatprep.mubr.msk.bf16.mxu0 %vm1217_vm0, %v1216_v0  ;;  %1178 = vmatprep.mubr.msk.bf16.mxu1 %vm1217_vm0, %v1216_v0 }
  0x56   :  { %1127 = vmatmul.mubr.msk.bf16.gmra.mrb[40].mxu0 %vm202_vm1, %v1211_v22  ;;  %1179 = vmatmul.mubr.msk.bf16.gmra.mrb[40].mxu1 %vm202_vm1, %v1212_v23 }
  0x57   :  { %1130 = vmatprep.mubr.msk.bf16.mxu0 %vm1217_vm0, %v1216_v0  ;;  %1182 = vmatprep.mubr.msk.bf16.mxu1 %vm1217_vm0, %v1216_v0 }
  0x5e   :  { %1131 = vmatmul.mubr.msk.bf16.gmra.mrb[44].mxu0 %vm202_vm1, %v1213_v24  ;;  %1183 = vmatmul.mubr.msk.bf16.gmra.mrb[44].mxu1 %vm202_vm1, %v1214_v25 }
  0x5f   :  { %1134 = vmatprep.mubr.msk.bf16.mxu0 %vm1217_vm0, %v1216_v0 }
  0x66   :  { %1135 = vmatmul.mubr.msk.bf16.gmra.mrb[48].mxu0 %vm202_vm1, %v1215_v26 }
  0xd9   :  { %v312_v28 = vpop.f32.mrb[0].mxu0  ;;  %v416_v29 = vpop.f32.mrb[0].mxu1 }
  0xda   :  { %v313_v30 = vadd.f32 %v1396_v27, %v312_v28  ;;  %v1088_v31 = vpop.f32.mrb[1].mxu0  ;;  %v417_v32 = vadd.f32 %v1396_v27, %v416_v29  ;;  %v1140_v33 = vpop.f32.mrb[1].mxu1 }
  0xdb   :  { %v315_v34 = vpop.f32.mrb[2].mxu0  ;;  %v419_v35 = vpop.f32.mrb[2].mxu1 }
  0xdc   :  { %vm510_vm2 = vcmp.gt.f32.partialorder %v313_v30, 0.0  ;;  %v559_v36 = vmul.f32 0.2, %v313_v30  ;;  %v316_v37 = vadd.f32 %v1396_v27, %v315_v34  ;;  %v1089_v38 = vpop.f32.mrb[3].mxu0  ;;  %vm536_vm3 = vcmp.gt.f32.partialorder %v417_v32, 0.0  ;;  %v1141_v39 = vpop.f32.mrb[3].mxu1 }
  0xdd   :  { %v585_v40 = vmul.f32 0.2, %v417_v32  ;;  %v420_v41 = vadd.f32 %v1396_v27, %v419_v35 }
  0xde   :  { %v608_v42 = vsel %vm510_vm2, %v313_v30, %v559_v36  ;;  %vm511_vm5 = vcmp.gt.f32.partialorder %v316_v37, 0.0  ;;  %v560_v43 = vmul.f32 0.2, %v316_v37 }
  0xdf   :  { %v1009_v44 = vpack.c.bf16 %v608_v42, %v608_v42  ;;  %v634_v45 = vsel %vm536_vm3, %v417_v32, %v585_v40  ;;  %vm537_vm6 = vcmp.gt.f32.partialorder %v420_v41, 0.0  ;;  %v586_v46 = vmul.f32 0.2, %v420_v41 }
  0xe0   :  { %v609_v47 = vsel %vm511_vm5, %v316_v37, %v560_v43  ;;  %v1035_v48 = vpack.c.bf16 %v634_v45, %v634_v45 }
  0xe1   :  { %855 = vst.msk [vmem:[%s1646_s3] sm:$0xf] %vm854_vm4, %v1009_v44  ;;  %v1010_v49 = vpack.c.bf16 %v609_v47, %v609_v47  ;;  %v320_v50 = vpop.f32.mrb[4].mxu0  ;;  %v635_v51 = vsel %vm537_vm6, %v420_v41, %v586_v46  ;;  %v424_v52 = vpop.f32.mrb[4].mxu1 }
  0xe2   :  { %881 = vst.msk [vmem:[%s1646_s3 + $0x68] sm:$0xf] %vm854_vm4, %v1035_v48  ;;  %v321_v53 = vadd.f32 %v1396_v27, %v320_v50  ;;  %v1036_v54 = vpack.c.bf16 %v635_v51, %v635_v51  ;;  %v1092_v55 = vpop.f32.mrb[5].mxu0  ;;  %v425_v56 = vadd.f32 %v1396_v27, %v424_v52  ;;  %v1144_v57 = vpop.f32.mrb[5].mxu1 }
  0xe3   :  { %856 = vst.msk [vmem:[%s1646_s3 + $0x4] sm:$0xf] %vm854_vm4, %v1010_v49  ;;  %v323_v58 = vpop.f32.mrb[6].mxu0  ;;  %v427_v59 = vpop.f32.mrb[6].mxu1 }
  0xe4   :  { %vm512_vm7 = vcmp.gt.f32.partialorder %v321_v53, 0.0  ;;  %v561_v60 = vmul.f32 0.2, %v321_v53  ;;  %882 = vst.msk [vmem:[%s1646_s3 + $0x6c] sm:$0xf] %vm854_vm4, %v1036_v54  ;;  %v324_v61 = vadd.f32 %v1396_v27, %v323_v58  ;;  %v1093_v62 = vpop.f32.mrb[7].mxu0  ;;  %v428_v1 = vadd.f32 %v1396_v27, %v427_v59 }
  0xe5   :  { %vm538_vm8 = vcmp.gt.f32.partialorder %v425_v56, 0.0  ;;  %v1145_v63 = vpop.f32.mrb[7].mxu1  ;;  %v587_v0 = vmul.f32 0.2, %v425_v56 }
  0xe6   :  { %v610_v2 = vsel %vm512_vm7, %v321_v53, %v561_v60  ;;  %vm513_vm9 = vcmp.gt.f32.partialorder %v324_v61, 0.0  ;;  %v562_v3 = vmul.f32 0.2, %v324_v61  ;;  %vm539_vm10 = vcmp.gt.f32.partialorder %v428_v1, 0.0 }
  0xe7   :  { %v1011_v4 = vpack.c.bf16 %v610_v2, %v610_v2  ;;  %v636_v5 = vsel %vm538_vm8, %v425_v56, %v587_v0  ;;  %v588_v6 = vmul.f32 0.2, %v428_v1 }
  0xe8   :  { %v611_v7 = vsel %vm513_vm9, %v324_v61, %v562_v3  ;;  %v1037_v8 = vpack.c.bf16 %v636_v5, %v636_v5 }
  0xe9   :  { %857 = vst.msk [vmem:[%s1646_s3 + $0x8] sm:$0xf] %vm854_vm4, %v1011_v4  ;;  %v1012_v9 = vpack.c.bf16 %v611_v7, %v611_v7  ;;  %v328_v10 = vpop.f32.mrb[8].mxu0  ;;  %v637_v11 = vsel %vm539_vm10, %v428_v1, %v588_v6  ;;  %v432_v12 = vpop.f32.mrb[8].mxu1 }
  0xea   :  { %883 = vst.msk [vmem:[%s1646_s3 + $0x70] sm:$0xf] %vm854_vm4, %v1037_v8  ;;  %v329_v13 = vadd.f32 %v1396_v27, %v328_v10  ;;  %v1038_v14 = vpack.c.bf16 %v637_v11, %v637_v11  ;;  %v1096_v15 = vpop.f32.mrb[9].mxu0  ;;  %v433_v16 = vadd.f32 %v1396_v27, %v432_v12  ;;  %v1148_v17 = vpop.f32.mrb[9].mxu1 }
  0xeb   :  { %858 = vst.msk [vmem:[%s1646_s3 + $0xc] sm:$0xf] %vm854_vm4, %v1012_v9  ;;  %v331_v18 = vpop.f32.mrb[10].mxu0  ;;  %v435_v19 = vpop.f32.mrb[10].mxu1 }
  0xec   :  { %vm514_vm11 = vcmp.gt.f32.partialorder %v329_v13, 0.0  ;;  %v563_v20 = vmul.f32 0.2, %v329_v13  ;;  %884 = vst.msk [vmem:[%s1646_s3 + $0x74] sm:$0xf] %vm854_vm4, %v1038_v14  ;;  %v332_v21 = vadd.f32 %v1396_v27, %v331_v18  ;;  %v1097_v22 = vpop.f32.mrb[11].mxu0  ;;  %v436_v25 = vadd.f32 %v1396_v27, %v435_v19 }
  0xed   :  { %vm540_vm12 = vcmp.gt.f32.partialorder %v433_v16, 0.0  ;;  %v1149_v23 = vpop.f32.mrb[11].mxu1  ;;  %v589_v24 = vmul.f32 0.2, %v433_v16 }
  0xee   :  { %v612_v26 = vsel %vm514_vm11, %v329_v13, %v563_v20  ;;  %vm515_vm13 = vcmp.gt.f32.partialorder %v332_v21, 0.0  ;;  %v564_v28 = vmul.f32 0.2, %v332_v21  ;;  %vm541_vm14 = vcmp.gt.f32.partialorder %v436_v25, 0.0 }
  0xef   :  { %v1013_v29 = vpack.c.bf16 %v612_v26, %v612_v26  ;;  %v638_v30 = vsel %vm540_vm12, %v433_v16, %v589_v24  ;;  %v590_v31 = vmul.f32 0.2, %v436_v25 }
  0xf0   :  { %v613_v32 = vsel %vm515_vm13, %v332_v21, %v564_v28  ;;  %v1039_v33 = vpack.c.bf16 %v638_v30, %v638_v30 }
  0xf1   :  { %859 = vst.msk [vmem:[%s1646_s3 + $0x10] sm:$0xf] %vm854_vm4, %v1013_v29  ;;  %v1014_v34 = vpack.c.bf16 %v613_v32, %v613_v32  ;;  %v336_v35 = vpop.f32.mrb[12].mxu0  ;;  %v639_v36 = vsel %vm541_vm14, %v436_v25, %v590_v31  ;;  %v440_v37 = vpop.f32.mrb[12].mxu1 }
  0xf2   :  { %885 = vst.msk [vmem:[%s1646_s3 + $0x78] sm:$0xf] %vm854_vm4, %v1039_v33  ;;  %v337_v38 = vadd.f32 %v1396_v27, %v336_v35  ;;  %v1040_v39 = vpack.c.bf16 %v639_v36, %v639_v36  ;;  %v1100_v40 = vpop.f32.mrb[13].mxu0  ;;  %v441_v41 = vadd.f32 %v1396_v27, %v440_v37  ;;  %v1152_v42 = vpop.f32.mrb[13].mxu1 }
  0xf3   :  { %860 = vst.msk [vmem:[%s1646_s3 + $0x14] sm:$0xf] %vm854_vm4, %v1014_v34  ;;  %v339_v43 = vpop.f32.mrb[14].mxu0  ;;  %v443_v44 = vpop.f32.mrb[14].mxu1 }
  0xf4   :  { %vm516_vm15 = vcmp.gt.f32.partialorder %v337_v38, 0.0  ;;  %v565_v45 = vmul.f32 0.2, %v337_v38  ;;  %886 = vst.msk [vmem:[%s1646_s3 + $0x7c] sm:$0xf] %vm854_vm4, %v1040_v39  ;;  %v340_v46 = vadd.f32 %v1396_v27, %v339_v43  ;;  %v1101_v47 = vpop.f32.mrb[15].mxu0  ;;  %v444_v50 = vadd.f32 %v1396_v27, %v443_v44 }
  0xf5   :  { %vm542_vm0 = vcmp.gt.f32.partialorder %v441_v41, 0.0  ;;  %v1153_v48 = vpop.f32.mrb[15].mxu1  ;;  %v591_v49 = vmul.f32 0.2, %v441_v41 }
  0xf6   :  { %v614_v51 = vsel %vm516_vm15, %v337_v38, %v565_v45  ;;  %vm517_vm1 = vcmp.gt.f32.partialorder %v340_v46, 0.0  ;;  %v566_v52 = vmul.f32 0.2, %v340_v46  ;;  %vm543_vm2 = vcmp.gt.f32.partialorder %v444_v50, 0.0 }
  0xf7   :  { %v1015_v53 = vpack.c.bf16 %v614_v51, %v614_v51  ;;  %v640_v54 = vsel %vm542_vm0, %v441_v41, %v591_v49  ;;  %v592_v55 = vmul.f32 0.2, %v444_v50 }
  0xf8   :  { %v615_v56 = vsel %vm517_vm1, %v340_v46, %v566_v52  ;;  %v1041_v57 = vpack.c.bf16 %v640_v54, %v640_v54 }
  0xf9   :  { %861 = vst.msk [vmem:[%s1646_s3 + $0x18] sm:$0xf] %vm854_vm4, %v1015_v53  ;;  %v1016_v58 = vpack.c.bf16 %v615_v56, %v615_v56  ;;  %v344_v59 = vpop.f32.mrb[16].mxu0  ;;  %v641_v60 = vsel %vm543_vm2, %v444_v50, %v592_v55  ;;  %v448_v61 = vpop.f32.mrb[16].mxu1 }
  0xfa   :  { %887 = vst.msk [vmem:[%s1646_s3 + $0x80] sm:$0xf] %vm854_vm4, %v1041_v57  ;;  %v345_v62 = vadd.f32 %v1396_v27, %v344_v59  ;;  %v1042_v63 = vpack.c.bf16 %v641_v60, %v641_v60  ;;  %v1104_v0 = vpop.f32.mrb[17].mxu0  ;;  %v449_v1 = vadd.f32 %v1396_v27, %v448_v61  ;;  %v1156_v2 = vpop.f32.mrb[17].mxu1 }
  0xfb   :  { %862 = vst.msk [vmem:[%s1646_s3 + $0x1c] sm:$0xf] %vm854_vm4, %v1016_v58  ;;  %v347_v3 = vpop.f32.mrb[18].mxu0  ;;  %v451_v4 = vpop.f32.mrb[18].mxu1 }
  0xfc   :  { %vm518_vm3 = vcmp.gt.f32.partialorder %v345_v62, 0.0  ;;  %v567_v5 = vmul.f32 0.2, %v345_v62  ;;  %888 = vst.msk [vmem:[%s1646_s3 + $0x84] sm:$0xf] %vm854_vm4, %v1042_v63  ;;  %v348_v6 = vadd.f32 %v1396_v27, %v347_v3  ;;  %v1105_v7 = vpop.f32.mrb[19].mxu0  ;;  %v452_v10 = vadd.f32 %v1396_v27, %v451_v4 }
  0xfd   :  { %vm544_vm5 = vcmp.gt.f32.partialorder %v449_v1, 0.0  ;;  %v1157_v8 = vpop.f32.mrb[19].mxu1  ;;  %v593_v9 = vmul.f32 0.2, %v449_v1 }
  0xfe   :  { %v616_v11 = vsel %vm518_vm3, %v345_v62, %v567_v5  ;;  %vm519_vm6 = vcmp.gt.f32.partialorder %v348_v6, 0.0  ;;  %v568_v12 = vmul.f32 0.2, %v348_v6  ;;  %vm545_vm7 = vcmp.gt.f32.partialorder %v452_v10, 0.0 }
  0xff   :  { %v1017_v13 = vpack.c.bf16 %v616_v11, %v616_v11  ;;  %v642_v14 = vsel %vm544_vm5, %v449_v1, %v593_v9  ;;  %v594_v15 = vmul.f32 0.2, %v452_v10 }
 0x100   :  { %v617_v16 = vsel %vm519_vm6, %v348_v6, %v568_v12  ;;  %v1043_v17 = vpack.c.bf16 %v642_v14, %v642_v14 }
 0x101   :  { %863 = vst.msk [vmem:[%s1646_s3 + $0x20] sm:$0xf] %vm854_vm4, %v1017_v13  ;;  %v1018_v18 = vpack.c.bf16 %v617_v16, %v617_v16  ;;  %v352_v19 = vpop.f32.mrb[20].mxu0  ;;  %v643_v20 = vsel %vm545_vm7, %v452_v10, %v594_v15  ;;  %v456_v21 = vpop.f32.mrb[20].mxu1 }
 0x102   :  { %889 = vst.msk [vmem:[%s1646_s3 + $0x88] sm:$0xf] %vm854_vm4, %v1043_v17  ;;  %v353_v22 = vadd.f32 %v1396_v27, %v352_v19  ;;  %v1044_v23 = vpack.c.bf16 %v643_v20, %v643_v20  ;;  %v1108_v24 = vpop.f32.mrb[21].mxu0  ;;  %v457_v25 = vadd.f32 %v1396_v27, %v456_v21  ;;  %v1160_v26 = vpop.f32.mrb[21].mxu1 }
 0x103   :  { %864 = vst.msk [vmem:[%s1646_s3 + $0x24] sm:$0xf] %vm854_vm4, %v1018_v18  ;;  %v355_v28 = vpop.f32.mrb[22].mxu0  ;;  %v459_v29 = vpop.f32.mrb[22].mxu1 }
 0x104   :  { %vm520_vm8 = vcmp.gt.f32.partialorder %v353_v22, 0.0  ;;  %v569_v30 = vmul.f32 0.2, %v353_v22  ;;  %890 = vst.msk [vmem:[%s1646_s3 + $0x8c] sm:$0xf] %vm854_vm4, %v1044_v23  ;;  %v356_v31 = vadd.f32 %v1396_v27, %v355_v28  ;;  %v1109_v32 = vpop.f32.mrb[23].mxu0  ;;  %v460_v35 = vadd.f32 %v1396_v27, %v459_v29 }
 0x105   :  { %vm546_vm9 = vcmp.gt.f32.partialorder %v457_v25, 0.0  ;;  %v1161_v33 = vpop.f32.mrb[23].mxu1  ;;  %v595_v34 = vmul.f32 0.2, %v457_v25 }
 0x106   :  { %v618_v36 = vsel %vm520_vm8, %v353_v22, %v569_v30  ;;  %vm521_vm10 = vcmp.gt.f32.partialorder %v356_v31, 0.0  ;;  %v570_v37 = vmul.f32 0.2, %v356_v31  ;;  %vm547_vm11 = vcmp.gt.f32.partialorder %v460_v35, 0.0 }
 0x107   :  { %v1019_v38 = vpack.c.bf16 %v618_v36, %v618_v36  ;;  %v644_v39 = vsel %vm546_vm9, %v457_v25, %v595_v34  ;;  %v596_v40 = vmul.f32 0.2, %v460_v35 }
 0x108   :  { %v619_v41 = vsel %vm521_vm10, %v356_v31, %v570_v37  ;;  %v1045_v42 = vpack.c.bf16 %v644_v39, %v644_v39 }
 0x109   :  { %865 = vst.msk [vmem:[%s1646_s3 + $0x28] sm:$0xf] %vm854_vm4, %v1019_v38  ;;  %v1020_v43 = vpack.c.bf16 %v619_v41, %v619_v41  ;;  %v360_v44 = vpop.f32.mrb[24].mxu0  ;;  %v645_v45 = vsel %vm547_vm11, %v460_v35, %v596_v40  ;;  %v464_v46 = vpop.f32.mrb[24].mxu1 }
 0x10a   :  { %891 = vst.msk [vmem:[%s1646_s3 + $0x90] sm:$0xf] %vm854_vm4, %v1045_v42  ;;  %v361_v47 = vadd.f32 %v1396_v27, %v360_v44  ;;  %v1046_v48 = vpack.c.bf16 %v645_v45, %v645_v45  ;;  %v1112_v49 = vpop.f32.mrb[25].mxu0  ;;  %v465_v50 = vadd.f32 %v1396_v27, %v464_v46  ;;  %v1164_v51 = vpop.f32.mrb[25].mxu1 }
 0x10b   :  { %866 = vst.msk [vmem:[%s1646_s3 + $0x2c] sm:$0xf] %vm854_vm4, %v1020_v43  ;;  %v363_v52 = vpop.f32.mrb[26].mxu0  ;;  %v467_v53 = vpop.f32.mrb[26].mxu1 }
 0x10c   :  { %vm522_vm12 = vcmp.gt.f32.partialorder %v361_v47, 0.0  ;;  %v571_v54 = vmul.f32 0.2, %v361_v47  ;;  %892 = vst.msk [vmem:[%s1646_s3 + $0x94] sm:$0xf] %vm854_vm4, %v1046_v48  ;;  %v364_v55 = vadd.f32 %v1396_v27, %v363_v52  ;;  %v1113_v56 = vpop.f32.mrb[27].mxu0  ;;  %v468_v59 = vadd.f32 %v1396_v27, %v467_v53 }
 0x10d   :  { %vm548_vm13 = vcmp.gt.f32.partialorder %v465_v50, 0.0  ;;  %v1165_v57 = vpop.f32.mrb[27].mxu1  ;;  %v597_v58 = vmul.f32 0.2, %v465_v50 }
 0x10e   :  { %v620_v60 = vsel %vm522_vm12, %v361_v47, %v571_v54  ;;  %vm523_vm14 = vcmp.gt.f32.partialorder %v364_v55, 0.0  ;;  %v572_v61 = vmul.f32 0.2, %v364_v55  ;;  %vm549_vm15 = vcmp.gt.f32.partialorder %v468_v59, 0.0 }
 0x10f   :  { %v1021_v62 = vpack.c.bf16 %v620_v60, %v620_v60  ;;  %v646_v63 = vsel %vm548_vm13, %v465_v50, %v597_v58  ;;  %v598_v0 = vmul.f32 0.2, %v468_v59 }
 0x110   :  { %v621_v1 = vsel %vm523_vm14, %v364_v55, %v572_v61  ;;  %v1047_v2 = vpack.c.bf16 %v646_v63, %v646_v63 }
 0x111   :  { %867 = vst.msk [vmem:[%s1646_s3 + $0x30] sm:$0xf] %vm854_vm4, %v1021_v62  ;;  %v1022_v3 = vpack.c.bf16 %v621_v1, %v621_v1  ;;  %v368_v4 = vpop.f32.mrb[28].mxu0  ;;  %v647_v5 = vsel %vm549_vm15, %v468_v59, %v598_v0  ;;  %v472_v6 = vpop.f32.mrb[28].mxu1 }
 0x112   :  { %893 = vst.msk [vmem:[%s1646_s3 + $0x98] sm:$0xf] %vm854_vm4, %v1047_v2  ;;  %v369_v7 = vadd.f32 %v1396_v27, %v368_v4  ;;  %v1048_v8 = vpack.c.bf16 %v647_v5, %v647_v5  ;;  %v1116_v9 = vpop.f32.mrb[29].mxu0  ;;  %v473_v10 = vadd.f32 %v1396_v27, %v472_v6  ;;  %v1168_v11 = vpop.f32.mrb[29].mxu1 }
 0x113   :  { %868 = vst.msk [vmem:[%s1646_s3 + $0x34] sm:$0xf] %vm854_vm4, %v1022_v3  ;;  %v371_v12 = vpop.f32.mrb[30].mxu0  ;;  %v475_v13 = vpop.f32.mrb[30].mxu1 }
 0x114   :  { %vm524_vm0 = vcmp.gt.f32.partialorder %v369_v7, 0.0  ;;  %v573_v14 = vmul.f32 0.2, %v369_v7  ;;  %894 = vst.msk [vmem:[%s1646_s3 + $0x9c] sm:$0xf] %vm854_vm4, %v1048_v8  ;;  %v372_v15 = vadd.f32 %v1396_v27, %v371_v12  ;;  %v1117_v16 = vpop.f32.mrb[31].mxu0  ;;  %v476_v19 = vadd.f32 %v1396_v27, %v475_v13 }
 0x115   :  { %vm550_vm1 = vcmp.gt.f32.partialorder %v473_v10, 0.0  ;;  %v1169_v17 = vpop.f32.mrb[31].mxu1  ;;  %v599_v18 = vmul.f32 0.2, %v473_v10 }
 0x116   :  { %v622_v20 = vsel %vm524_vm0, %v369_v7, %v573_v14  ;;  %vm525_vm2 = vcmp.gt.f32.partialorder %v372_v15, 0.0  ;;  %v574_v21 = vmul.f32 0.2, %v372_v15  ;;  %vm551_vm3 = vcmp.gt.f32.partialorder %v476_v19, 0.0 }
 0x117   :  { %v1023_v22 = vpack.c.bf16 %v622_v20, %v622_v20  ;;  %v648_v23 = vsel %vm550_vm1, %v473_v10, %v599_v18  ;;  %v600_v24 = vmul.f32 0.2, %v476_v19 }
 0x118   :  { %v623_v25 = vsel %vm525_vm2, %v372_v15, %v574_v21  ;;  %v1049_v26 = vpack.c.bf16 %v648_v23, %v648_v23 }
 0x119   :  { %869 = vst.msk [vmem:[%s1646_s3 + $0x38] sm:$0xf] %vm854_vm4, %v1023_v22  ;;  %v1024_v28 = vpack.c.bf16 %v623_v25, %v623_v25  ;;  %v376_v29 = vpop.f32.mrb[32].mxu0  ;;  %v649_v30 = vsel %vm551_vm3, %v476_v19, %v600_v24  ;;  %v480_v31 = vpop.f32.mrb[32].mxu1 }
 0x11a   :  { %895 = vst.msk [vmem:[%s1646_s3 + $0xa0] sm:$0xf] %vm854_vm4, %v1049_v26  ;;  %v377_v32 = vadd.f32 %v1396_v27, %v376_v29  ;;  %v1050_v33 = vpack.c.bf16 %v649_v30, %v649_v30  ;;  %v1120_v34 = vpop.f32.mrb[33].mxu0  ;;  %v481_v35 = vadd.f32 %v1396_v27, %v480_v31  ;;  %v1172_v36 = vpop.f32.mrb[33].mxu1 }
 0x11b   :  { %870 = vst.msk [vmem:[%s1646_s3 + $0x3c] sm:$0xf] %vm854_vm4, %v1024_v28  ;;  %v379_v37 = vpop.f32.mrb[34].mxu0  ;;  %v483_v38 = vpop.f32.mrb[34].mxu1 }
 0x11c   :  { %vm526_vm5 = vcmp.gt.f32.partialorder %v377_v32, 0.0  ;;  %v575_v39 = vmul.f32 0.2, %v377_v32  ;;  %896 = vst.msk [vmem:[%s1646_s3 + $0xa4] sm:$0xf] %vm854_vm4, %v1050_v33  ;;  %v380_v40 = vadd.f32 %v1396_v27, %v379_v37  ;;  %v1121_v41 = vpop.f32.mrb[35].mxu0  ;;  %v484_v44 = vadd.f32 %v1396_v27, %v483_v38 }
 0x11d   :  { %vm552_vm6 = vcmp.gt.f32.partialorder %v481_v35, 0.0  ;;  %v1173_v42 = vpop.f32.mrb[35].mxu1  ;;  %v601_v43 = vmul.f32 0.2, %v481_v35 }
 0x11e   :  { %v624_v45 = vsel %vm526_vm5, %v377_v32, %v575_v39  ;;  %vm527_vm7 = vcmp.gt.f32.partialorder %v380_v40, 0.0  ;;  %v576_v46 = vmul.f32 0.2, %v380_v40  ;;  %vm553_vm8 = vcmp.gt.f32.partialorder %v484_v44, 0.0 }
 0x11f   :  { %v1025_v47 = vpack.c.bf16 %v624_v45, %v624_v45  ;;  %v650_v48 = vsel %vm552_vm6, %v481_v35, %v601_v43  ;;  %v602_v49 = vmul.f32 0.2, %v484_v44 }
 0x120   :  { %v625_v50 = vsel %vm527_vm7, %v380_v40, %v576_v46  ;;  %v1051_v51 = vpack.c.bf16 %v650_v48, %v650_v48 }
 0x121   :  { %871 = vst.msk [vmem:[%s1646_s3 + $0x40] sm:$0xf] %vm854_vm4, %v1025_v47  ;;  %v1026_v52 = vpack.c.bf16 %v625_v50, %v625_v50  ;;  %v384_v53 = vpop.f32.mrb[36].mxu0  ;;  %v651_v54 = vsel %vm553_vm8, %v484_v44, %v602_v49  ;;  %v488_v55 = vpop.f32.mrb[36].mxu1 }
 0x122   :  { %897 = vst.msk [vmem:[%s1646_s3 + $0xa8] sm:$0xf] %vm854_vm4, %v1051_v51  ;;  %v385_v56 = vadd.f32 %v1396_v27, %v384_v53  ;;  %v1052_v57 = vpack.c.bf16 %v651_v54, %v651_v54  ;;  %v1124_v58 = vpop.f32.mrb[37].mxu0  ;;  %v489_v59 = vadd.f32 %v1396_v27, %v488_v55  ;;  %v1176_v60 = vpop.f32.mrb[37].mxu1 }
 0x123   :  { %872 = vst.msk [vmem:[%s1646_s3 + $0x44] sm:$0xf] %vm854_vm4, %v1026_v52  ;;  %v387_v61 = vpop.f32.mrb[38].mxu0  ;;  %v491_v62 = vpop.f32.mrb[38].mxu1 }
 0x124   :  { %vm528_vm9 = vcmp.gt.f32.partialorder %v385_v56, 0.0  ;;  %v577_v63 = vmul.f32 0.2, %v385_v56  ;;  %898 = vst.msk [vmem:[%s1646_s3 + $0xac] sm:$0xf] %vm854_vm4, %v1052_v57  ;;  %v388_v0 = vadd.f32 %v1396_v27, %v387_v61  ;;  %v1125_v1 = vpop.f32.mrb[39].mxu0  ;;  %v492_v4 = vadd.f32 %v1396_v27, %v491_v62 }
 0x125   :  { %vm554_vm10 = vcmp.gt.f32.partialorder %v489_v59, 0.0  ;;  %v1177_v2 = vpop.f32.mrb[39].mxu1  ;;  %v603_v3 = vmul.f32 0.2, %v489_v59 }
 0x126   :  { %v626_v5 = vsel %vm528_vm9, %v385_v56, %v577_v63  ;;  %vm529_vm11 = vcmp.gt.f32.partialorder %v388_v0, 0.0  ;;  %v578_v6 = vmul.f32 0.2, %v388_v0  ;;  %vm555_vm12 = vcmp.gt.f32.partialorder %v492_v4, 0.0 }
 0x127   :  { %v1027_v7 = vpack.c.bf16 %v626_v5, %v626_v5  ;;  %v652_v8 = vsel %vm554_vm10, %v489_v59, %v603_v3  ;;  %v604_v9 = vmul.f32 0.2, %v492_v4 }
 0x128   :  { %v627_v10 = vsel %vm529_vm11, %v388_v0, %v578_v6  ;;  %v1053_v11 = vpack.c.bf16 %v652_v8, %v652_v8 }
 0x129   :  { %873 = vst.msk [vmem:[%s1646_s3 + $0x48] sm:$0xf] %vm854_vm4, %v1027_v7  ;;  %v1028_v12 = vpack.c.bf16 %v627_v10, %v627_v10  ;;  %v392_v13 = vpop.f32.mrb[40].mxu0  ;;  %v653_v14 = vsel %vm555_vm12, %v492_v4, %v604_v9  ;;  %v496_v15 = vpop.f32.mrb[40].mxu1 }
 0x12a   :  { %899 = vst.msk [vmem:[%s1646_s3 + $0xb0] sm:$0xf] %vm854_vm4, %v1053_v11  ;;  %v393_v16 = vadd.f32 %v1396_v27, %v392_v13  ;;  %v1054_v17 = vpack.c.bf16 %v653_v14, %v653_v14  ;;  %v1128_v18 = vpop.f32.mrb[41].mxu0  ;;  %v497_v19 = vadd.f32 %v1396_v27, %v496_v15  ;;  %v1180_v20 = vpop.f32.mrb[41].mxu1 }
 0x12b   :  { %874 = vst.msk [vmem:[%s1646_s3 + $0x4c] sm:$0xf] %vm854_vm4, %v1028_v12  ;;  %v395_v21 = vpop.f32.mrb[42].mxu0  ;;  %v499_v22 = vpop.f32.mrb[42].mxu1 }
 0x12c   :  { %vm530_vm13 = vcmp.gt.f32.partialorder %v393_v16, 0.0  ;;  %v579_v23 = vmul.f32 0.2, %v393_v16  ;;  %900 = vst.msk [vmem:[%s1646_s3 + $0xb4] sm:$0xf] %vm854_vm4, %v1054_v17  ;;  %v396_v24 = vadd.f32 %v1396_v27, %v395_v21  ;;  %v1129_v25 = vpop.f32.mrb[43].mxu0  ;;  %v500_v29 = vadd.f32 %v1396_v27, %v499_v22 }
 0x12d   :  { %vm556_vm14 = vcmp.gt.f32.partialorder %v497_v19, 0.0  ;;  %v1181_v26 = vpop.f32.mrb[43].mxu1  ;;  %v605_v28 = vmul.f32 0.2, %v497_v19 }
 0x12e   :  { %v628_v30 = vsel %vm530_vm13, %v393_v16, %v579_v23  ;;  %vm531_vm15 = vcmp.gt.f32.partialorder %v396_v24, 0.0  ;;  %v580_v31 = vmul.f32 0.2, %v396_v24  ;;  %vm557_vm0 = vcmp.gt.f32.partialorder %v500_v29, 0.0 }
 0x12f   :  { %v1029_v32 = vpack.c.bf16 %v628_v30, %v628_v30  ;;  %v654_v33 = vsel %vm556_vm14, %v497_v19, %v605_v28  ;;  %v606_v34 = vmul.f32 0.2, %v500_v29 }
 0x130   :  { %v629_v35 = vsel %vm531_vm15, %v396_v24, %v580_v31  ;;  %v1055_v36 = vpack.c.bf16 %v654_v33, %v654_v33 }
 0x131   :  { %875 = vst.msk [vmem:[%s1646_s3 + $0x50] sm:$0xf] %vm854_vm4, %v1029_v32  ;;  %v1030_v37 = vpack.c.bf16 %v629_v35, %v629_v35  ;;  %v400_v38 = vpop.f32.mrb[44].mxu0  ;;  %v655_v39 = vsel %vm557_vm0, %v500_v29, %v606_v34  ;;  %v504_v40 = vpop.f32.mrb[44].mxu1 }
 0x132   :  { %901 = vst.msk [vmem:[%s1646_s3 + $0xb8] sm:$0xf] %vm854_vm4, %v1055_v36  ;;  %v401_v41 = vadd.f32 %v1396_v27, %v400_v38  ;;  %v1056_v42 = vpack.c.bf16 %v655_v39, %v655_v39  ;;  %v1132_v43 = vpop.f32.mrb[45].mxu0  ;;  %v505_v44 = vadd.f32 %v1396_v27, %v504_v40  ;;  %v1184_v45 = vpop.f32.mrb[45].mxu1 }
 0x133   :  { %876 = vst.msk [vmem:[%s1646_s3 + $0x54] sm:$0xf] %vm854_vm4, %v1030_v37  ;;  %v403_v46 = vpop.f32.mrb[46].mxu0  ;;  %v507_v47 = vpop.f32.mrb[46].mxu1 }
 0x134   :  { %vm532_vm1 = vcmp.gt.f32.partialorder %v401_v41, 0.0  ;;  %v581_v48 = vmul.f32 0.2, %v401_v41  ;;  %902 = vst.msk [vmem:[%s1646_s3 + $0xbc] sm:$0xf] %vm854_vm4, %v1056_v42  ;;  %v404_v49 = vadd.f32 %v1396_v27, %v403_v46  ;;  %v1133_v50 = vpop.f32.mrb[47].mxu0 }
 0x135   :  { %vm558_vm2 = vcmp.gt.f32.partialorder %v505_v44, 0.0  ;;  %v1185_v51 = vpop.f32.mrb[47].mxu1  ;;  %v607_v52 = vmul.f32 0.2, %v505_v44 }
 0x136   :  { %v630_v53 = vsel %vm532_vm1, %v401_v41, %v581_v48  ;;  %vm533_vm3 = vcmp.gt.f32.partialorder %v404_v49, 0.0  ;;  %v582_v54 = vmul.f32 0.2, %v404_v49 }
 0x137   :  { %v1031_v55 = vpack.c.bf16 %v630_v53, %v630_v53  ;;  %v656_v56 = vsel %vm558_vm2, %v505_v44, %v607_v52 }
 0x138   :  { %v631_v57 = vsel %vm533_vm3, %v404_v49, %v582_v54  ;;  %v1057_v58 = vpack.c.bf16 %v656_v56, %v656_v56 }
 0x139   :  { %877 = vst.msk [vmem:[%s1646_s3 + $0x58] sm:$0xf] %vm854_vm4, %v1031_v55  ;;  %v1032_v59 = vpack.c.bf16 %v631_v57, %v631_v57  ;;  %v408_v60 = vpop.f32.mrb[48].mxu0 }
 0x13a   :  { %903 = vst.msk [vmem:[%s1646_s3 + $0xc0] sm:$0xf] %vm854_vm4, %v1057_v58  ;;  %v409_v61 = vadd.f32 %v1396_v27, %v408_v60  ;;  %v1136_v62 = vpop.f32.mrb[49].mxu0 }
 0x13b   :  { %878 = vst.msk [vmem:[%s1646_s3 + $0x5c] sm:$0xf] %vm854_vm4, %v1032_v59  ;;  %v411_v63 = vpop.f32.mrb[50].mxu0 }
 0x13c   :  { %vm534_vm5 = vcmp.gt.f32.partialorder %v409_v61, 0.0  ;;  %v583_v0 = vmul.f32 0.2, %v409_v61  ;;  %v412_v1 = vadd.f32 %v1396_v27, %v411_v63  ;;  %v1137_v2 = vpop.f32.mrb[51].mxu0 }
 0x13e   :  { %v632_v3 = vsel %vm534_vm5, %v409_v61, %v583_v0  ;;  %vm535_vm6 = vcmp.gt.f32.partialorder %v412_v1, 0.0  ;;  %v584_v4 = vmul.f32 0.2, %v412_v1 }
 0x13f   :  { %v1033_v5 = vpack.c.bf16 %v632_v3, %v632_v3 }
 0x140   :  { %v633_v6 = vsel %vm535_vm6, %v412_v1, %v584_v4 }
 0x141   :  { %879 = vst.msk [vmem:[%s1646_s3 + $0x60] sm:$0xf] %vm854_vm4, %v1033_v5  ;;  %v1034_v7 = vpack.c.bf16 %v633_v6, %v633_v6 }
 0x143   :  { %880 = vst.msk [vmem:[%s1646_s3 + $0x64] sm:$0xf] %vm854_vm4, %v1034_v7 }

// kernel: discriminator_forward.4
= control target key start
LH: loop header
LB: loop body
LE: loop exit
PB: predicated region body
PF: predicated region fallthrough
CT: control target
= control target key end

     0   :  { %vm1213_vm0 = vcmask 1041408   ;;  %s2395_s1 = inlined_call_operand.vmem [shape: bf16[1024,128], index: 1, kind: input, shape index: {}]   ;;  %s2396_s0 = inlined_call_operand.vmem [shape: bf16[98,1024], index: 0, kind: input, shape index: {}]   ;;  %s2397_s2 = inlined_call_operand.vmem [shape: f32[1,128], index: 2, kind: input, shape index: {}]   ;;  %s2398_s3 = inlined_call_operand.vmem [shape: f32[1,128], index: 3, kind: input, shape index: {}]   ;;  %s2399_s4 = inlined_call_operand.vmem [shape: bf16[98,128], index: 4, kind: output, shape index: {}]  }
   0x1   :  { %v1835_v0 = vld [vmem:[%s2395_s1 + $0x40] sm:$0xff]   ;;  %v1839_v4 = vld [vmem:[%s2395_s1 + $0x48] sm:$0xff]   ;;  %v1843_v8 = vld [vmem:[%s2395_s1 + $0x50] sm:$0xff]  }
   0x2   :  { %v1836_v1 = vld [vmem:[%s2395_s1 + $0xc0] sm:$0xff]   ;;  %1603 = vmatprep.subr.bf16.mxu0 %v1835_v0  ;;  %v1840_v5 = vld [vmem:[%s2395_s1 + $0xc8] sm:$0xff]   ;;  %v1844_v9 = vld [vmem:[%s2395_s1 + $0xd0] sm:$0xff]  }
   0x3   :  { %v1837_v2 = vld [vmem:[%s2395_s1] sm:$0xff]   ;;  %1661 = vmatprep.subr.bf16.mxu1 %v1836_v1  ;;  %v1841_v6 = vld [vmem:[%s2395_s1 + $0x8] sm:$0xff]   ;;  %v1845_v10 = vld [vmem:[%s2395_s1 + $0x10] sm:$0xff]  }
   0x4   :  { %v1838_v3 = vld [vmem:[%s2395_s1 + $0x80] sm:$0xff]   ;;  %1604 = vmatpush3.bf16.msra.mxu0 %v1837_v2  ;;  %v1842_v7 = vld [vmem:[%s2395_s1 + $0x88] sm:$0xff]   ;;  %v1846_v11 = vld [vmem:[%s2395_s1 + $0x90] sm:$0xff]  }
   0x5   :  { %1662 = vmatpush3.bf16.msra.mxu1 %v1838_v3  ;;  %1605 = vmatprep.subr.bf16.mxu0 %v1839_v4  ;;  %v1847_v12 = vld [vmem:[%s2395_s1 + $0x58] sm:$0xff]   ;;  %v1851_v16 = vld [vmem:[%s2395_s1 + $0x60] sm:$0xff]   ;;  %v1855_v20 = vld [vmem:[%s2395_s1 + $0x68] sm:$0xff]  }
   0x6   :  { %1663 = vmatprep.subr.bf16.mxu1 %v1840_v5  ;;  %v1848_v13 = vld [vmem:[%s2395_s1 + $0xd8] sm:$0xff]   ;;  %v1852_v17 = vld [vmem:[%s2395_s1 + $0xe0] sm:$0xff]   ;;  %v1856_v21 = vld [vmem:[%s2395_s1 + $0xe8] sm:$0xff]  }
   0x7   :  { %v1849_v14 = vld [vmem:[%s2395_s1 + $0x18] sm:$0xff]   ;;  %v1853_v18 = vld [vmem:[%s2395_s1 + $0x20] sm:$0xff]   ;;  %v1857_v22 = vld [vmem:[%s2395_s1 + $0x28] sm:$0xff]  }
   0x8   :  { %1606 = vmatpush3.bf16.msra.mxu0 %v1841_v6  ;;  %v1850_v15 = vld [vmem:[%s2395_s1 + $0x98] sm:$0xff]   ;;  %v1854_v19 = vld [vmem:[%s2395_s1 + $0xa0] sm:$0xff]   ;;  %v1858_v23 = vld [vmem:[%s2395_s1 + $0xa8] sm:$0xff]  }
   0x9   :  { %1664 = vmatpush3.bf16.msra.mxu1 %v1842_v7  ;;  %1607 = vmatprep.subr.bf16.mxu0 %v1843_v8  ;;  %v1859_v24 = vld [vmem:[%s2395_s1 + $0x70] sm:$0xff]   ;;  %v1863_v28 = vld [vmem:[%s2395_s1 + $0x78] sm:$0xff]   ;;  %v18_v32 = vld [vmem:[%s2396_s0] sm:$0xff] }
   0xa   :  { %1665 = vmatprep.subr.bf16.mxu1 %v1844_v9  ;;  %v1860_v25 = vld [vmem:[%s2395_s1 + $0xf0] sm:$0xff]   ;;  %v1864_v29 = vld [vmem:[%s2395_s1 + $0xf8] sm:$0xff]   ;;  %v22_v33 = vld [vmem:[%s2396_s0 + $0x20] sm:$0xff] }
   0xb   :  { %v1861_v26 = vld [vmem:[%s2395_s1 + $0x30] sm:$0xff]   ;;  %v1865_v30 = vld [vmem:[%s2395_s1 + $0x38] sm:$0xff]   ;;  %v19_v34 = vld [vmem:[%s2396_s0 + $0x8] sm:$0xff]  ;;  %v1421_v35 = vcombine.low %v18_v32, %v22_v33  ;;  %v1422_v36 = vcombine.high %v18_v32, %v22_v33 }
   0xc   :  { %1608 = vmatpush3.bf16.msra.mxu0 %v1845_v10  ;;  %v1862_v27 = vld [vmem:[%s2395_s1 + $0xb0] sm:$0xff]   ;;  %v1866_v31 = vld [vmem:[%s2395_s1 + $0xb8] sm:$0xff]   ;;  %v23_v37 = vld [vmem:[%s2396_s0 + $0x28] sm:$0xff] }
   0xd   :  { %1666 = vmatpush3.bf16.msra.mxu1 %v1846_v11  ;;  %1609 = vmatprep.subr.bf16.mxu0 %v1847_v12  ;;  %v1423_v38 = vcombine.low %v19_v34, %v23_v37  ;;  %v1424_v39 = vcombine.high %v19_v34, %v23_v37  ;;  %v1867_v40 = vld [vmem:[%s2395_s1 + $0x140] sm:$0xff]   ;;  %v27_v47 = vld [vmem:[%s2396_s0 + $0x48] sm:$0xff]  ;;  %v1875_v56 = vld [vmem:[%s2395_s1 + $0x150] sm:$0xff]  }
   0xe   :  { %1667 = vmatprep.subr.bf16.mxu1 %v1848_v13  ;;  %882 = vmatprep.mubr.bf16.mxu0 %v1422_v36  ;;  %v1868_v41 = vld [vmem:[%s2395_s1 + $0x100] sm:$0xff]   ;;  %v31_v48 = vld [vmem:[%s2396_s0 + $0x68] sm:$0xff]  ;;  %v1876_v63 = vld [vmem:[%s2395_s1 + $0x110] sm:$0xff]  }
   0xf   :  { %970 = vmatprep.mubr.bf16.mxu1 %v1424_v39  ;;  %v1869_v42 = vld [vmem:[%s2395_s1 + $0x1c0] sm:$0xff]   ;;  %v1432_v49 = vcombine.high %v27_v47, %v31_v48  ;;  %v1871_v50 = vld [vmem:[%s2395_s1 + $0x148] sm:$0xff]   ;;  %v1431_v53 = vcombine.low %v27_v47, %v31_v48  ;;  %v1877_v0 = vld [vmem:[%s2395_s1 + $0x1d0] sm:$0xff]  }
  0x10   :  { %1610 = vmatpush3.bf16.msra.mxu0 %v1849_v14  ;;  %v1870_v43 = vld [vmem:[%s2395_s1 + $0x180] sm:$0xff]   ;;  %v1872_v52 = vld [vmem:[%s2395_s1 + $0x108] sm:$0xff]   ;;  %v1878_v1 = vld [vmem:[%s2395_s1 + $0x190] sm:$0xff]  }
  0x11   :  { %1668 = vmatpush3.bf16.msra.mxu1 %v1850_v15  ;;  %1611 = vmatprep.subr.bf16.mxu0 %v1851_v16  ;;  %v26_v44 = vld [vmem:[%s2396_s0 + $0x40] sm:$0xff]  ;;  %v1873_v54 = vld [vmem:[%s2395_s1 + $0x1c8] sm:$0xff]   ;;  %v1879_v3 = vld [vmem:[%s2395_s1 + $0x158] sm:$0xff]  }
  0x12   :  { %1669 = vmatprep.subr.bf16.mxu1 %v1852_v17  ;;  %v30_v45 = vld [vmem:[%s2396_s0 + $0x60] sm:$0xff]  ;;  %v1874_v55 = vld [vmem:[%s2395_s1 + $0x188] sm:$0xff]   ;;  %v1880_v5 = vld [vmem:[%s2395_s1 + $0x118] sm:$0xff]  }
  0x13   :  { %v1430_v46 = vcombine.high %v26_v44, %v30_v45  ;;  %v1429_v51 = vcombine.low %v26_v44, %v30_v45  ;;  %v34_v57 = vld [vmem:[%s2396_s0 + $0x80] sm:$0xff]  ;;  %v35_v59 = vld [vmem:[%s2396_s0 + $0x88] sm:$0xff]  ;;  %v1881_v12 = vld [vmem:[%s2395_s1 + $0x1d8] sm:$0xff]  }
  0x14   :  { %1612 = vmatpush3.bf16.msra.mxu0 %v1853_v18  ;;  %v38_v58 = vld [vmem:[%s2396_s0 + $0xa0] sm:$0xff]  ;;  %v39_v60 = vld [vmem:[%s2396_s0 + $0xa8] sm:$0xff]  ;;  %v1882_v13 = vld [vmem:[%s2395_s1 + $0x198] sm:$0xff]  }
  0x15   :  { %1670 = vmatpush3.bf16.msra.mxu1 %v1854_v19  ;;  %1613 = vmatprep.subr.bf16.mxu0 %v1855_v20  ;;  %v1438_v61 = vcombine.high %v34_v57, %v38_v58  ;;  %v1440_v62 = vcombine.high %v35_v59, %v39_v60  ;;  %v1437_v2 = vcombine.low %v34_v57, %v38_v58  ;;  %v42_v6 = vld [vmem:[%s2396_s0 + $0xc0] sm:$0xff]  ;;  %v43_v8 = vld [vmem:[%s2396_s0 + $0xc8] sm:$0xff]  ;;  %v1899_v44 = vld [vmem:[%s2395_s1 + $0x178] sm:$0xff]  }
  0x16   :  { %1671 = vmatprep.subr.bf16.mxu1 %v1856_v21  ;;  %v1439_v4 = vcombine.low %v35_v59, %v39_v60  ;;  %v46_v7 = vld [vmem:[%s2396_s0 + $0xe0] sm:$0xff]  ;;  %v47_v10 = vld [vmem:[%s2396_s0 + $0xe8] sm:$0xff]  ;;  %v1900_v45 = vld [vmem:[%s2395_s1 + $0x138] sm:$0xff]  }
  0x17   :  { %v1446_v9 = vcombine.high %v42_v6, %v46_v7  ;;  %v1448_v11 = vcombine.high %v43_v8, %v47_v10  ;;  %v1883_v14 = vld [vmem:[%s2395_s1 + $0x160] sm:$0xff]   ;;  %v1445_v16 = vcombine.low %v42_v6, %v46_v7  ;;  %v1447_v20 = vcombine.low %v43_v8, %v47_v10  ;;  %v59_v32 = vld [vmem:[%s2396_s0 + $0x148] sm:$0xff]  ;;  %v1902_v48 = vld [vmem:[%s2395_s1 + $0x1b8] sm:$0xff]  }
  0x18   :  { %1614 = vmatpush3.bf16.msra.mxu0 %v1857_v22  ;;  %v1884_v15 = vld [vmem:[%s2395_s1 + $0x120] sm:$0xff]   ;;  %v51_v22 = vld [vmem:[%s2396_s0 + $0x108] sm:$0xff]  ;;  %v28_v60 = vld [vmem:[%s2396_s0 + $0x50] sm:$0xff] }
  0x19   :  { %1672 = vmatpush3.bf16.msra.mxu1 %v1858_v23  ;;  %1615 = vmatprep.subr.bf16.mxu0 %v1859_v24  ;;  %v1885_v17 = vld [vmem:[%s2395_s1 + $0x1e0] sm:$0xff]   ;;  %v55_v23 = vld [vmem:[%s2396_s0 + $0x128] sm:$0xff]  ;;  %v37_v6 = vld [vmem:[%s2396_s0 + $0x98] sm:$0xff] }
  0x1a   :  { %1673 = vmatprep.subr.bf16.mxu1 %v1860_v25  ;;  %v50_v18 = vld [vmem:[%s2396_s0 + $0x100] sm:$0xff]  ;;  %v1456_v24 = vcombine.high %v51_v22, %v55_v23  ;;  %v63_v33 = vld [vmem:[%s2396_s0 + $0x168] sm:$0xff]  ;;  %v1455_v36 = vcombine.low %v51_v22, %v55_v23  ;;  %v41_v7 = vld [vmem:[%s2396_s0 + $0xb8] sm:$0xff] }
  0x1b   :  { %v54_v19 = vld [vmem:[%s2396_s0 + $0x120] sm:$0xff]  ;;  %v1464_v39 = vcombine.high %v59_v32, %v63_v33  ;;  %v53_v22 = vld [vmem:[%s2396_s0 + $0x118] sm:$0xff] }
  0x1c   :  { %1616 = vmatpush3.bf16.msra.mxu0 %v1861_v26  ;;  %v1454_v21 = vcombine.high %v50_v18, %v54_v19  ;;  %v1886_v25 = vld [vmem:[%s2395_s1 + $0x1a0] sm:$0xff]   ;;  %v1887_v26 = vld [vmem:[%s2395_s1 + $0x168] sm:$0xff]   ;;  %v1453_v34 = vcombine.low %v50_v18, %v54_v19  ;;  %v57_v23 = vld [vmem:[%s2396_s0 + $0x138] sm:$0xff] }
  0x1d   :  { %1674 = vmatpush3.bf16.msra.mxu1 %v1862_v27  ;;  %1617 = vmatprep.subr.bf16.mxu0 %v1863_v28  ;;  %v1888_v27 = vld [vmem:[%s2395_s1 + $0x128] sm:$0xff]  }
  0x1e   :  { %1675 = vmatprep.subr.bf16.mxu1 %v1864_v29  ;;  %v1889_v28 = vld [vmem:[%s2395_s1 + $0x1e8] sm:$0xff]  }
  0x1f   :  { %v1890_v29 = vld [vmem:[%s2395_s1 + $0x1a8] sm:$0xff]  }
  0x20   :  { %1618 = vmatpush3.bf16.msra.mxu0 %v1865_v30  ;;  %v58_v30 = vld [vmem:[%s2396_s0 + $0x140] sm:$0xff] }
  0x21   :  { %1676 = vmatpush3.bf16.msra.mxu1 %v1866_v31  ;;  %1719 = vmatprep.subr.bf16.mxu0 %v1867_v40  ;;  %v62_v31 = vld [vmem:[%s2396_s0 + $0x160] sm:$0xff]  ;;  %v1893_v40 = vld [vmem:[%s2395_s1 + $0x1f0] sm:$0xff]  }
  0x22   :  { %1777 = vmatprep.subr.bf16.mxu1 %v1869_v42  ;;  %v1462_v37 = vcombine.high %v58_v30, %v62_v31  ;;  %v66_v42 = vld [vmem:[%s2396_s0 + $0x180] sm:$0x11]  ;;  %v1461_v47 = vcombine.low %v58_v30, %v62_v31  ;;  %v61_v30 = vld [vmem:[%s2396_s0 + $0x158] sm:$0xff] }
  0x23   :  { %883 = vmatmul.mubr.bf16.vlgmr.msra.gmra.mrb[0].mxu0 %v1421_v35  ;;  %v1891_v35 = vld [vmem:[%s2395_s1 + $0x170] sm:$0xff]   ;;  %v65_v31 = vld [vmem:[%s2396_s0 + $0x178] sm:$0xff] }
  0x24   :  { %971 = vmatmul.mubr.bf16.vlgmr.msra.gmra.mrb[0].mxu1 %v1423_v38  ;;  %1720 = vmatpush3.bf16.msra.mxu0 %v1868_v41  ;;  %v1892_v38 = vld [vmem:[%s2395_s1 + $0x130] sm:$0xff]  }
  0x25   :  { %1778 = vmatpush3.bf16.msra.mxu1 %v1870_v43  ;;  %890 = vmatprep.mubr.bf16.mxu0 %v1430_v46  ;;  %v1894_v41 = vld [vmem:[%s2395_s1 + $0x1b0] sm:$0xff]   ;;  %v67_v43 = vld [vmem:[%s2396_s0 + $0x188] sm:$0x11]  ;;  %v1901_v46 = vld [vmem:[%s2395_s1 + $0x1f8] sm:$0xff]  }
  0x26   :  { %978 = vmatprep.mubr.bf16.mxu1 %v1432_v49  ;;  %1721 = vmatprep.subr.bf16.mxu0 %v1871_v50  ;;  %v1463_v49 = vcombine.low %v59_v32, %v63_v33  ;;  %v1470_v50 = vcombine.high %v66_v42, %v66_v42  ;;  %v1471_v57 = vcombine.low %v67_v43, %v67_v43 }
  0x27   :  { %1779 = vmatprep.subr.bf16.mxu1 %v1873_v54  ;;  %v21_v54 = vld [vmem:[%s2396_s0 + $0x18] sm:$0xff]  ;;  %v1459_v33 = vcombine.low %v53_v22, %v57_v23 }
  0x28   :  { %1722 = vmatpush3.bf16.msra.mxu0 %v1872_v52  ;;  %v20_v52 = vld [vmem:[%s2396_s0 + $0x10] sm:$0xff] }
  0x29   :  { %1780 = vmatpush3.bf16.msra.mxu1 %v1874_v55  ;;  %1723 = vmatprep.subr.bf16.mxu0 %v1875_v56  ;;  %v25_v55 = vld [vmem:[%s2396_s0 + $0x38] sm:$0xff]  ;;  %v1469_v56 = vcombine.low %v66_v42, %v66_v42 }
  0x2a   :  { %1781 = vmatprep.subr.bf16.mxu1 %v1877_v0  ;;  %v1428_v59 = vcombine.high %v21_v54, %v25_v55 }
  0x2b   :  { %891 = vmatmul.mubr.bf16.gmra.mrb[4].mxu0 %v1429_v51  ;;  %v1472_v51 = vcombine.high %v67_v43, %v67_v43 }
  0x2c   :  { %979 = vmatmul.mubr.bf16.gmra.mrb[4].mxu1 %v1431_v53  ;;  %898 = vmatprep.mubr.bf16.mxu0 %v1438_v61  ;;  %v24_v53 = vld [vmem:[%s2396_s0 + $0x30] sm:$0xff] }
  0x2d   :  { %986 = vmatprep.mubr.bf16.mxu1 %v1440_v62  ;;  %1724 = vmatpush3.bf16.msra.mxu0 %v1876_v63  ;;  %v1426_v58 = vcombine.high %v20_v52, %v24_v53  ;;  %v32_v61 = vld [vmem:[%s2396_s0 + $0x70] sm:$0xff]  ;;  %v29_v62 = vld [vmem:[%s2396_s0 + $0x58] sm:$0xff]  ;;  %v1425_v0 = vcombine.low %v20_v52, %v24_v53 }
  0x2e   :  { %1782 = vmatpush3.bf16.msra.mxu1 %v1878_v1  ;;  %1725 = vmatprep.subr.bf16.mxu0 %v1879_v3  ;;  %v33_v63 = vld [vmem:[%s2396_s0 + $0x78] sm:$0xff]  ;;  %v1427_v1 = vcombine.low %v21_v54, %v25_v55  ;;  %v1433_v8 = vcombine.low %v28_v60, %v32_v61 }
  0x2f   :  { %1783 = vmatprep.subr.bf16.mxu1 %v1881_v12  ;;  %v1436_v3 = vcombine.high %v29_v62, %v33_v63  ;;  %v44_v12 = vld [vmem:[%s2396_s0 + $0xd0] sm:$0xff] }
  0x31   :  { %1726 = vmatpush3.bf16.msra.mxu0 %v1880_v5  ;;  %v40_v5 = vld [vmem:[%s2396_s0 + $0xb0] sm:$0xff] }
  0x32   :  { %1784 = vmatpush3.bf16.msra.mxu1 %v1882_v13  ;;  %1727 = vmatprep.subr.bf16.mxu0 %v1883_v14  ;;  %v48_v13 = vld [vmem:[%s2396_s0 + $0xf0] sm:$0xff]  ;;  %v45_v14 = vld [vmem:[%s2396_s0 + $0xd8] sm:$0xff] }
  0x33   :  { %899 = vmatmul.mubr.bf16.gmra.mrb[8].mxu0 %v1437_v2  ;;  %1785 = vmatprep.subr.bf16.mxu1 %v1885_v17  ;;  %v1434_v2 = vcombine.high %v28_v60, %v32_v61  ;;  %v1443_v17 = vcombine.low %v37_v6, %v41_v7  ;;  %v1450_v18 = vcombine.high %v44_v12, %v48_v13 }
  0x34   :  { %987 = vmatmul.mubr.bf16.gmra.mrb[8].mxu1 %v1439_v4  ;;  %906 = vmatprep.mubr.bf16.mxu0 %v1446_v9  ;;  %v36_v4 = vld [vmem:[%s2396_s0 + $0x90] sm:$0xff]  ;;  %v1435_v9 = vcombine.low %v29_v62, %v33_v63 }
  0x35   :  { %994 = vmatprep.mubr.bf16.mxu1 %v1448_v11  ;;  %1728 = vmatpush3.bf16.msra.mxu0 %v1884_v15  ;;  %v1442_v10 = vcombine.high %v36_v4, %v40_v5  ;;  %v1444_v11 = vcombine.high %v37_v6, %v41_v7  ;;  %v49_v15 = vld [vmem:[%s2396_s0 + $0xf8] sm:$0xff] }
  0x36   :  { %1786 = vmatpush3.bf16.msra.mxu1 %v1886_v25  ;;  %1729 = vmatprep.subr.bf16.mxu0 %v1887_v26  ;;  %v1452_v19 = vcombine.high %v45_v14, %v49_v15  ;;  %v1451_v25 = vcombine.low %v45_v14, %v49_v15 }
  0x37   :  { %1787 = vmatprep.subr.bf16.mxu1 %v1889_v28  ;;  %v60_v28 = vld [vmem:[%s2396_s0 + $0x150] sm:$0xff] }
  0x39   :  { %1730 = vmatpush3.bf16.msra.mxu0 %v1888_v27  ;;  %v1460_v27 = vcombine.high %v53_v22, %v57_v23 }
  0x3a   :  { %1788 = vmatpush3.bf16.msra.mxu1 %v1890_v29  ;;  %1731 = vmatprep.subr.bf16.mxu0 %v1891_v35  ;;  %v64_v29 = vld [vmem:[%s2396_s0 + $0x170] sm:$0xff]  ;;  %v1468_v35 = vcombine.high %v61_v30, %v65_v31 }
  0x3b   :  { %907 = vmatmul.mubr.bf16.gmra.mrb[12].mxu0 %v1445_v16  ;;  %1789 = vmatprep.subr.bf16.mxu1 %v1893_v40  ;;  %v1441_v16 = vcombine.low %v36_v4, %v40_v5 }
  0x3c   :  { %995 = vmatmul.mubr.bf16.gmra.mrb[12].mxu1 %v1447_v20  ;;  %914 = vmatprep.mubr.bf16.mxu0 %v1454_v21  ;;  %v52_v20 = vld [vmem:[%s2396_s0 + $0x110] sm:$0xff] }
  0x3d   :  { %1002 = vmatprep.mubr.bf16.mxu1 %v1456_v24  ;;  %1732 = vmatpush3.bf16.msra.mxu0 %v1892_v38  ;;  %v56_v21 = vld [vmem:[%s2396_s0 + $0x130] sm:$0xff]  ;;  %v1449_v24 = vcombine.low %v44_v12, %v48_v13  ;;  %v1465_v38 = vcombine.low %v60_v28, %v64_v29 }
  0x3e   :  { %1790 = vmatpush3.bf16.msra.mxu1 %v1894_v41  ;;  %1733 = vmatprep.subr.bf16.mxu0 %v1899_v44  ;;  %v1458_v26 = vcombine.high %v52_v20, %v56_v21  ;;  %v1457_v32 = vcombine.low %v52_v20, %v56_v21 }
  0x3f   :  { %1791 = vmatprep.subr.bf16.mxu1 %v1901_v46 }
  0x41   :  { %1734 = vmatpush3.bf16.msra.mxu0 %v1900_v45 }
  0x42   :  { %1792 = vmatpush3.bf16.msra.mxu1 %v1902_v48 }
  0x43   :  { %915 = vmatmul.mubr.bf16.gmra.mrb[16].mxu0 %v1453_v34  ;;  %v1466_v34 = vcombine.high %v60_v28, %v64_v29 }
  0x44   :  { %1003 = vmatmul.mubr.bf16.gmra.mrb[16].mxu1 %v1455_v36  ;;  %922 = vmatprep.mubr.bf16.mxu0 %v1462_v37  ;;  %v68_v36 = vld [vmem:[%s2396_s0 + $0x190] sm:$0x11]  ;;  %v69_v37 = vld [vmem:[%s2396_s0 + $0x198] sm:$0x11] }
  0x45   :  { %1010 = vmatprep.mubr.bf16.mxu1 %v1464_v39  ;;  %v1467_v39 = vcombine.low %v61_v30, %v65_v31  ;;  %v1474_v40 = vcombine.high %v68_v36, %v68_v36  ;;  %v1476_v41 = vcombine.high %v69_v37, %v69_v37  ;;  %v1473_v42 = vcombine.low %v68_v36, %v68_v36 }
  0x46   :  { %v1475_v43 = vcombine.low %v69_v37, %v69_v37 }
  0x4b   :  { %923 = vmatmul.mubr.bf16.gmra.mrb[20].mxu0 %v1461_v47 }
  0x4c   :  { %1011 = vmatmul.mubr.bf16.gmra.mrb[20].mxu1 %v1463_v49  ;;  %930 = vmatprep.mubr.bf16.mxu0 %v1470_v50 }
  0x4d   :  { %1018 = vmatprep.mubr.bf16.mxu1 %v1472_v51 }
  0x53   :  { %931 = vmatmul.mubr.bf16.gmra.mrb[24].mxu0 %v1469_v56 }
  0x54   :  { %1019 = vmatmul.mubr.bf16.gmra.mrb[24].mxu1 %v1471_v57  ;;  %1058 = vmatprep.mubr.bf16.mxu0 %v1426_v58 }
  0x55   :  { %1146 = vmatprep.mubr.bf16.mxu1 %v1428_v59 }
  0x5b   :  { %1059 = vmatmul.mubr.bf16.vlgmr.msra.gmra.mrb[28].mxu0 %v1425_v0 }
  0x5c   :  { %1147 = vmatmul.mubr.bf16.vlgmr.msra.gmra.mrb[28].mxu1 %v1427_v1  ;;  %1066 = vmatprep.mubr.bf16.mxu0 %v1434_v2 }
  0x5d   :  { %1154 = vmatprep.mubr.bf16.mxu1 %v1436_v3 }
  0x63   :  { %1067 = vmatmul.mubr.bf16.gmra.mrb[32].mxu0 %v1433_v8 }
  0x64   :  { %1155 = vmatmul.mubr.bf16.gmra.mrb[32].mxu1 %v1435_v9  ;;  %1074 = vmatprep.mubr.bf16.mxu0 %v1442_v10 }
  0x65   :  { %1162 = vmatprep.mubr.bf16.mxu1 %v1444_v11 }
  0x6b   :  { %1075 = vmatmul.mubr.bf16.gmra.mrb[36].mxu0 %v1441_v16 }
  0x6c   :  { %1163 = vmatmul.mubr.bf16.gmra.mrb[36].mxu1 %v1443_v17  ;;  %1082 = vmatprep.mubr.bf16.mxu0 %v1450_v18 }
  0x6d   :  { %1170 = vmatprep.mubr.bf16.mxu1 %v1452_v19 }
  0x73   :  { %1083 = vmatmul.mubr.bf16.gmra.mrb[40].mxu0 %v1449_v24 }
  0x74   :  { %1171 = vmatmul.mubr.bf16.gmra.mrb[40].mxu1 %v1451_v25  ;;  %1090 = vmatprep.mubr.bf16.mxu0 %v1458_v26 }
  0x75   :  { %1178 = vmatprep.mubr.bf16.mxu1 %v1460_v27 }
  0x7b   :  { %1091 = vmatmul.mubr.bf16.gmra.mrb[44].mxu0 %v1457_v32 }
  0x7c   :  { %1179 = vmatmul.mubr.bf16.gmra.mrb[44].mxu1 %v1459_v33  ;;  %1098 = vmatprep.mubr.bf16.mxu0 %v1466_v34 }
  0x7d   :  { %1186 = vmatprep.mubr.bf16.mxu1 %v1468_v35 }
  0x83   :  { %1099 = vmatmul.mubr.bf16.gmra.mrb[48].mxu0 %v1465_v38 }
  0x84   :  { %1187 = vmatmul.mubr.bf16.gmra.mrb[48].mxu1 %v1467_v39  ;;  %1106 = vmatprep.mubr.bf16.mxu0 %v1474_v40 }
  0x85   :  { %1194 = vmatprep.mubr.bf16.mxu1 %v1476_v41 }
  0x8b   :  { %1107 = vmatmul.mubr.bf16.gmra.mrb[52].mxu0 %v1473_v42 }
  0x8c   :  { %1195 = vmatmul.mubr.bf16.gmra.mrb[52].mxu1 %v1475_v43 }
  0xf6   :  { %v1619_v44 = vpop.f32.mrb[0].mxu0 }
  0xf7   :  { %v1677_v45 = vpop.f32.mrb[0].mxu1  ;;  %v1620_v46 = vpop.f32.mrb[1].mxu0 }
  0xf8   :  { %v1621_v47 = vadd.f32 %v1620_v46, %v1619_v44  ;;  %v1678_v48 = vpop.f32.mrb[1].mxu1  ;;  %v1622_v49 = vpop.f32.mrb[2].mxu0 }
  0xf9   :  { %v1679_v50 = vadd.f32 %v1678_v48, %v1677_v45  ;;  %v1680_v51 = vpop.f32.mrb[2].mxu1  ;;  %v1623_v52 = vpop.f32.mrb[3].mxu0 }
  0xfa   :  { %v1624_v53 = vadd.f32 %v1623_v52, %v1622_v49  ;;  %v1681_v54 = vpop.f32.mrb[3].mxu1 }
  0xfb   :  { %v2282_v55 = vadd.f32 %v1679_v50, %v1621_v47  ;;  %v1682_v56 = vadd.f32 %v1681_v54, %v1680_v51 }
  0xfd   :  { %v2284_v57 = vadd.f32 %v1682_v56, %v1624_v53 }
  0xfe   :  { %v1625_v58 = vpop.f32.mrb[4].mxu0 }
  0xff   :  { %v1683_v59 = vpop.f32.mrb[4].mxu1  ;;  %v1626_v60 = vpop.f32.mrb[5].mxu0 }
 0x100   :  { %v1627_v61 = vadd.f32 %v1626_v60, %v1625_v58  ;;  %v1684_v62 = vpop.f32.mrb[5].mxu1  ;;  %v1628_v63 = vpop.f32.mrb[6].mxu0 }
 0x101   :  { %v1685_v0 = vadd.f32 %v1684_v62, %v1683_v59  ;;  %v1686_v1 = vpop.f32.mrb[6].mxu1  ;;  %v1629_v2 = vpop.f32.mrb[7].mxu0 }
 0x102   :  { %v1630_v3 = vadd.f32 %v1629_v2, %v1628_v63  ;;  %v1687_v4 = vpop.f32.mrb[7].mxu1 }
 0x103   :  { %v2286_v5 = vadd.f32 %v1685_v0, %v1627_v61  ;;  %v1688_v6 = vadd.f32 %v1687_v4, %v1686_v1 }
 0x105   :  { %v2288_v7 = vadd.f32 %v1688_v6, %v1630_v3 }
 0x106   :  { %v1631_v8 = vpop.f32.mrb[8].mxu0 }
 0x107   :  { %v1689_v9 = vpop.f32.mrb[8].mxu1  ;;  %v1632_v10 = vpop.f32.mrb[9].mxu0 }
 0x108   :  { %v1633_v11 = vadd.f32 %v1632_v10, %v1631_v8  ;;  %v1690_v12 = vpop.f32.mrb[9].mxu1  ;;  %v1634_v13 = vpop.f32.mrb[10].mxu0 }
 0x109   :  { %v1691_v14 = vadd.f32 %v1690_v12, %v1689_v9  ;;  %v1692_v15 = vpop.f32.mrb[10].mxu1  ;;  %v1635_v16 = vpop.f32.mrb[11].mxu0 }
 0x10a   :  { %v1636_v17 = vadd.f32 %v1635_v16, %v1634_v13  ;;  %v1693_v18 = vpop.f32.mrb[11].mxu1 }
 0x10b   :  { %v2290_v19 = vadd.f32 %v1691_v14, %v1633_v11  ;;  %v1694_v20 = vadd.f32 %v1693_v18, %v1692_v15 }
 0x10d   :  { %v2292_v21 = vadd.f32 %v1694_v20, %v1636_v17 }
 0x10e   :  { %v1637_v22 = vpop.f32.mrb[12].mxu0 }
 0x10f   :  { %v1695_v23 = vpop.f32.mrb[12].mxu1  ;;  %v1638_v24 = vpop.f32.mrb[13].mxu0 }
 0x110   :  { %v1639_v25 = vadd.f32 %v1638_v24, %v1637_v22  ;;  %v1696_v26 = vpop.f32.mrb[13].mxu1  ;;  %v1640_v27 = vpop.f32.mrb[14].mxu0 }
 0x111   :  { %v1697_v28 = vadd.f32 %v1696_v26, %v1695_v23  ;;  %v1698_v29 = vpop.f32.mrb[14].mxu1  ;;  %v1641_v30 = vpop.f32.mrb[15].mxu0 }
 0x112   :  { %v1642_v31 = vadd.f32 %v1641_v30, %v1640_v27  ;;  %v1699_v32 = vpop.f32.mrb[15].mxu1 }
 0x113   :  { %v2294_v33 = vadd.f32 %v1697_v28, %v1639_v25  ;;  %v1700_v34 = vadd.f32 %v1699_v32, %v1698_v29 }
 0x115   :  { %v2296_v35 = vadd.f32 %v1700_v34, %v1642_v31 }
 0x116   :  { %v1643_v36 = vpop.f32.mrb[16].mxu0 }
 0x117   :  { %v1701_v37 = vpop.f32.mrb[16].mxu1  ;;  %v1644_v38 = vpop.f32.mrb[17].mxu0 }
 0x118   :  { %v1645_v39 = vadd.f32 %v1644_v38, %v1643_v36  ;;  %v1702_v40 = vpop.f32.mrb[17].mxu1  ;;  %v1646_v41 = vpop.f32.mrb[18].mxu0 }
 0x119   :  { %v1703_v42 = vadd.f32 %v1702_v40, %v1701_v37  ;;  %v1704_v43 = vpop.f32.mrb[18].mxu1  ;;  %v1647_v44 = vpop.f32.mrb[19].mxu0 }
 0x11a   :  { %v1648_v45 = vadd.f32 %v1647_v44, %v1646_v41  ;;  %v1705_v46 = vpop.f32.mrb[19].mxu1 }
 0x11b   :  { %v2298_v47 = vadd.f32 %v1703_v42, %v1645_v39  ;;  %v1706_v48 = vadd.f32 %v1705_v46, %v1704_v43 }
 0x11d   :  { %v2300_v49 = vadd.f32 %v1706_v48, %v1648_v45 }
 0x11e   :  { %v1649_v50 = vpop.f32.mrb[20].mxu0 }
 0x11f   :  { %v1707_v51 = vpop.f32.mrb[20].mxu1  ;;  %v1650_v52 = vpop.f32.mrb[21].mxu0 }
 0x120   :  { %v1651_v53 = vadd.f32 %v1650_v52, %v1649_v50  ;;  %v1708_v54 = vpop.f32.mrb[21].mxu1  ;;  %v1652_v56 = vpop.f32.mrb[22].mxu0 }
 0x121   :  { %v1709_v58 = vadd.f32 %v1708_v54, %v1707_v51  ;;  %v1710_v59 = vpop.f32.mrb[22].mxu1  ;;  %v1653_v60 = vpop.f32.mrb[23].mxu0 }
 0x122   :  { %v1654_v61 = vadd.f32 %v1653_v60, %v1652_v56  ;;  %v1711_v62 = vpop.f32.mrb[23].mxu1 }
 0x123   :  { %v2302_v63 = vadd.f32 %v1709_v58, %v1651_v53  ;;  %v1712_v0 = vadd.f32 %v1711_v62, %v1710_v59 }
 0x125   :  { %v2304_v1 = vadd.f32 %v1712_v0, %v1654_v61 }
 0x126   :  { %v1655_v2 = vpop.f32.mrb[24].mxu0 }
 0x127   :  { %v1713_v3 = vpop.f32.mrb[24].mxu1  ;;  %v1656_v4 = vpop.f32.mrb[25].mxu0 }
 0x128   :  { %v1657_v6 = vadd.f32 %v1656_v4, %v1655_v2  ;;  %v1714_v8 = vpop.f32.mrb[25].mxu1  ;;  %v1658_v9 = vpop.f32.mrb[26].mxu0 }
 0x129   :  { %v1715_v10 = vadd.f32 %v1714_v8, %v1713_v3  ;;  %v1716_v11 = vpop.f32.mrb[26].mxu1  ;;  %v1659_v12 = vpop.f32.mrb[27].mxu0 }
 0x12a   :  { %v1717_v13 = vpop.f32.mrb[27].mxu1 }
 0x12b   :  { %v2306_v14 = vadd.f32 %v1715_v10, %v1657_v6 }
 0x12e   :  { %v1735_v15 = vpop.f32.mrb[28].mxu0 }
 0x12f   :  { %v1793_v16 = vpop.f32.mrb[28].mxu1  ;;  %v1736_v17 = vpop.f32.mrb[29].mxu0 }
 0x130   :  { %v1737_v18 = vadd.f32 %v1736_v17, %v1735_v15  ;;  %v1794_v20 = vpop.f32.mrb[29].mxu1  ;;  %v1738_v22 = vpop.f32.mrb[30].mxu0 }
 0x131   :  { %v1795_v23 = vadd.f32 %v1794_v20, %v1793_v16  ;;  %v1796_v24 = vpop.f32.mrb[30].mxu1  ;;  %v1739_v25 = vpop.f32.mrb[31].mxu0 }
 0x132   :  { %v1061_v26 = vadd.f32 %v1737_v18, %v2282_v55  ;;  %v1740_v27 = vadd.f32 %v1739_v25, %v1738_v22  ;;  %v1797_v28 = vpop.f32.mrb[31].mxu1 }
 0x133   :  { %v1798_v29 = vadd.f32 %v1797_v28, %v1796_v24 }
 0x134   :  { %v2309_v30 = vadd.f32 %v1795_v23, %v1061_v26  ;;  %v1064_v31 = vadd.f32 %v1740_v27, %v2284_v57 }
 0x136   :  { %v2312_v32 = vadd.f32 %v1798_v29, %v1064_v31  ;;  %v1741_v34 = vpop.f32.mrb[32].mxu0 }
 0x137   :  { %v1799_v36 = vpop.f32.mrb[32].mxu1  ;;  %v1742_v37 = vpop.f32.mrb[33].mxu0 }
 0x138   :  { %v1202_v38 = vadd.f32 %v2312_v32, %v2309_v30  ;;  %v1743_v39 = vadd.f32 %v1742_v37, %v1741_v34  ;;  %v1800_v40 = vpop.f32.mrb[33].mxu1  ;;  %v1744_v41 = vpop.f32.mrb[34].mxu0 }
 0x139   :  { %v1801_v42 = vadd.f32 %v1800_v40, %v1799_v36  ;;  %v1802_v55 = vpop.f32.mrb[34].mxu1  ;;  %v1745_v43 = vpop.f32.mrb[35].mxu0 }
 0x13a   :  { %v1069_v44 = vadd.f32 %v1743_v39, %v2286_v5  ;;  %v1746_v45 = vadd.f32 %v1745_v43, %v1744_v41  ;;  %v1803_v46 = vpop.f32.mrb[35].mxu1 }
 0x13b   :  { %v1804_v48 = vadd.f32 %v1803_v46, %v1802_v55 }
 0x13c   :  { %v2317_v57 = vadd.f32 %v1801_v42, %v1069_v44  ;;  %v1072_v50 = vadd.f32 %v1746_v45, %v2288_v7 }
 0x13e   :  { %v1203_v51 = vadd.f32 %v1202_v38, %v2317_v57  ;;  %v2321_v52 = vadd.f32 %v1804_v48, %v1072_v50  ;;  %v1747_v53 = vpop.f32.mrb[36].mxu0 }
 0x13f   :  { %v1805_v54 = vpop.f32.mrb[36].mxu1  ;;  %v1748_v56 = vpop.f32.mrb[37].mxu0 }
 0x140   :  { %v1204_v58 = vadd.f32 %v1203_v51, %v2321_v52  ;;  %v1749_v59 = vadd.f32 %v1748_v56, %v1747_v53  ;;  %v1806_v60 = vpop.f32.mrb[37].mxu1  ;;  %v1750_v61 = vpop.f32.mrb[38].mxu0 }
 0x141   :  { %v1807_v5 = vadd.f32 %v1806_v60, %v1805_v54  ;;  %v1808_v62 = vpop.f32.mrb[38].mxu1  ;;  %v1751_v0 = vpop.f32.mrb[39].mxu0 }
 0x142   :  { %v1077_v2 = vadd.f32 %v1749_v59, %v2290_v19  ;;  %v1752_v3 = vadd.f32 %v1751_v0, %v1750_v61  ;;  %v1809_v4 = vpop.f32.mrb[39].mxu1 }
 0x143   :  { %v1810_v7 = vadd.f32 %v1809_v4, %v1808_v62 }
 0x144   :  { %v2325_v6 = vadd.f32 %v1807_v5, %v1077_v2  ;;  %v1080_v8 = vadd.f32 %v1752_v3, %v2292_v21 }
 0x146   :  { %v1205_v9 = vadd.f32 %v1204_v58, %v2325_v6  ;;  %v2329_v10 = vadd.f32 %v1810_v7, %v1080_v8  ;;  %v1753_v11 = vpop.f32.mrb[40].mxu0 }
 0x147   :  { %v1811_v12 = vpop.f32.mrb[40].mxu1  ;;  %v1754_v13 = vpop.f32.mrb[41].mxu0 }
 0x148   :  { %v1206_v15 = vadd.f32 %v1205_v9, %v2329_v10  ;;  %v1755_v16 = vadd.f32 %v1754_v13, %v1753_v11  ;;  %v1812_v17 = vpop.f32.mrb[41].mxu1  ;;  %v1756_v18 = vpop.f32.mrb[42].mxu0 }
 0x149   :  { %v1813_v19 = vadd.f32 %v1812_v17, %v1811_v12  ;;  %v1814_v20 = vpop.f32.mrb[42].mxu1  ;;  %v1757_v22 = vpop.f32.mrb[43].mxu0 }
 0x14a   :  { %v1085_v23 = vadd.f32 %v1755_v16, %v2294_v33  ;;  %v1758_v24 = vadd.f32 %v1757_v22, %v1756_v18  ;;  %v1815_v25 = vpop.f32.mrb[43].mxu1 }
 0x14b   :  { %v1816_v21 = vadd.f32 %v1815_v25, %v1814_v20 }
 0x14c   :  { %v2333_v26 = vadd.f32 %v1813_v19, %v1085_v23  ;;  %v1088_v27 = vadd.f32 %v1758_v24, %v2296_v35 }
 0x14e   :  { %v1207_v28 = vadd.f32 %v1206_v15, %v2333_v26  ;;  %v2337_v29 = vadd.f32 %v1816_v21, %v1088_v27  ;;  %v1759_v31 = vpop.f32.mrb[44].mxu0 }
 0x14f   :  { %v1817_v34 = vpop.f32.mrb[44].mxu1  ;;  %v1760_v36 = vpop.f32.mrb[45].mxu0 }
 0x150   :  { %v1208_v37 = vadd.f32 %v1207_v28, %v2337_v29  ;;  %v1761_v38 = vadd.f32 %v1760_v36, %v1759_v31  ;;  %v1818_v39 = vpop.f32.mrb[45].mxu1  ;;  %v1762_v40 = vpop.f32.mrb[46].mxu0 }
 0x151   :  { %v1819_v33 = vadd.f32 %v1818_v39, %v1817_v34  ;;  %v1820_v41 = vpop.f32.mrb[46].mxu1  ;;  %v1763_v42 = vpop.f32.mrb[47].mxu0 }
 0x152   :  { %v1093_v55 = vadd.f32 %v1761_v38, %v2298_v47  ;;  %v1764_v43 = vadd.f32 %v1763_v42, %v1762_v40  ;;  %v1821_v44 = vpop.f32.mrb[47].mxu1 }
 0x153   :  { %v1822_v35 = vadd.f32 %v1821_v44, %v1820_v41 }
 0x154   :  { %v1181_v45 = vadd.f32 %v1819_v33, %v1093_v55  ;;  %v1096_v46 = vadd.f32 %v1764_v43, %v2300_v49 }
 0x156   :  { %v1209_v48 = vadd.f32 %v1208_v37, %v1181_v45  ;;  %v1184_v50 = vadd.f32 %v1822_v35, %v1096_v46  ;;  %v1765_v51 = vpop.f32.mrb[48].mxu0 }
 0x157   :  { %v1823_v53 = vpop.f32.mrb[48].mxu1  ;;  %v1766_v54 = vpop.f32.mrb[49].mxu0 }
 0x158   :  { %v1210_v56 = vadd.f32 %v1209_v48, %v1184_v50  ;;  %v1767_v58 = vadd.f32 %v1766_v54, %v1765_v51  ;;  %v1824_v59 = vpop.f32.mrb[49].mxu1  ;;  %v1768_v60 = vpop.f32.mrb[50].mxu0 }
 0x159   :  { %v1825_v61 = vadd.f32 %v1824_v59, %v1823_v53  ;;  %v1826_v5 = vpop.f32.mrb[50].mxu1  ;;  %v1769_v62 = vpop.f32.mrb[51].mxu0 }
 0x15a   :  { %v1101_v47 = vadd.f32 %v1767_v58, %v2302_v63  ;;  %v1770_v0 = vadd.f32 %v1769_v62, %v1768_v60  ;;  %v1827_v2 = vpop.f32.mrb[51].mxu1 }
 0x15b   :  { %v1828_v3 = vadd.f32 %v1827_v2, %v1826_v5 }
 0x15c   :  { %v1189_v4 = vadd.f32 %v1825_v61, %v1101_v47  ;;  %v1104_v49 = vadd.f32 %v1770_v0, %v2304_v1 }
 0x15e   :  { %v1211_v7 = vadd.f32 %v1210_v56, %v1189_v4  ;;  %v1192_v8 = vadd.f32 %v1828_v3, %v1104_v49  ;;  %v1771_v9 = vpop.f32.mrb[52].mxu0 }
 0x15f   :  { %v1829_v11 = vpop.f32.mrb[52].mxu1  ;;  %v1772_v12 = vpop.f32.mrb[53].mxu0 }
 0x160   :  { %v1212_v13 = vadd.f32 %v1211_v7, %v1192_v8  ;;  %v1773_v15 = vadd.f32 %v1772_v12, %v1771_v9  ;;  %v1830_v16 = vpop.f32.mrb[53].mxu1  ;;  %v1774_v17 = vpop.f32.mrb[54].mxu0 }
 0x161   :  { %v1831_v18 = vadd.f32 %v1830_v16, %v1829_v11  ;;  %v1832_v19 = vpop.f32.mrb[54].mxu1  ;;  %v1775_v20 = vpop.f32.mrb[55].mxu0  ;;  %v1274_v16 = vlaneseq }
 0x162   :  { %v1109_v63 = vadd.f32 %v1773_v15, %v2306_v14  ;;  %v1833_v22 = vpop.f32.mrb[55].mxu1 }
 0x163   :  { %v1275_v17 = vshrl.u32 %v1274_v16, 7 }
 0x164   :  { %v1197_v23 = vadd.f32 %v1831_v18, %v1109_v63  ;;  %v1271_v18 = vld [vmem:[%s2397_s2] sm:$0x1] }
 0x165   :  { %v1276_v19 = vsub.s32 0, %v1275_v17 }
 0x166   :  { %v1214_v24 = vsel %vm1213_vm0, %v1197_v23, 0.0 }
 0x167   :  { %v1215_v1 = vadd.f32 %v1214_v24, %v1212_v13 }
 0x169   :  { %v1216_v25 = vrot.slane %v1215_v1, 4 }
 0x16b   :  { %v1217_v21 = vadd.f32 %v1216_v25, %v1215_v1 }
 0x16d   :  { %v1218_v27 = vrot.slane %v1217_v21, 2 }
 0x16f   :  { %v1219_v28 = vadd.f32 %v1218_v27, %v1217_v21  ;;  %v1541_v21 = vld [vmem:[%s2398_s3] ss:$0 sm:$0xff] }
 0x171   :  { %v1220_v31 = vrot.slane %v1219_v28, 1 }
 0x173   :  { %v1221_v34 = vadd.f32 %v1220_v31, %v1219_v28 }
 0x175   :  { %v1222_v36 = vmul.f32 0.010204081, %v1221_v34 }
 0x177   :  { %v1223_v37 = vsub.f32 %v2309_v30, %v1222_v36  ;;  %v1224_v38 = vsub.f32 %v2312_v32, %v1222_v36  ;;  %v1225_v39 = vsub.f32 %v2317_v57, %v1222_v36  ;;  %v1226_v14 = vsub.f32 %v2321_v52, %v1222_v36 }
 0x178   :  { %v1227_v40 = vsub.f32 %v2325_v6, %v1222_v36  ;;  %v1228_v33 = vsub.f32 %v2329_v10, %v1222_v36  ;;  %v1229_v41 = vsub.f32 %v2333_v26, %v1222_v36  ;;  %v1230_v42 = vsub.f32 %v2337_v29, %v1222_v36 }
 0x179   :  { %v1231_v55 = vsub.f32 %v1181_v45, %v1222_v36  ;;  %v1232_v43 = vsub.f32 %v1184_v50, %v1222_v36  ;;  %v1233_v44 = vsub.f32 %v1189_v4, %v1222_v36  ;;  %v1234_v35 = vsub.f32 %v1192_v8, %v1222_v36 }
 0x17a   :  { %v1235_v46 = vsub.f32 %v1197_v23, %v1222_v36  ;;  %v1236_v30 = vmul.f32 %v1223_v37, %v1223_v37  ;;  %v1237_v48 = vmul.f32 %v1224_v38, %v1224_v38  ;;  %v1238_v32 = vmul.f32 %v1225_v39, %v1225_v39 }
 0x17b   :  { %v1239_v57 = vmul.f32 %v1226_v14, %v1226_v14  ;;  %v1240_v52 = vmul.f32 %v1227_v40, %v1227_v40  ;;  %v1241_v6 = vmul.f32 %v1228_v33, %v1228_v33  ;;  %v1242_v10 = vmul.f32 %v1229_v41, %v1229_v41 }
 0x17c   :  { %v1249_v51 = vadd.f32 %v1237_v48, %v1236_v30  ;;  %v1243_v26 = vmul.f32 %v1230_v42, %v1230_v42  ;;  %v1244_v29 = vmul.f32 %v1231_v55, %v1231_v55  ;;  %v1245_v50 = vmul.f32 %v1232_v43, %v1232_v43 }
 0x17d   :  { %v1246_v61 = vmul.f32 %v1233_v44, %v1233_v44  ;;  %v1248_v62 = vmul.f32 %v1235_v46, %v1235_v46  ;;  %v1247_v47 = vmul.f32 %v1234_v35, %v1234_v35 }
 0x17e   :  { %v1250_v53 = vadd.f32 %v1249_v51, %v1238_v32 }
 0x17f   :  { %v1260_v3 = vsel %vm1213_vm0, %v1248_v62, 0.0 }
 0x180   :  { %v1251_v54 = vadd.f32 %v1250_v53, %v1239_v57 }
 0x182   :  { %v1252_v56 = vadd.f32 %v1251_v54, %v1240_v52 }
 0x184   :  { %v1253_v58 = vadd.f32 %v1252_v56, %v1241_v6 }
 0x186   :  { %v1254_v59 = vadd.f32 %v1253_v58, %v1242_v10 }
 0x188   :  { %v1255_v45 = vadd.f32 %v1254_v59, %v1243_v26 }
 0x18a   :  { %v1256_v60 = vadd.f32 %v1255_v45, %v1244_v29 }
 0x18c   :  { %v1257_v5 = vadd.f32 %v1256_v60, %v1245_v50 }
 0x18e   :  { %v1258_v0 = vadd.f32 %v1257_v5, %v1246_v61 }
 0x190   :  { %v1259_v2 = vadd.f32 %v1258_v0, %v1247_v47 }
 0x192   :  { %v1261_v4 = vadd.f32 %v1260_v3, %v1259_v2 }
 0x194   :  { %v1262_v49 = vrot.slane %v1261_v4, 4 }
 0x196   :  { %v1263_v7 = vadd.f32 %v1262_v49, %v1261_v4 }
 0x198   :  { %v1264_v8 = vrot.slane %v1263_v7, 2 }
 0x19a   :  { %v1265_v9 = vadd.f32 %v1264_v8, %v1263_v7 }
 0x19c   :  { %v1266_v11 = vrot.slane %v1265_v9, 1 }
 0x19e   :  { %v1267_v12 = vadd.f32 %v1266_v11, %v1265_v9 }
 0x1a0   :  { %v1268_v13 = vmul.f32 0.010204081, %v1267_v12 }
 0x1a2   :  { %v1269_v15 = vadd.f32 1e-05, %v1268_v13 }
 0x1a4   :  { %1907 = vrsqrt.f32 %v1269_v15 }
 0x1ae   :  { %v1908_v20 = vpop.eup %1907 }
 0x1af   :  { %v1272_v63 = vmul.f32 %v1908_v20, %v1271_v18 }
 0x1b1   :  { %v1277_v22 = vrot.slane %v1272_v63, %v1276_v19 }
 0x1b3   :  { %v1279_v23 = vmul.f32 %v1277_v22, %v1223_v37  ;;  %v1280_v24 = vmul.f32 %v1277_v22, %v1224_v38  ;;  %v1281_v1 = vmul.f32 %v1277_v22, %v1225_v39  ;;  %v1282_v25 = vmul.f32 %v1277_v22, %v1226_v14 }
 0x1b4   :  { %v1283_v27 = vmul.f32 %v1277_v22, %v1227_v40  ;;  %v1284_v28 = vmul.f32 %v1277_v22, %v1228_v33  ;;  %v1285_v31 = vmul.f32 %v1277_v22, %v1229_v41  ;;  %v1286_v34 = vmul.f32 %v1277_v22, %v1230_v42 }
 0x1b5   :  { %v1287_v36 = vmul.f32 %v1277_v22, %v1231_v55  ;;  %v1288_v30 = vmul.f32 %v1277_v22, %v1232_v43  ;;  %v1289_v48 = vmul.f32 %v1277_v22, %v1233_v44  ;;  %v1290_v32 = vmul.f32 %v1277_v22, %v1234_v35 }
 0x1b6   :  { %v1291_v51 = vmul.f32 %v1277_v22, %v1235_v46  ;;  %v1299_v57 = vadd.f32 %v1541_v21, %v1279_v23  ;;  %v1300_v53 = vadd.f32 %v1541_v21, %v1280_v24  ;;  %v1301_v52 = vadd.f32 %v1541_v21, %v1281_v1 }
 0x1b7   :  { %v1302_v37 = vadd.f32 %v1541_v21, %v1282_v25  ;;  %v1303_v38 = vadd.f32 %v1541_v21, %v1283_v27  ;;  %v1304_v39 = vadd.f32 %v1541_v21, %v1284_v28  ;;  %v1305_v14 = vadd.f32 %v1541_v21, %v1285_v31 }
 0x1b8   :  { %v1306_v54 = vadd.f32 %v1541_v21, %v1286_v34  ;;  %v1307_v6 = vadd.f32 %v1541_v21, %v1287_v36  ;;  %v1308_v56 = vadd.f32 %v1541_v21, %v1288_v30  ;;  %v1309_v10 = vadd.f32 %v1541_v21, %v1289_v48 }
 0x1b9   :  { %v1310_v40 = vadd.f32 %v1541_v21, %v1290_v32  ;;  %v1311_v33 = vadd.f32 %v1541_v21, %v1291_v51  ;;  %vm1312_vm1 = vcmp.gt.f32.partialorder %v1299_v57, 0.0  ;;  %vm1313_vm2 = vcmp.gt.f32.partialorder %v1300_v53, 0.0 }
 0x1ba   :  { %vm1314_vm3 = vcmp.gt.f32.partialorder %v1301_v52, 0.0  ;;  %vm1315_vm4 = vcmp.gt.f32.partialorder %v1302_v37, 0.0  ;;  %vm1316_vm5 = vcmp.gt.f32.partialorder %v1303_v38, 0.0  ;;  %vm1317_vm6 = vcmp.gt.f32.partialorder %v1304_v39, 0.0 }
 0x1bb   :  { %vm1318_vm7 = vcmp.gt.f32.partialorder %v1305_v14, 0.0  ;;  %vm1319_vm8 = vcmp.gt.f32.partialorder %v1306_v54, 0.0  ;;  %vm1320_vm9 = vcmp.gt.f32.partialorder %v1307_v6, 0.0  ;;  %vm1321_vm10 = vcmp.gt.f32.partialorder %v1308_v56, 0.0 }
 0x1bc   :  { %vm1322_vm11 = vcmp.gt.f32.partialorder %v1309_v10, 0.0  ;;  %vm1323_vm12 = vcmp.gt.f32.partialorder %v1310_v40, 0.0  ;;  %vm1324_vm13 = vcmp.gt.f32.partialorder %v1311_v33, 0.0  ;;  %v1325_v41 = vmul.f32 0.2, %v1299_v57 }
 0x1bd   :  { %v1326_v42 = vmul.f32 0.2, %v1300_v53  ;;  %v1327_v55 = vmul.f32 0.2, %v1301_v52  ;;  %v1328_v43 = vmul.f32 0.2, %v1302_v37 }
 0x1be   :  { %v1329_v44 = vmul.f32 0.2, %v1303_v38  ;;  %v1330_v35 = vmul.f32 0.2, %v1304_v39  ;;  %v1331_v46 = vmul.f32 0.2, %v1305_v14  ;;  %v1338_v58 = vsel %vm1312_vm1, %v1299_v57, %v1325_v41 }
 0x1bf   :  { %v1332_v26 = vmul.f32 0.2, %v1306_v54  ;;  %v1333_v59 = vmul.f32 0.2, %v1307_v6  ;;  %v1334_v29 = vmul.f32 0.2, %v1308_v56  ;;  %v1339_v45 = vsel %vm1313_vm2, %v1300_v53, %v1326_v42 }
 0x1c0   :  { %v1335_v50 = vmul.f32 0.2, %v1309_v10  ;;  %v1336_v60 = vmul.f32 0.2, %v1310_v40  ;;  %v1337_v61 = vmul.f32 0.2, %v1311_v33  ;;  %v1340_v5 = vsel %vm1314_vm3, %v1301_v52, %v1327_v55 }
 0x1c1   :  { %v1341_v62 = vsel %vm1315_vm4, %v1302_v37, %v1328_v43  ;;  %v1342_v47 = vsel %vm1316_vm5, %v1303_v38, %v1329_v44  ;;  %v1343_v0 = vsel %vm1317_vm6, %v1304_v39, %v1330_v35  ;;  %v1344_v2 = vsel %vm1318_vm7, %v1305_v14, %v1331_v46 }
 0x1c2   :  { %v1345_v3 = vsel %vm1319_vm8, %v1306_v54, %v1332_v26  ;;  %v1346_v4 = vsel %vm1320_vm9, %v1307_v6, %v1333_v59  ;;  %v1347_v49 = vsel %vm1321_vm10, %v1308_v56, %v1334_v29  ;;  %v1348_v7 = vsel %vm1322_vm11, %v1309_v10, %v1335_v50 }
 0x1c3   :  { %v1349_v8 = vsel %vm1323_vm12, %v1310_v40, %v1336_v60  ;;  %v1350_v9 = vsel %vm1324_vm13, %v1311_v33, %v1337_v61  ;;  %v1571_v11 = vpack.c.bf16 %v1339_v45, %v1338_v58  ;;  %v1576_v12 = vpack.c.bf16 %v1341_v62, %v1340_v5 }
 0x1c4   :  { %v1567_v13 = vpack.c.bf16 %v1350_v9, %v1350_v9  ;;  %v1581_v15 = vpack.c.bf16 %v1343_v0, %v1342_v47  ;;  %v1586_v16 = vpack.c.bf16 %v1345_v3, %v1344_v2  ;;  %v1591_v17 = vpack.c.bf16 %v1347_v49, %v1346_v4 }
 0x1c5   :  { %1572 = vst [vmem:[%s2399_s4] sm:$0xff] %v1571_v11   ;;  %1598 = vst [vmem:[%s2399_s4 + $0x8] sm:$0xff] %v1576_v12   ;;  %v1596_v18 = vpack.c.bf16 %v1349_v8, %v1348_v7 }
 0x1c6   :  { %1599 = vst [vmem:[%s2399_s4 + $0x10] sm:$0xff] %v1581_v15   ;;  %1600 = vst [vmem:[%s2399_s4 + $0x18] sm:$0xff] %v1586_v16  }
 0x1c7   :  { %1601 = vst [vmem:[%s2399_s4 + $0x20] sm:$0xff] %v1591_v17   ;;  %1416 = vst [vmem:[%s2399_s4 + $0x30] sm:$0x1] %v1567_v13 }
 0x1c8   :  { %1602 = vst [vmem:[%s2399_s4 + $0x28] sm:$0xff] %v1596_v18  }

// kernel: discriminator_forward.5
= control target key start
LH: loop header
LB: loop body
LE: loop exit
PB: predicated region body
PF: predicated region fallthrough
CT: control target
= control target key end

     0   :  { %vm1435_vm8 = vcmask 261120   ;;  %vm1510_vm9 = vcmask 1041408   ;;  %vm1530_vm10 = vcmask 1024   ;;  %s2614_s1 = inlined_call_operand.vmem [shape: bf16[1152,256], index: 1, kind: input, shape index: {}]   ;;  %s2615_s0 = inlined_call_operand.vmem [shape: bf16[32,1152], index: 0, kind: input, shape index: {}]   ;;  %s2616_s2 = inlined_call_operand.vmem [shape: f32[1,256], index: 2, kind: input, shape index: {}]   ;;  %s2617_s3 = inlined_call_operand.vmem [shape: f32[1,256], index: 3, kind: input, shape index: {}]   ;;  %s2618_s4 = inlined_call_operand.vmem [shape: bf16[32,256], index: 4, kind: input, shape index: {}]   ;;  %s2619_s5 = inlined_call_operand.vmem [shape: bf16[2,32], index: 5, kind: input, shape index: {}]   ;;  %s2620_s6 = inlined_call_operand.<no memory space> [shape: f32[1,1], index: 6, kind: input, shape index: {}]   ;;  %s2621_s7 = inlined_call_operand.vmem [shape: f32[2,1], index: 7, kind: output, shape index: {}]  }
   0x1   :  { %v1760_v0 = vld [vmem:[%s2614_s1 + $0x4] ss:$8 sps:$4 sm:$0xff]   ;;  %v1764_v2 = vld [vmem:[%s2614_s1] ss:$8 sps:$4 sm:$0xff]   ;;  %v1766_v4 = vld [vmem:[%s2614_s1 + $0x14] ss:$8 sps:$4 sm:$0xff]  }
   0x2   :  { %v1762_v1 = vld [vmem:[%s2614_s1 + $0x204] ss:$8 sps:$4 sm:$0xff]   ;;  %1005 = vmatprep.subr.bf16.mxu1 %v1760_v0  ;;  %v1765_v3 = vld [vmem:[%s2614_s1 + $0x200] ss:$8 sps:$4 sm:$0xff]   ;;  %v1768_v5 = vld [vmem:[%s2614_s1 + $0x214] ss:$8 sps:$4 sm:$0xff]  }
   0x3   :  { %1111 = vmatprep.subr.bf16.mxu0 %v1762_v1  ;;  %1006 = vmatpush1.bf16.msra.mxu1 %v1764_v2  ;;  %v1770_v6 = vld [vmem:[%s2614_s1 + $0x10] ss:$8 sps:$4 sm:$0xff]   ;;  %v1772_v8 = vld [vmem:[%s2614_s1 + $0x24] ss:$8 sps:$4 sm:$0xff]   ;;  %v1776_v10 = vld [vmem:[%s2614_s1 + $0x20] ss:$8 sps:$4 sm:$0xff]  }
   0x4   :  { %1112 = vmatpush1.bf16.msra.mxu0 %v1765_v3  ;;  %1007 = vmatprep.subr.bf16.mxu1 %v1766_v4  ;;  %v1771_v7 = vld [vmem:[%s2614_s1 + $0x210] ss:$8 sps:$4 sm:$0xff]   ;;  %v1774_v9 = vld [vmem:[%s2614_s1 + $0x224] ss:$8 sps:$4 sm:$0xff]   ;;  %v1777_v11 = vld [vmem:[%s2614_s1 + $0x220] ss:$8 sps:$4 sm:$0xff]  }
   0x5   :  { %1113 = vmatprep.subr.bf16.mxu0 %v1768_v5  ;;  %v1778_v12 = vld [vmem:[%s2614_s1 + $0x34] ss:$8 sps:$4 sm:$0xff]   ;;  %v1782_v14 = vld [vmem:[%s2614_s1 + $0x30] ss:$8 sps:$4 sm:$0xff]   ;;  %v1784_v16 = vld [vmem:[%s2614_s1 + $0x44] ss:$8 sps:$4 sm:$0xff]  }
   0x6   :  { %v1780_v13 = vld [vmem:[%s2614_s1 + $0x234] ss:$8 sps:$4 sm:$0xff]   ;;  %v1783_v15 = vld [vmem:[%s2614_s1 + $0x230] ss:$8 sps:$4 sm:$0xff]   ;;  %v1786_v17 = vld [vmem:[%s2614_s1 + $0x244] ss:$8 sps:$4 sm:$0xff]  }
   0x7   :  { %1008 = vmatpush1.bf16.msra.mxu1 %v1770_v6  ;;  %v1788_v18 = vld [vmem:[%s2614_s1 + $0x40] ss:$8 sps:$4 sm:$0xff]   ;;  %v1790_v20 = vld [vmem:[%s2614_s1 + $0x54] ss:$8 sps:$4 sm:$0xff]   ;;  %v1794_v22 = vld [vmem:[%s2614_s1 + $0x50] ss:$8 sps:$4 sm:$0xff]  }
   0x8   :  { %1114 = vmatpush1.bf16.msra.mxu0 %v1771_v7  ;;  %1009 = vmatprep.subr.bf16.mxu1 %v1772_v8  ;;  %v1789_v19 = vld [vmem:[%s2614_s1 + $0x240] ss:$8 sps:$4 sm:$0xff]   ;;  %v1792_v21 = vld [vmem:[%s2614_s1 + $0x254] ss:$8 sps:$4 sm:$0xff]   ;;  %v1795_v23 = vld [vmem:[%s2614_s1 + $0x250] ss:$8 sps:$4 sm:$0xff]  }
   0x9   :  { %1115 = vmatprep.subr.bf16.mxu0 %v1774_v9  ;;  %v1796_v24 = vld [vmem:[%s2614_s1 + $0x64] ss:$8 sps:$4 sm:$0xff]   ;;  %v1800_v26 = vld [vmem:[%s2614_s1 + $0x60] ss:$8 sps:$4 sm:$0xff]   ;;  %v1802_v28 = vld [vmem:[%s2614_s1 + $0x74] ss:$8 sps:$4 sm:$0xff]  }
   0xa   :  { %v1798_v25 = vld [vmem:[%s2614_s1 + $0x264] ss:$8 sps:$4 sm:$0xff]   ;;  %v1801_v27 = vld [vmem:[%s2614_s1 + $0x260] ss:$8 sps:$4 sm:$0xff]   ;;  %v1804_v29 = vld [vmem:[%s2614_s1 + $0x274] ss:$8 sps:$4 sm:$0xff]  }
   0xb   :  { %1010 = vmatpush1.bf16.msra.mxu1 %v1776_v10  ;;  %v1806_v30 = vld [vmem:[%s2614_s1 + $0x70] ss:$8 sps:$4 sm:$0xff]   ;;  %v1808_v32 = vld [vmem:[%s2614_s1 + $0x84] ss:$8 sps:$4 sm:$0xff]   ;;  %v1812_v34 = vld [vmem:[%s2614_s1 + $0x80] ss:$8 sps:$4 sm:$0xff]  }
   0xc   :  { %1116 = vmatpush1.bf16.msra.mxu0 %v1777_v11  ;;  %1011 = vmatprep.subr.bf16.mxu1 %v1778_v12  ;;  %v1807_v31 = vld [vmem:[%s2614_s1 + $0x270] ss:$8 sps:$4 sm:$0xff]   ;;  %v1810_v33 = vld [vmem:[%s2614_s1 + $0x284] ss:$8 sps:$4 sm:$0xff]   ;;  %v1813_v35 = vld [vmem:[%s2614_s1 + $0x280] ss:$8 sps:$4 sm:$0xff]  }
   0xd   :  { %1117 = vmatprep.subr.bf16.mxu0 %v1780_v13  ;;  %v1814_v36 = vld [vmem:[%s2614_s1 + $0x94] ss:$8 sps:$4 sm:$0xff]   ;;  %v1818_v38 = vld [vmem:[%s2614_s1 + $0x90] ss:$8 sps:$4 sm:$0xff]   ;;  %v1820_v40 = vld [vmem:[%s2614_s1 + $0xa4] ss:$8 sps:$4 sm:$0xff]  }
   0xe   :  { %v1816_v37 = vld [vmem:[%s2614_s1 + $0x294] ss:$8 sps:$4 sm:$0xff]   ;;  %v1819_v39 = vld [vmem:[%s2614_s1 + $0x290] ss:$8 sps:$4 sm:$0xff]   ;;  %v1822_v41 = vld [vmem:[%s2614_s1 + $0x2a4] ss:$8 sps:$4 sm:$0xff]  }
   0xf   :  { %1012 = vmatpush1.bf16.msra.mxu1 %v1782_v14  ;;  %v1824_v42 = vld [vmem:[%s2614_s1 + $0xa0] ss:$8 sps:$4 sm:$0xff]   ;;  %v1826_v44 = vld [vmem:[%s2614_s1 + $0xb4] ss:$8 sps:$4 sm:$0xff]   ;;  %v1830_v46 = vld [vmem:[%s2614_s1 + $0xb0] ss:$8 sps:$4 sm:$0xff]  }
  0x10   :  { %1118 = vmatpush1.bf16.msra.mxu0 %v1783_v15  ;;  %1013 = vmatprep.subr.bf16.mxu1 %v1784_v16  ;;  %v1825_v43 = vld [vmem:[%s2614_s1 + $0x2a0] ss:$8 sps:$4 sm:$0xff]   ;;  %v1828_v45 = vld [vmem:[%s2614_s1 + $0x2b4] ss:$8 sps:$4 sm:$0xff]   ;;  %v1831_v47 = vld [vmem:[%s2614_s1 + $0x2b0] ss:$8 sps:$4 sm:$0xff]  }
  0x11   :  { %1119 = vmatprep.subr.bf16.mxu0 %v1786_v17  ;;  %v1858_v48 = vld [vmem:[%s2615_s0 + $0x4] ss:$36 sps:$4 sm:$0xff]   ;;  %v1864_v51 = vld [vmem:[%s2615_s0 + $0x14] ss:$36 sps:$4 sm:$0xff]  }
  0x12   :  { %v1832_v49 = vld [vmem:[%s2614_s1 + $0xc4] ss:$8 sps:$4 sm:$0xff]   ;;  %1037 = vmatprep.mubr.bf16.mxu1 %v1858_v48  ;;  %v1836_v52 = vld [vmem:[%s2614_s1 + $0xc0] ss:$8 sps:$4 sm:$0xff]   ;;  %v1838_v54 = vld [vmem:[%s2614_s1 + $0xd4] ss:$8 sps:$4 sm:$0xff]   ;;  %1143 = vmatprep.mubr.bf16.mxu0 %v1864_v51 }
  0x13   :  { %1014 = vmatpush1.bf16.msra.mxu1 %v1788_v18  ;;  %v1834_v50 = vld [vmem:[%s2614_s1 + $0x2c4] ss:$8 sps:$4 sm:$0xff]   ;;  %v1837_v53 = vld [vmem:[%s2614_s1 + $0x2c0] ss:$8 sps:$4 sm:$0xff]   ;;  %v1840_v55 = vld [vmem:[%s2614_s1 + $0x2d4] ss:$8 sps:$4 sm:$0xff]  }
  0x14   :  { %1120 = vmatpush1.bf16.msra.mxu0 %v1789_v19  ;;  %1015 = vmatprep.subr.bf16.mxu1 %v1790_v20  ;;  %v1842_v56 = vld [vmem:[%s2614_s1 + $0xd0] ss:$8 sps:$4 sm:$0xff]   ;;  %v1844_v58 = vld [vmem:[%s2614_s1 + $0xe4] ss:$8 sps:$4 sm:$0xff]   ;;  %v1848_v60 = vld [vmem:[%s2614_s1 + $0xe0] ss:$8 sps:$4 sm:$0xff]  }
  0x15   :  { %1121 = vmatprep.subr.bf16.mxu0 %v1792_v21  ;;  %v1843_v57 = vld [vmem:[%s2614_s1 + $0x2d0] ss:$8 sps:$4 sm:$0xff]   ;;  %v1846_v59 = vld [vmem:[%s2614_s1 + $0x2e4] ss:$8 sps:$4 sm:$0xff]   ;;  %v1849_v61 = vld [vmem:[%s2614_s1 + $0x2e0] ss:$8 sps:$4 sm:$0xff]  }
  0x16   :  { %v1850_v62 = vld [vmem:[%s2614_s1 + $0xf4] ss:$8 sps:$4 sm:$0xff]   ;;  %v1854_v0 = vld [vmem:[%s2614_s1 + $0xf0] ss:$8 sps:$4 sm:$0xff]   ;;  %v1861_v2 = vld [vmem:[%s2614_s1 + $0x104] ss:$8 sps:$4 sm:$0xff]  }
  0x17   :  { %1016 = vmatpush1.bf16.msra.mxu1 %v1794_v22  ;;  %v1852_v63 = vld [vmem:[%s2614_s1 + $0x2f4] ss:$8 sps:$4 sm:$0xff]   ;;  %v1855_v1 = vld [vmem:[%s2614_s1 + $0x2f0] ss:$8 sps:$4 sm:$0xff]   ;;  %v1867_v3 = vld [vmem:[%s2614_s1 + $0x304] ss:$8 sps:$4 sm:$0xff]  }
  0x18   :  { %1122 = vmatpush1.bf16.msra.mxu0 %v1795_v23  ;;  %1017 = vmatprep.subr.bf16.mxu1 %v1796_v24  ;;  %v1856_v4 = vld [vmem:[%s2615_s0] ss:$36 sps:$4 sm:$0xff]   ;;  %v1862_v6 = vld [vmem:[%s2615_s0 + $0x10] ss:$36 sps:$4 sm:$0xff]  }
  0x19   :  { %1123 = vmatprep.subr.bf16.mxu0 %v1798_v25  ;;  %v1859_v5 = vld [vmem:[%s2614_s1 + $0x100] ss:$8 sps:$4 sm:$0xff]   ;;  %v1870_v8 = vld [vmem:[%s2614_s1 + $0x114] ss:$8 sps:$4 sm:$0xff]   ;;  %v1868_v10 = vld [vmem:[%s2614_s1 + $0x110] ss:$8 sps:$4 sm:$0xff]  }
  0x1a   :  { %v1865_v7 = vld [vmem:[%s2614_s1 + $0x300] ss:$8 sps:$4 sm:$0xff]   ;;  %v1873_v9 = vld [vmem:[%s2614_s1 + $0x314] ss:$8 sps:$4 sm:$0xff]   ;;  %v1871_v11 = vld [vmem:[%s2614_s1 + $0x310] ss:$8 sps:$4 sm:$0xff]  }
  0x1b   :  { %1018 = vmatpush1.bf16.msra.mxu1 %v1800_v26  ;;  %v1876_v12 = vld [vmem:[%s2614_s1 + $0x124] ss:$8 sps:$4 sm:$0xff]   ;;  %v1874_v14 = vld [vmem:[%s2614_s1 + $0x120] ss:$8 sps:$4 sm:$0xff]   ;;  %v1882_v16 = vld [vmem:[%s2614_s1 + $0x134] ss:$8 sps:$4 sm:$0xff]  }
  0x1c   :  { %1124 = vmatpush1.bf16.msra.mxu0 %v1801_v27  ;;  %1019 = vmatprep.subr.bf16.mxu1 %v1802_v28  ;;  %v1879_v13 = vld [vmem:[%s2614_s1 + $0x324] ss:$8 sps:$4 sm:$0xff]   ;;  %v1877_v15 = vld [vmem:[%s2614_s1 + $0x320] ss:$8 sps:$4 sm:$0xff]   ;;  %v1885_v17 = vld [vmem:[%s2614_s1 + $0x334] ss:$8 sps:$4 sm:$0xff]  }
  0x1d   :  { %1125 = vmatprep.subr.bf16.mxu0 %v1804_v29  ;;  %v1880_v18 = vld [vmem:[%s2614_s1 + $0x130] ss:$8 sps:$4 sm:$0xff]   ;;  %v1888_v20 = vld [vmem:[%s2614_s1 + $0x144] ss:$8 sps:$4 sm:$0xff]   ;;  %v1886_v22 = vld [vmem:[%s2614_s1 + $0x140] ss:$8 sps:$4 sm:$0xff]  }
  0x1e   :  { %v1883_v19 = vld [vmem:[%s2614_s1 + $0x330] ss:$8 sps:$4 sm:$0xff]   ;;  %v1891_v21 = vld [vmem:[%s2614_s1 + $0x344] ss:$8 sps:$4 sm:$0xff]   ;;  %v1889_v23 = vld [vmem:[%s2614_s1 + $0x340] ss:$8 sps:$4 sm:$0xff]  }
  0x1f   :  { %1020 = vmatpush1.bf16.msra.mxu1 %v1806_v30  ;;  %v1894_v24 = vld [vmem:[%s2614_s1 + $0x154] ss:$8 sps:$4 sm:$0xff]   ;;  %v1892_v26 = vld [vmem:[%s2614_s1 + $0x150] ss:$8 sps:$4 sm:$0xff]   ;;  %v1900_v28 = vld [vmem:[%s2614_s1 + $0x164] ss:$8 sps:$4 sm:$0xff]  }
  0x20   :  { %1126 = vmatpush1.bf16.msra.mxu0 %v1807_v31  ;;  %1021 = vmatprep.subr.bf16.mxu1 %v1808_v32  ;;  %v1897_v25 = vld [vmem:[%s2614_s1 + $0x354] ss:$8 sps:$4 sm:$0xff]   ;;  %v1895_v27 = vld [vmem:[%s2614_s1 + $0x350] ss:$8 sps:$4 sm:$0xff]   ;;  %v1950_v31 = vld [vmem:[%s2615_s0 + $0x48] ss:$36 sps:$4 sm:$0xff]  }
  0x21   :  { %1127 = vmatprep.subr.bf16.mxu0 %v1810_v33  ;;  %v1946_v29 = vld [vmem:[%s2615_s0 + $0x4c] ss:$36 sps:$4 sm:$0xff]   ;;  %v1948_v30 = vld [vmem:[%s2615_s0 + $0x5c] ss:$36 sps:$4 sm:$0xff]  }
  0x22   :  { %v1903_v32 = vld [vmem:[%s2614_s1 + $0x364] ss:$8 sps:$4 sm:$0xff]   ;;  %v1954_v33 = vld [vmem:[%s2615_s0 + $0x58] ss:$36 sps:$4 sm:$0xff]  }
  0x23   :  { %1022 = vmatpush1.bf16.msra.mxu1 %v1812_v34  ;;  %v1898_v34 = vld [vmem:[%s2614_s1 + $0x160] ss:$8 sps:$4 sm:$0xff]   ;;  %v1916_v48 = vld [vmem:[%s2614_s1 + $0x190] ss:$8 sps:$4 sm:$0xff]   ;;  %v1927_v51 = vld [vmem:[%s2614_s1 + $0x3a4] ss:$8 sps:$4 sm:$0xff]  }
  0x24   :  { %1128 = vmatpush1.bf16.msra.mxu0 %v1813_v35  ;;  %1023 = vmatprep.subr.bf16.mxu1 %v1814_v36  ;;  %v1901_v35 = vld [vmem:[%s2614_s1 + $0x360] ss:$8 sps:$4 sm:$0xff]   ;;  %v1906_v36 = vld [vmem:[%s2614_s1 + $0x174] ss:$8 sps:$4 sm:$0xff]  }
  0x25   :  { %1129 = vmatprep.subr.bf16.mxu0 %v1816_v37  ;;  %v1909_v37 = vld [vmem:[%s2614_s1 + $0x374] ss:$8 sps:$4 sm:$0xff]  }
  0x27   :  { %1024 = vmatpush1.bf16.msra.mxu1 %v1818_v38  ;;  %v1904_v38 = vld [vmem:[%s2614_s1 + $0x170] ss:$8 sps:$4 sm:$0xff]  }
  0x28   :  { %1130 = vmatpush1.bf16.msra.mxu0 %v1819_v39  ;;  %1025 = vmatprep.subr.bf16.mxu1 %v1820_v40  ;;  %v1907_v39 = vld [vmem:[%s2614_s1 + $0x370] ss:$8 sps:$4 sm:$0xff]   ;;  %v1912_v40 = vld [vmem:[%s2614_s1 + $0x184] ss:$8 sps:$4 sm:$0xff]  }
  0x29   :  { %1131 = vmatprep.subr.bf16.mxu0 %v1822_v41  ;;  %v1966_v41 = vld [vmem:[%s2615_s0 + $0xc] ss:$36 sps:$4 sm:$0xff]  }
  0x2b   :  { %1026 = vmatpush1.bf16.msra.mxu1 %v1824_v42  ;;  %v1915_v42 = vld [vmem:[%s2614_s1 + $0x384] ss:$8 sps:$4 sm:$0xff]  }
  0x2c   :  { %1132 = vmatpush1.bf16.msra.mxu0 %v1825_v43  ;;  %1027 = vmatprep.subr.bf16.mxu1 %v1826_v44  ;;  %v1969_v43 = vld [vmem:[%s2615_s0 + $0x1c] ss:$36 sps:$4 sm:$0xff]  }
  0x2d   :  { %1133 = vmatprep.subr.bf16.mxu0 %v1828_v45  ;;  %v1910_v44 = vld [vmem:[%s2614_s1 + $0x180] ss:$8 sps:$4 sm:$0xff]  }
  0x2e   :  { %v1913_v45 = vld [vmem:[%s2614_s1 + $0x380] ss:$8 sps:$4 sm:$0xff]  }
  0x2f   :  { %1028 = vmatpush1.bf16.msra.mxu1 %v1830_v46  ;;  %v1918_v46 = vld [vmem:[%s2614_s1 + $0x194] ss:$8 sps:$4 sm:$0xff]  }
  0x30   :  { %1134 = vmatpush1.bf16.msra.mxu0 %v1831_v47  ;;  %1029 = vmatprep.subr.bf16.mxu1 %v1832_v49  ;;  %v1921_v47 = vld [vmem:[%s2614_s1 + $0x394] ss:$8 sps:$4 sm:$0xff]   ;;  %v1919_v49 = vld [vmem:[%s2614_s1 + $0x390] ss:$8 sps:$4 sm:$0xff]  }
  0x31   :  { %1135 = vmatprep.subr.bf16.mxu0 %v1834_v50  ;;  %v1924_v50 = vld [vmem:[%s2614_s1 + $0x1a4] ss:$8 sps:$4 sm:$0xff]  }
  0x33   :  { %1030 = vmatpush1.bf16.msra.mxu1 %v1836_v52  ;;  %v1922_v52 = vld [vmem:[%s2614_s1 + $0x1a0] ss:$8 sps:$4 sm:$0xff]  }
  0x34   :  { %1136 = vmatpush1.bf16.msra.mxu0 %v1837_v53  ;;  %1031 = vmatprep.subr.bf16.mxu1 %v1838_v54  ;;  %v1925_v53 = vld [vmem:[%s2614_s1 + $0x3a0] ss:$8 sps:$4 sm:$0xff]   ;;  %v1930_v54 = vld [vmem:[%s2614_s1 + $0x1b4] ss:$8 sps:$4 sm:$0xff]  }
  0x35   :  { %1137 = vmatprep.subr.bf16.mxu0 %v1840_v55  ;;  %v1933_v55 = vld [vmem:[%s2614_s1 + $0x3b4] ss:$8 sps:$4 sm:$0xff]  }
  0x37   :  { %1032 = vmatpush1.bf16.msra.mxu1 %v1842_v56  ;;  %v1928_v56 = vld [vmem:[%s2614_s1 + $0x1b0] ss:$8 sps:$4 sm:$0xff]  }
  0x38   :  { %1138 = vmatpush1.bf16.msra.mxu0 %v1843_v57  ;;  %1033 = vmatprep.subr.bf16.mxu1 %v1844_v58  ;;  %v1931_v57 = vld [vmem:[%s2614_s1 + $0x3b0] ss:$8 sps:$4 sm:$0xff]   ;;  %v1936_v58 = vld [vmem:[%s2614_s1 + $0x1c4] ss:$8 sps:$4 sm:$0xff]  }
  0x39   :  { %1139 = vmatprep.subr.bf16.mxu0 %v1846_v59  ;;  %v1939_v59 = vld [vmem:[%s2614_s1 + $0x3c4] ss:$8 sps:$4 sm:$0xff]  }
  0x3b   :  { %1034 = vmatpush1.bf16.msra.mxu1 %v1848_v60  ;;  %v1934_v60 = vld [vmem:[%s2614_s1 + $0x1c0] ss:$8 sps:$4 sm:$0xff]  }
  0x3c   :  { %1140 = vmatpush1.bf16.msra.mxu0 %v1849_v61  ;;  %1035 = vmatprep.subr.bf16.mxu1 %v1850_v62  ;;  %v1937_v61 = vld [vmem:[%s2614_s1 + $0x3c0] ss:$8 sps:$4 sm:$0xff]   ;;  %v1942_v62 = vld [vmem:[%s2614_s1 + $0x1d4] ss:$8 sps:$4 sm:$0xff]  }
  0x3d   :  { %1141 = vmatprep.subr.bf16.mxu0 %v1852_v63  ;;  %v1945_v63 = vld [vmem:[%s2614_s1 + $0x3d4] ss:$8 sps:$4 sm:$0xff]  }
  0x3f   :  { %1036 = vmatpush1.bf16.msra.mxu1 %v1854_v0  ;;  %v1940_v0 = vld [vmem:[%s2614_s1 + $0x1d0] ss:$8 sps:$4 sm:$0xff]  }
  0x40   :  { %1142 = vmatpush1.bf16.msra.mxu0 %v1855_v1  ;;  %1058 = vmatprep.subr.bf16.mxu1 %v1861_v2  ;;  %v1943_v1 = vld [vmem:[%s2614_s1 + $0x3d0] ss:$8 sps:$4 sm:$0xff]   ;;  %v1953_v2 = vld [vmem:[%s2614_s1 + $0x1e4] ss:$8 sps:$4 sm:$0xff]  }
  0x41   :  { %1164 = vmatprep.subr.bf16.mxu0 %v1867_v3  ;;  %v1957_v3 = vld [vmem:[%s2614_s1 + $0x3e4] ss:$8 sps:$4 sm:$0xff]  }
  0x42   :  { %1038 = vmatmul.mubr.bf16.vlgmr.msra.gmra.mrb[0].mxu1 %v1856_v4  ;;  %v1951_v4 = vld [vmem:[%s2614_s1 + $0x1e0] ss:$8 sps:$4 sm:$0xff]  }
  0x43   :  { %1144 = vmatmul.mubr.bf16.vlgmr.msra.gmra.mrb[0].mxu0 %v1862_v6  ;;  %1059 = vmatpush1.bf16.msra.mxu1 %v1859_v5  ;;  %v1955_v5 = vld [vmem:[%s2614_s1 + $0x3e0] ss:$8 sps:$4 sm:$0xff]   ;;  %v1960_v6 = vld [vmem:[%s2614_s1 + $0x1f4] ss:$8 sps:$4 sm:$0xff]  }
  0x44   :  { %1165 = vmatpush1.bf16.msra.mxu0 %v1865_v7  ;;  %1060 = vmatprep.subr.bf16.mxu1 %v1870_v8  ;;  %v1963_v7 = vld [vmem:[%s2614_s1 + $0x3f4] ss:$8 sps:$4 sm:$0xff]   ;;  %v1958_v8 = vld [vmem:[%s2614_s1 + $0x1f0] ss:$8 sps:$4 sm:$0xff]  }
  0x45   :  { %1166 = vmatprep.subr.bf16.mxu0 %v1873_v9  ;;  %1047 = vmatprep.mubr.bf16.mxu1 %v1946_v29  ;;  %v1961_v9 = vld [vmem:[%s2614_s1 + $0x3f0] ss:$8 sps:$4 sm:$0xff]   ;;  %v1996_v29 = vld [vmem:[%s2614_s1 + $0x464] ss:$8 sps:$4 sm:$0xff]  }
  0x46   :  { %1153 = vmatprep.mubr.bf16.mxu0 %v1948_v30  ;;  %v1994_v30 = vld [vmem:[%s2614_s1 + $0x460] ss:$8 sps:$4 sm:$0xff]  }
  0x47   :  { %1061 = vmatpush1.bf16.msra.mxu1 %v1868_v10  ;;  %v1972_v10 = vld [vmem:[%s2614_s1 + $0x404] ss:$8 sps:$4 sm:$0xff]  }
  0x48   :  { %1167 = vmatpush1.bf16.msra.mxu0 %v1871_v11  ;;  %1062 = vmatprep.subr.bf16.mxu1 %v1876_v12  ;;  %v1964_v11 = vld [vmem:[%s2615_s0 + $0x8] ss:$36 sps:$4 sm:$0xff]   ;;  %v1967_v12 = vld [vmem:[%s2615_s0 + $0x18] ss:$36 sps:$4 sm:$0xff]  }
  0x49   :  { %1168 = vmatprep.subr.bf16.mxu0 %v1879_v13  ;;  %v1970_v13 = vld [vmem:[%s2614_s1 + $0x400] ss:$8 sps:$4 sm:$0xff]  }
  0x4a   :  { %1048 = vmatmul.mubr.bf16.gmra.mrb[4].mxu1 %v1950_v31  ;;  %v1999_v31 = vld [vmem:[%s2614_s1 + $0x474] ss:$8 sps:$4 sm:$0xff]  }
  0x4b   :  { %1063 = vmatpush1.bf16.msra.mxu1 %v1874_v14  ;;  %1154 = vmatmul.mubr.bf16.gmra.mrb[4].mxu0 %v1954_v33  ;;  %v1975_v14 = vld [vmem:[%s2614_s1 + $0x414] ss:$8 sps:$4 sm:$0xff]   ;;  %v2000_v33 = vld [vmem:[%s2615_s0 + $0x20] ss:$36 sps:$4 sm:$0xff]  }
  0x4c   :  { %1169 = vmatpush1.bf16.msra.mxu0 %v1877_v15  ;;  %1064 = vmatprep.subr.bf16.mxu1 %v1882_v16  ;;  %v1976_v15 = vld [vmem:[%s2615_s0 + $0x54] ss:$36 sps:$4 sm:$0xff]   ;;  %v1978_v16 = vld [vmem:[%s2615_s0 + $0x64] ss:$36 sps:$4 sm:$0xff]  }
  0x4d   :  { %1170 = vmatprep.subr.bf16.mxu0 %v1885_v17  ;;  %1090 = vmatprep.mubr.bf16.mxu1 %v1966_v41  ;;  %v1973_v17 = vld [vmem:[%s2614_s1 + $0x410] ss:$8 sps:$4 sm:$0xff]  }
  0x4e   :  { %1196 = vmatprep.mubr.bf16.mxu0 %v1969_v43 }
  0x4f   :  { %1065 = vmatpush1.bf16.msra.mxu1 %v1880_v18  ;;  %v1984_v18 = vld [vmem:[%s2614_s1 + $0x424] ss:$8 sps:$4 sm:$0xff]  }
  0x50   :  { %1171 = vmatpush1.bf16.msra.mxu0 %v1883_v19  ;;  %1066 = vmatprep.subr.bf16.mxu1 %v1888_v20  ;;  %v1980_v19 = vld [vmem:[%s2615_s0 + $0x50] ss:$36 sps:$4 sm:$0xff]   ;;  %v1981_v20 = vld [vmem:[%s2615_s0 + $0x60] ss:$36 sps:$4 sm:$0xff]  }
  0x51   :  { %1172 = vmatprep.subr.bf16.mxu0 %v1891_v21  ;;  %v1982_v21 = vld [vmem:[%s2614_s1 + $0x420] ss:$8 sps:$4 sm:$0xff]  }
  0x53   :  { %1067 = vmatpush1.bf16.msra.mxu1 %v1886_v22  ;;  %v1987_v22 = vld [vmem:[%s2614_s1 + $0x434] ss:$8 sps:$4 sm:$0xff]  }
  0x54   :  { %1173 = vmatpush1.bf16.msra.mxu0 %v1889_v23  ;;  %1068 = vmatprep.subr.bf16.mxu1 %v1894_v24  ;;  %v1985_v23 = vld [vmem:[%s2614_s1 + $0x430] ss:$8 sps:$4 sm:$0xff]   ;;  %v1990_v24 = vld [vmem:[%s2614_s1 + $0x444] ss:$8 sps:$4 sm:$0xff]  }
  0x55   :  { %1174 = vmatprep.subr.bf16.mxu0 %v1897_v25  ;;  %v2010_v25 = vmov 0  }
  0x57   :  { %1069 = vmatpush1.bf16.msra.mxu1 %v1892_v26  ;;  %v1988_v26 = vld [vmem:[%s2614_s1 + $0x440] ss:$8 sps:$4 sm:$0xff]  }
  0x58   :  { %1175 = vmatpush1.bf16.msra.mxu0 %v1895_v27  ;;  %1070 = vmatprep.subr.bf16.mxu1 %v1900_v28  ;;  %v1993_v27 = vld [vmem:[%s2614_s1 + $0x454] ss:$8 sps:$4 sm:$0xff]   ;;  %v1991_v28 = vld [vmem:[%s2614_s1 + $0x450] ss:$8 sps:$4 sm:$0xff]  }
  0x59   :  { %1176 = vmatprep.subr.bf16.mxu0 %v1903_v32  ;;  %v1997_v32 = vld [vmem:[%s2614_s1 + $0x470] ss:$8 sps:$4 sm:$0xff]  }
  0x5b   :  { %1071 = vmatpush1.bf16.msra.mxu1 %v1898_v34  ;;  %v2001_v34 = vld [vmem:[%s2615_s0 + $0x68] ss:$36 sps:$4 sm:$0xff]  }
  0x5c   :  { %1177 = vmatpush1.bf16.msra.mxu0 %v1901_v35  ;;  %1072 = vmatprep.subr.bf16.mxu1 %v1906_v36  ;;  %v2011_v35 = vmov 0.0  }
  0x5d   :  { %1178 = vmatprep.subr.bf16.mxu0 %v1909_v37 }
  0x5f   :  { %1073 = vmatpush1.bf16.msra.mxu1 %v1904_v38 }
  0x60   :  { %1179 = vmatpush1.bf16.msra.mxu0 %v1907_v39  ;;  %1074 = vmatprep.subr.bf16.mxu1 %v1912_v40 }
  0x61   :  { %1180 = vmatprep.subr.bf16.mxu0 %v1915_v42 }
  0x63   :  { %1075 = vmatpush1.bf16.msra.mxu1 %v1910_v44 }
  0x64   :  { %1181 = vmatpush1.bf16.msra.mxu0 %v1913_v45  ;;  %1076 = vmatprep.subr.bf16.mxu1 %v1918_v46 }
  0x65   :  { %1182 = vmatprep.subr.bf16.mxu0 %v1921_v47 }
  0x67   :  { %1077 = vmatpush1.bf16.msra.mxu1 %v1916_v48 }
  0x68   :  { %1183 = vmatpush1.bf16.msra.mxu0 %v1919_v49  ;;  %1078 = vmatprep.subr.bf16.mxu1 %v1924_v50 }
  0x69   :  { %1184 = vmatprep.subr.bf16.mxu0 %v1927_v51 }
  0x6b   :  { %1079 = vmatpush1.bf16.msra.mxu1 %v1922_v52 }
  0x6c   :  { %1185 = vmatpush1.bf16.msra.mxu0 %v1925_v53  ;;  %1080 = vmatprep.subr.bf16.mxu1 %v1930_v54 }
  0x6d   :  { %1186 = vmatprep.subr.bf16.mxu0 %v1933_v55 }
  0x6f   :  { %1081 = vmatpush1.bf16.msra.mxu1 %v1928_v56 }
  0x70   :  { %1187 = vmatpush1.bf16.msra.mxu0 %v1931_v57  ;;  %1082 = vmatprep.subr.bf16.mxu1 %v1936_v58 }
  0x71   :  { %1188 = vmatprep.subr.bf16.mxu0 %v1939_v59 }
  0x73   :  { %1083 = vmatpush1.bf16.msra.mxu1 %v1934_v60 }
  0x74   :  { %1189 = vmatpush1.bf16.msra.mxu0 %v1937_v61  ;;  %1084 = vmatprep.subr.bf16.mxu1 %v1942_v62 }
  0x75   :  { %1190 = vmatprep.subr.bf16.mxu0 %v1945_v63 }
  0x77   :  { %1085 = vmatpush1.bf16.msra.mxu1 %v1940_v0 }
  0x78   :  { %1191 = vmatpush1.bf16.msra.mxu0 %v1943_v1  ;;  %1086 = vmatprep.subr.bf16.mxu1 %v1953_v2 }
  0x79   :  { %1192 = vmatprep.subr.bf16.mxu0 %v1957_v3 }
  0x7b   :  { %1087 = vmatpush1.bf16.msra.mxu1 %v1951_v4 }
  0x7c   :  { %1193 = vmatpush1.bf16.msra.mxu0 %v1955_v5  ;;  %1088 = vmatprep.subr.bf16.mxu1 %v1960_v6 }
  0x7d   :  { %1194 = vmatprep.subr.bf16.mxu0 %v1963_v7 }
  0x7f   :  { %1089 = vmatpush1.bf16.msra.mxu1 %v1958_v8 }
  0x80   :  { %1195 = vmatpush1.bf16.msra.mxu0 %v1961_v9  ;;  %1709 = vmatprep.subr.bf16.mxu1 %v1972_v10 }
  0x81   :  { %1217 = vmatprep.subr.bf16.mxu0 %v1972_v10 }
  0x82   :  { %1091 = vmatmul.mubr.bf16.vlgmr.msra.gmra.mrb[0].mxu1 %v1964_v11 }
  0x83   :  { %1197 = vmatmul.mubr.bf16.vlgmr.msra.gmra.mrb[0].mxu0 %v1967_v12  ;;  %1717 = vmatpush1.bf16.msra.mxu1 %v1970_v13 }
  0x84   :  { %1218 = vmatpush1.bf16.msra.mxu0 %v1970_v13  ;;  %1710 = vmatprep.subr.bf16.mxu1 %v1975_v14 }
  0x85   :  { %1219 = vmatprep.subr.bf16.mxu0 %v1975_v14  ;;  %1100 = vmatprep.mubr.bf16.mxu1 %v1976_v15 }
  0x86   :  { %1206 = vmatprep.mubr.bf16.mxu0 %v1978_v16 }
  0x87   :  { %1718 = vmatpush1.bf16.msra.mxu1 %v1973_v17 }
  0x88   :  { %1220 = vmatpush1.bf16.msra.mxu0 %v1973_v17  ;;  %1711 = vmatprep.subr.bf16.mxu1 %v1984_v18 }
  0x89   :  { %1221 = vmatprep.subr.bf16.mxu0 %v1984_v18 }
  0x8a   :  { %1101 = vmatmul.mubr.bf16.gmra.mrb[4].mxu1 %v1980_v19 }
  0x8b   :  { %1207 = vmatmul.mubr.bf16.gmra.mrb[4].mxu0 %v1981_v20  ;;  %1719 = vmatpush1.bf16.msra.mxu1 %v1982_v21 }
  0x8c   :  { %1222 = vmatpush1.bf16.msra.mxu0 %v1982_v21  ;;  %1712 = vmatprep.subr.bf16.mxu1 %v1987_v22 }
  0x8d   :  { %1223 = vmatprep.subr.bf16.mxu0 %v1987_v22  ;;  %1249 = vmatprep.mubr.bf16.mxu0 %v2010_v25 }
  0x8e   :  { %1259 = vmatprep.mubr.bf16.mxu1 %v2010_v25 }
  0x8f   :  { %1720 = vmatpush1.bf16.msra.mxu1 %v1985_v23 }
  0x90   :  { %1224 = vmatpush1.bf16.msra.mxu0 %v1985_v23  ;;  %1713 = vmatprep.subr.bf16.mxu1 %v1990_v24 }
  0x91   :  { %1225 = vmatprep.subr.bf16.mxu0 %v1990_v24 }
  0x93   :  { %1721 = vmatpush1.bf16.msra.mxu1 %v1988_v26 }
  0x94   :  { %1226 = vmatpush1.bf16.msra.mxu0 %v1988_v26  ;;  %1714 = vmatprep.subr.bf16.mxu1 %v1993_v27 }
  0x95   :  { %1227 = vmatprep.subr.bf16.mxu0 %v1993_v27 }
  0x97   :  { %1722 = vmatpush1.bf16.msra.mxu1 %v1991_v28 }
  0x98   :  { %1228 = vmatpush1.bf16.msra.mxu0 %v1991_v28  ;;  %1715 = vmatprep.subr.bf16.mxu1 %v1996_v29 }
  0x99   :  { %1229 = vmatprep.subr.bf16.mxu0 %v1996_v29 }
  0x9b   :  { %1723 = vmatpush1.bf16.msra.mxu1 %v1994_v30 }
  0x9c   :  { %1230 = vmatpush1.bf16.msra.mxu0 %v1994_v30  ;;  %1716 = vmatprep.subr.bf16.mxu1 %v1999_v31 }
  0x9d   :  { %1231 = vmatprep.subr.bf16.mxu0 %v1999_v31 }
  0x9f   :  { %1724 = vmatpush1.bf16.msra.mxu1 %v1997_v32 }
  0xa0   :  { %1232 = vmatpush1.bf16.msra.mxu0 %v1997_v32 }
  0xa2   :  { %1260 = vmatmul.mubr.bf16.vlgmr.msra.gmra.mrb[8].mxu1 %v2001_v34 }
  0xa3   :  { %1250 = vmatmul.mubr.bf16.vlgmr.msra.gmra.mrb[0].mxu0 %v2000_v33  ;;  %1503 = vmatprep.mubr.f32.mxu1 %v2011_v35 }
 0x155   :  { %v1092_v36 = vpop.f32.mrb[0].mxu1 }
 0x156   :  { %v1094_v37 = vpop.f32.mrb[1].mxu1 }
 0x157   :  { %v1096_v38 = vpop.f32.mrb[2].mxu1 }
 0x158   :  { %v1098_v39 = vpop.f32.mrb[3].mxu1 }
 0x15d   :  { %v1102_v40 = vpop.f32.mrb[4].mxu1 }
 0x15e   :  { %v1208_v41 = vpop.f32.mrb[4].mxu0  ;;  %v1104_v43 = vpop.f32.mrb[5].mxu1 }
 0x15f   :  { %v1729_v42 = vadd.f32 %v1208_v41, %v1102_v40  ;;  %v1210_v44 = vpop.f32.mrb[5].mxu0  ;;  %v1106_v46 = vpop.f32.mrb[6].mxu1 }
 0x160   :  { %v1731_v45 = vadd.f32 %v1210_v44, %v1104_v43  ;;  %v1212_v47 = vpop.f32.mrb[6].mxu0  ;;  %v1108_v49 = vpop.f32.mrb[7].mxu1 }
 0x161   :  { %v1733_v48 = vadd.f32 %v1212_v47, %v1106_v46  ;;  %v1214_v50 = vpop.f32.mrb[7].mxu0 }
 0x162   :  { %v1735_v51 = vadd.f32 %v1214_v50, %v1108_v49 }
 0x175   :  { %v1261_v53 = vpop.f32.mrb[8].mxu1 }
 0x176   :  { %v1251_v52 = vpop.f32.mrb[0].mxu0  ;;  %v1730_v55 = vadd.f32 %v1729_v42, %v1261_v53  ;;  %v1263_v57 = vpop.f32.mrb[9].mxu1 }
 0x177   :  { %v1725_v54 = vadd.f32 %v1251_v52, %v1092_v36  ;;  %v1253_v56 = vpop.f32.mrb[1].mxu0  ;;  %v1732_v59 = vadd.f32 %v1731_v45, %v1263_v57  ;;  %v1265_v61 = vpop.f32.mrb[10].mxu1 }
 0x178   :  { %v1726_v58 = vadd.f32 %v1253_v56, %v1094_v37  ;;  %v1255_v60 = vpop.f32.mrb[2].mxu0  ;;  %v1734_v63 = vadd.f32 %v1733_v48, %v1265_v61  ;;  %v1267_v1 = vpop.f32.mrb[11].mxu1 }
 0x179   :  { %v1727_v62 = vadd.f32 %v1255_v60, %v1096_v38  ;;  %v1257_v0 = vpop.f32.mrb[3].mxu0  ;;  %v1736_v3 = vadd.f32 %v1735_v51, %v1267_v1 }
 0x17a   :  { %v1728_v2 = vadd.f32 %v1257_v0, %v1098_v39  ;;  %v1337_v0 = vlaneseq }
 0x17b   :  { %v1270_v4 = vadd.f32 %v1727_v62, %v1725_v54 }
 0x17c   :  { %v1279_v5 = vadd.f32 %v1728_v2, %v1726_v58 }
 0x17d   :  { %v1271_v6 = vadd.f32 %v1730_v55, %v1270_v4 }
 0x17e   :  { %v1280_v7 = vadd.f32 %v1732_v59, %v1279_v5 }
 0x17f   :  { %v1272_v8 = vadd.f32 %v1734_v63, %v1271_v6 }
 0x180   :  { %v1281_v9 = vadd.f32 %v1736_v3, %v1280_v7 }
 0x181   :  { %v1273_v10 = vrot.slane %v1272_v8, 4 }
 0x182   :  { %v1282_v11 = vrot.slane %v1281_v9, 4 }
 0x183   :  { %v1274_v12 = vadd.f32 %v1273_v10, %v1272_v8  ;;  %v1330_v8 = vld [vmem:[%s2616_s2] sm:$0x3] }
 0x184   :  { %v1283_v13 = vadd.f32 %v1282_v11, %v1281_v9 }
 0x185   :  { %v1275_v14 = vrot.slane %v1274_v12, 2 }
 0x186   :  { %v1284_v15 = vrot.slane %v1283_v13, 2 }
 0x187   :  { %v1276_v16 = vadd.f32 %v1275_v14, %v1274_v12  ;;  %v1369_v12 = vld [vmem:[%s2617_s3] sm:$0x3]  ;;  %v1414_v14 = vld [vmem:[%s2618_s4 + $0x8] sm:$0xff] }
 0x188   :  { %v1285_v17 = vadd.f32 %v1284_v15, %v1283_v13  ;;  %v1413_v13 = vld [vmem:[%s2618_s4] sm:$0xff] }
 0x189   :  { %v1277_v18 = vrot.slane %v1276_v16, 1 }
 0x18a   :  { %v1286_v19 = vrot.slane %v1285_v17, 1 }
 0x18b   :  { %v1278_v20 = vadd.f32 %v1277_v18, %v1276_v16  ;;  %v2586_v16 = vld [vmem:[%s2618_s4 + $0x10] sm:$0xff] }
 0x18c   :  { %v1287_v21 = vadd.f32 %v1286_v19, %v1285_v17  ;;  %v2591_v17 = vld [vmem:[%s2618_s4 + $0x18] sm:$0xff] }
 0x18d   :  { %v1288_v22 = vmul.f32 0.03125, %v1278_v20  ;;  %v1417_v20 = vunpack.c.l.bf16 %v1413_v13 }
 0x18e   :  { %v1289_v23 = vmul.f32 0.03125, %v1287_v21  ;;  %v1418_v21 = vunpack.c.h.bf16 %v1413_v13 }
 0x18f   :  { %v2539_v24 = vsub.f32 %v1725_v54, %v1288_v22  ;;  %v2541_v25 = vsub.f32 %v1727_v62, %v1288_v22  ;;  %v2543_v26 = vsub.f32 %v1730_v55, %v1288_v22  ;;  %v2545_v27 = vsub.f32 %v1734_v63, %v1288_v22 }
 0x190   :  { %v2547_v28 = vsub.f32 %v1726_v58, %v1289_v23  ;;  %v2549_v29 = vsub.f32 %v1728_v2, %v1289_v23  ;;  %v2551_v30 = vsub.f32 %v1732_v59, %v1289_v23  ;;  %v2553_v31 = vsub.f32 %v1736_v3, %v1289_v23 }
 0x191   :  { %v1298_v32 = vmul.f32 %v2539_v24, %v2539_v24  ;;  %v1300_v33 = vmul.f32 %v2541_v25, %v2541_v25  ;;  %v1302_v36 = vmul.f32 %v2543_v26, %v2543_v26  ;;  %v1304_v40 = vmul.f32 %v2545_v27, %v2545_v27 }
 0x192   :  { %v1299_v34 = vmul.f32 %v2547_v28, %v2547_v28  ;;  %v1301_v35 = vmul.f32 %v2549_v29, %v2549_v29  ;;  %v1303_v38 = vmul.f32 %v2551_v30, %v2551_v30  ;;  %v1305_v42 = vmul.f32 %v2553_v31, %v2553_v31 }
 0x193   :  { %v1306_v37 = vadd.f32 %v1300_v33, %v1298_v32  ;;  %v2012_v62 = vmov 1966171168   ;;  %v1338_v2 = vshrl.u32 %v1337_v0, 7  ;;  %v1419_v32 = vunpack.c.l.bf16 %v1414_v14 }
 0x194   :  { %v1315_v39 = vadd.f32 %v1301_v35, %v1299_v34  ;;  %v1335_v63 = vunpack.c.l.s4 %v2012_v62  ;;  %v1420_v33 = vunpack.c.h.bf16 %v1414_v14  ;;  %v1421_v34 = vunpack.c.l.bf16 %v2586_v16 }
 0x195   :  { %v1307_v41 = vadd.f32 %v1306_v37, %v1302_v36  ;;  %v1353_v10 = vsub.s32 0, %v1338_v2  ;;  %v1357_v11 = vsub.s32 1, %v1338_v2  ;;  %v1422_v35 = vunpack.c.h.bf16 %v2586_v16 }
 0x196   :  { %v1316_v43 = vadd.f32 %v1315_v39, %v1303_v38  ;;  %v1336_v1 = vunpack.c.0.s8 %v1335_v63  ;;  %v1423_v36 = vunpack.c.l.bf16 %v2591_v17  ;;  %v1424_v37 = vunpack.c.h.bf16 %v2591_v17 }
 0x197   :  { %v1308_v44 = vadd.f32 %v1307_v41, %v1304_v40  ;;  %v1374_v18 = vrot.slane %v1369_v12, %v1353_v10  ;;  %v1378_v19 = vrot.slane %v1369_v12, %v1357_v11  ;;  %v12_v12 = vstv %s2620_s6 }
 0x198   :  { %v1317_v45 = vadd.f32 %v1316_v43, %v1305_v42  ;;  %v1339_v4 = vsub.s32 %v1336_v1, %v1338_v2  ;;  %13 = vst [vmem:[#allocation2] sm:$0x1] %v12_v12 }
 0x199   :  { %v1309_v46 = vrot.slane %v1308_v44, 4 }
 0x19a   :  { %v1318_v47 = vrot.slane %v1317_v45, 4 }
 0x19b   :  { %v1310_v48 = vadd.f32 %v1309_v46, %v1308_v44 }
 0x19c   :  { %v1319_v49 = vadd.f32 %v1318_v47, %v1317_v45 }
 0x19d   :  { %v1311_v50 = vrot.slane %v1310_v48, 2 }
 0x19e   :  { %v1320_v51 = vrot.slane %v1319_v49, 2 }
 0x19f   :  { %v1312_v52 = vadd.f32 %v1311_v50, %v1310_v48 }
 0x1a0   :  { %v1321_v53 = vadd.f32 %v1320_v51, %v1319_v49 }
 0x1a1   :  { %v1313_v54 = vrot.slane %v1312_v52, 1 }
 0x1a2   :  { %v1322_v55 = vrot.slane %v1321_v53, 1 }
 0x1a3   :  { %v1314_v56 = vadd.f32 %v1313_v54, %v1312_v52 }
 0x1a4   :  { %v1323_v57 = vadd.f32 %v1322_v55, %v1321_v53 }
 0x1a5   :  { %v1324_v58 = vmul.f32 0.03125, %v1314_v56 }
 0x1a6   :  { %v1325_v59 = vmul.f32 0.03125, %v1323_v57 }
 0x1a7   :  { %v1326_v60 = vadd.f32 1e-05, %v1324_v58 }
 0x1a8   :  { %v1327_v61 = vadd.f32 1e-05, %v1325_v59 }
 0x1a9   :  { %2002 = vrsqrt.f32 %v1326_v60 }
 0x1aa   :  { %2004 = vrsqrt.f32 %v1327_v61 }
 0x1b3   :  { %v2003_v3 = vpop.eup %2002 }
 0x1b4   :  { %v2005_v5 = vpop.eup %2004 }
 0x1b5   :  { %v1333_v6 = vcombine.low %v2003_v3, %v2005_v5 }
 0x1b7   :  { %v1340_v7 = vrot.slane %v1333_v6, %v1339_v4 }
 0x1b9   :  { %v1347_v9 = vrot.slane %v1340_v7, %v1339_v4 }
 0x1bb   :  { %v1349_v15 = vmul.f32 %v1347_v9, %v1330_v8  ;;  %v1433_v9 = vld [vmem:[%s2619_s5] sm:$0x1] }
 0x1bd   :  { %v1354_v22 = vrot.slane %v1349_v15, %v1353_v10  ;;  %v1358_v23 = vrot.slane %v1349_v15, %v1357_v11  ;;  %v1434_v11 = vunpack.c.l.bf16 %v1433_v9 }
 0x1bf   :  { %v1368_v38 = vmul.f32 %v1358_v23, %v2553_v31  ;;  %v1362_v39 = vmul.f32 %v1358_v23, %v2547_v28  ;;  %v1364_v40 = vmul.f32 %v1358_v23, %v2549_v29  ;;  %v1361_v41 = vmul.f32 %v1354_v22, %v2539_v24 }
 0x1c0   :  { %v1363_v42 = vmul.f32 %v1354_v22, %v2541_v25  ;;  %v1366_v43 = vmul.f32 %v1358_v23, %v2551_v30  ;;  %v1365_v44 = vmul.f32 %v1354_v22, %v2543_v26  ;;  %v1367_v45 = vmul.f32 %v1354_v22, %v2545_v27 }
 0x1c1   :  { %v1388_v46 = vadd.f32 %v1378_v19, %v1368_v38  ;;  %v1382_v47 = vadd.f32 %v1378_v19, %v1362_v39  ;;  %v1384_v48 = vadd.f32 %v1378_v19, %v1364_v40  ;;  %v1381_v49 = vadd.f32 %v1374_v18, %v1361_v41 }
 0x1c2   :  { %v1383_v50 = vadd.f32 %v1374_v18, %v1363_v42  ;;  %v1386_v31 = vadd.f32 %v1378_v19, %v1366_v43  ;;  %v1385_v51 = vadd.f32 %v1374_v18, %v1365_v44  ;;  %v1387_v28 = vadd.f32 %v1374_v18, %v1367_v45  ;;  %v1699_v18 = vld [vmem:[#allocation2] ss:$0 sm:$0xff] }
 0x1c3   :  { %v1404_v52 = vmul.f32 0.2, %v1388_v46  ;;  %vm1390_vm0 = vcmp.gt.f32.partialorder %v1382_v47, 0.0  ;;  %vm1392_vm1 = vcmp.gt.f32.partialorder %v1384_v48, 0.0  ;;  %v1398_v24 = vmul.f32 0.2, %v1382_v47 }
 0x1c4   :  { %v1400_v29 = vmul.f32 0.2, %v1384_v48  ;;  %vm1389_vm2 = vcmp.gt.f32.partialorder %v1381_v49, 0.0  ;;  %vm1391_vm3 = vcmp.gt.f32.partialorder %v1383_v50, 0.0  ;;  %v1397_v25 = vmul.f32 0.2, %v1381_v49 }
 0x1c5   :  { %v1406_v30 = vsel %vm1390_vm0, %v1382_v47, %v1398_v24  ;;  %v1399_v26 = vmul.f32 0.2, %v1383_v50  ;;  %vm1394_vm4 = vcmp.gt.f32.partialorder %v1386_v31, 0.0  ;;  %vm1396_vm5 = vcmp.gt.f32.partialorder %v1388_v46, 0.0 }
 0x1c6   :  { %v1408_v27 = vsel %vm1392_vm1, %v1384_v48, %v1400_v29  ;;  %v1426_v53 = vmul.f32 %v1418_v21, %v1406_v30  ;;  %v1405_v54 = vsel %vm1389_vm2, %v1381_v49, %v1397_v25  ;;  %v1402_v55 = vmul.f32 0.2, %v1386_v31 }
 0x1c7   :  { %v1428_v56 = vmul.f32 %v1420_v33, %v1408_v27  ;;  %v1407_v57 = vsel %vm1391_vm3, %v1383_v50, %v1399_v26  ;;  %v1425_v58 = vmul.f32 %v1417_v20, %v1405_v54  ;;  %v1412_v59 = vsel %vm1396_vm5, %v1388_v46, %v1404_v52 }
 0x1c8   :  { %v1427_v60 = vmul.f32 %v1419_v32, %v1407_v57  ;;  %v1410_v61 = vsel %vm1394_vm4, %v1386_v31, %v1402_v55  ;;  %v1432_v62 = vmul.f32 %v1424_v37, %v1412_v59  ;;  %vm1393_vm6 = vcmp.gt.f32.partialorder %v1385_v51, 0.0 }
 0x1c9   :  { %v1701_v63 = vpack.c.bf16 %v1428_v56, %v1426_v53  ;;  %v1430_v0 = vmul.f32 %v1422_v35, %v1410_v61  ;;  %vm1395_vm7 = vcmp.gt.f32.partialorder %v1387_v28, 0.0  ;;  %v1401_v1 = vmul.f32 0.2, %v1385_v51 }
 0x1ca   :  { %v1703_v2 = vpack.c.bf16 %v1427_v60, %v1425_v58  ;;  %v1403_v3 = vmul.f32 0.2, %v1387_v28 }
 0x1cb   :  { %1702 = vmatprep.subr.bf16.mxu1 %v1701_v63  ;;  %v1705_v4 = vpack.c.bf16 %v1432_v62, %v1430_v0  ;;  %v1409_v5 = vsel %vm1393_vm6, %v1385_v51, %v1401_v1 }
 0x1cc   :  { %1704 = vmatpush1.bf16.msra.mxu1 %v1703_v2  ;;  %v1411_v6 = vsel %vm1395_vm7, %v1387_v28, %v1403_v3  ;;  %v1429_v7 = vmul.f32 %v1421_v34, %v1409_v5 }
 0x1cd   :  { %1706 = vmatprep.subr.bf16.mxu1 %v1705_v4  ;;  %v1431_v8 = vmul.f32 %v1423_v36, %v1411_v6 }
 0x1cf   :  { %v1707_v10 = vpack.c.bf16 %v1431_v8, %v1429_v7 }
 0x1d1   :  { %1708 = vmatpush1.bf16.msra.mxu1 %v1707_v10 }
 0x1d4   :  { %1698 = vmatmul.mubr.msk.f32.vlgmr.msra.gmra.mrb[12].mxu1 %vm1435_vm8, %v1434_v11 }
 0x2a7   :  { %v1505_v13 = vpop.f32.mrb[12].mxu1 }
 0x2a8   :  { %v1511_v14 = vsel %vm1510_vm9, %v1505_v13, 0.0  ;;  %v1507_v15 = vpop.f32.mrb[13].mxu1 }
 0x2a9   :  { %v1512_v16 = vsel %vm1510_vm9, %v1507_v15, 0.0 }
 0x2aa   :  { %v1513_v17 = vadd.f32 %v1512_v16, %v1511_v14 }
 0x2ac   :  { %1514 = vadd.xlane.f32.xlu0 %v1513_v17 }
 0x339   :  { %v1515_v19 = vpop.xlane.xlu0 %1514 }
 0x33a   :  { %v1523_v20 = vadd.f32 %v1699_v18, %v1515_v19 }
 0x33c   :  { %v1700_v21 = vmul.f32 -1.442695, %v1523_v20 }
 0x33e   :  { %2006 = vpow2.f32 %v1700_v21 }
 0x348   :  { %v2007_v22 = vpop.eup %2006 }
 0x349   :  { %v1527_v23 = vadd.f32 1.0, %v2007_v22 }
 0x34b   :  { %2008 = vrcp.f32 %v1527_v23 }
 0x355   :  { %v2009_v32 = vpop.eup %2008 }
 0x356   :  { %1531 = vst.msk [vmem:[%s2621_s7] sm:$0x3] %vm1530_vm10, %v2009_v32 }

</bundles_post_ra>
